<compile_context>
chip_gen: v6e
topology: v6e:2x2x1
jax: 0.10.0
libtpu: 0.0.40
codegen_flags: <defaults>
</compile_context>

<pallas_src>
import functools

import jax
import jax.numpy as jnp
from jax.experimental import pallas as pl
from jax.experimental.pallas import tpu as pltpu


N_DISTANCE = 32
MAX_DISTANCE = 20.0
MAX_RELATIVE_FEATURE = 32


def _round_up(x, m):
    return (x + m - 1) // m * m


# ---------------------------------------------------------------------------
# Fused Pallas kernel: RBF + PositionalEncodings linear + edge_embedding + LN
# ---------------------------------------------------------------------------
def _rna_edge_kernel(didx_ref, dist_ref, w_pe_ref, b_pe_ref, rep_ref, mu_ref,
                     w_epe_ref, w_erbf_ref, gamma_ref, beta_ref, o_ref,
                     *, inv_two_sigma_sq, ln_eps):
    tm = dist_ref.shape[0]
    n_pe_in = w_pe_ref.shape[0]          # 2*max_rel + 2 = 66

    # --- PositionalEncodings: one_hot(d) @ W_pe^T + b_pe (one-hot in-kernel) --
    d_idx = didx_ref[...]                                        # (tm, 1) int32
    iota = jax.lax.broadcasted_iota(jnp.int32, (tm, n_pe_in), 1)
    onehot = (iota == d_idx).astype(jnp.float32)                 # (tm, 66)
    pe = jnp.dot(onehot, w_pe_ref[...],
                 preferred_element_type=jnp.float32) + b_pe_ref[...]   # (tm, 16)

    # --- RBF featurization of gathered atom-pair distances ------------------
    # Replicate each of the 25 distances across the 32 RBF centers with a
    # small 0/1 matmul (MXU) instead of repeat/reshape across lanes.
    d_rep = jnp.dot(dist_ref[...], rep_ref[...],
                    preferred_element_type=jnp.float32)          # (tm, 800)
    diff = d_rep - mu_ref[...]
    rbf = jnp.exp(-(diff * diff) * inv_two_sigma_sq)             # (tm, 800)

    # --- edge_embedding on concat([pe, rbf]) as a split matmul (no concat) ---
    y = (jnp.dot(pe, w_epe_ref[...], preferred_element_type=jnp.float32)
         + jnp.dot(rbf, w_erbf_ref[...], preferred_element_type=jnp.float32))

    # --- norm_edges: LayerNorm over the feature dim --------------------------
    mean = jnp.mean(y, axis=-1, keepdims=True)
    cent = y - mean
    var = jnp.mean(cent * cent, axis=-1, keepdims=True)
    out = cent * jax.lax.rsqrt(var + ln_eps) * gamma_ref[...] + beta_ref[...]
    o_ref[...] = out.astype(o_ref.dtype)


def fused_edge_features(d_pos, dist_g, params, *, n_rbf=N_DISTANCE,
                        max_distance=MAX_DISTANCE, ln_eps=1e-5, tile_m=256):
    """d_pos: (L, K) int32 positional index; dist_g: (L, K, A*A) f32 distances."""
    L, K = d_pos.shape
    A2 = dist_g.shape[-1]
    w_pe_t = params["w_pe_t"].astype(jnp.float32)      # (66, pe_dim)
    b_pe = params["b_pe"].astype(jnp.float32)          # (pe_dim,)
    w_edge_t = params["w_edge_t"].astype(jnp.float32)  # (pe_dim + A2*n_rbf, E)
    gamma = params["ln_gamma"].astype(jnp.float32)     # (E,)
    beta = params["ln_beta"].astype(jnp.float32)       # (E,)

    n_pe_in, pe_dim = w_pe_t.shape
    E = w_edge_t.shape[1]
    F = A2 * n_rbf

    M = L * K
    d2 = d_pos.reshape(M, 1).astype(jnp.int32)
    x2 = dist_g.reshape(M, A2).astype(jnp.float32)

    # Big row tiles; pad rows instead of requiring M % tile_m == 0.
    tile_m = int(max(8, min(tile_m, _round_up(M, 8))))
    M_pad = _round_up(M, tile_m)
    if M_pad != M:
        d2 = jnp.pad(d2, ((0, M_pad - M), (0, 0)))
        x2 = jnp.pad(x2, ((0, M_pad - M), (0, 0)))

    sigma = max_distance / n_rbf
    mu_row = jnp.tile(jnp.arange(1, n_rbf + 1, dtype=jnp.float32) * sigma,
                      A2).reshape(1, F)
    rep = jnp.repeat(jnp.eye(A2, dtype=jnp.float32), n_rbf, axis=1)   # (A2, F)

    w_e_pe = w_edge_t[:pe_dim]       # (pe_dim, E)  -> consumes E_position
    w_e_rbf = w_edge_t[pe_dim:]      # (F, E)       -> consumes RBF features

    kernel = functools.partial(_rna_edge_kernel,
                               inv_two_sigma_sq=1.0 / (2.0 * sigma * sigma),
                               ln_eps=ln_eps)

    rows = lambda i: (i, 0)
    const = lambda i: (0, 0)   # constant index map: resident across the grid

    out = pl.pallas_call(
        kernel,
        out_shape=jax.ShapeDtypeStruct((M_pad, E), jnp.float32),
        grid_spec=pltpu.PrefetchScalarGridSpec(
            num_scalar_prefetch=0,
            grid=(M_pad // tile_m,),
            in_specs=[
                pl.BlockSpec((tile_m, 1), rows),        # positional index d
                pl.BlockSpec((tile_m, A2), rows),       # gathered distances
                pl.BlockSpec((n_pe_in, pe_dim), const),  # W_pe^T
                pl.BlockSpec((1, pe_dim), const),        # b_pe
                pl.BlockSpec((A2, F), const),            # replication matrix
                pl.BlockSpec((1, F), const),             # RBF centers mu
                pl.BlockSpec((pe_dim, E), const),        # W_edge[:pe_dim]
                pl.BlockSpec((F, E), const),             # W_edge[pe_dim:]
                pl.BlockSpec((1, E), const),             # LN gamma
                pl.BlockSpec((1, E), const),             # LN beta
            ],
            out_specs=pl.BlockSpec((tile_m, E), rows),
        ),
        compiler_params=pltpu.CompilerParams(
            dimension_semantics=("parallel",)),
    )(d2, x2, w_pe_t, b_pe.reshape(1, pe_dim), rep, mu_row,
      w_e_pe, w_e_rbf, gamma.reshape(1, E), beta.reshape(1, E))

    return out[:M].reshape(L, K, E)


# ---------------------------------------------------------------------------
# JAX glue matching the torch module (distances, top-k, gathers)
# ---------------------------------------------------------------------------
def _pairwise_atom_distances(xyz):
    L, A, _ = xyz.shape
    diff = xyz[:, None, :, None, :] - xyz[None, :, None, :, :]   # (L,L,A,A,3)
    return jnp.sqrt(jnp.sum(diff * diff, axis=-1)).reshape(L, L, A * A)


def _dist_topk(xyz, mask, topk, eps=1e-6):
    mask_f = mask.astype(jnp.float32)
    mask_2d = mask_f[:, None] * mask_f[None, :]
    c = xyz[:, 0]
    d = jnp.sqrt(jnp.sum((c[None, :, :] - c[:, None, :]) ** 2, axis=-1) + eps)
    d = d * mask_2d
    d_max = jnp.max(d, axis=-1, keepdims=True)
    d_adj = d + (1.0 - mask_2d) * d_max
    k = min(topk, xyz.shape[0])
    # TODO(synk): top-k neighbor selection has no clean Pallas TPU equivalent; kept in XLA.
    neg_vals, e_idx = jax.lax.top_k(-d_adj, k)
    return -neg_vals, e_idx


def _positional_index(residue_idx, chain_idx, e_idx, max_rel=MAX_RELATIVE_FEATURE):
    offset = residue_idx[:, None] - residue_idx[None, :]
    offset_g = jnp.take_along_axis(offset, e_idx, axis=1)
    chains_same = (chain_idx[:, None] == chain_idx[None, :]).astype(jnp.int32)
    e_chains = jnp.take_along_axis(chains_same, e_idx, axis=1)
    d_clip = jnp.clip(offset_g + max_rel, 0, 2 * max_rel)
    d_pos = d_clip * e_chains + (1 - e_chains) * (2 * max_rel + 1)
    return d_pos.astype(jnp.int32)


def rna_features_forward(xyz, chain_idx, residue_idx, mask, params, *, topk=30,
                         n_rbf=N_DISTANCE, max_distance=MAX_DISTANCE, tile_m=256):
    """Equivalent of RNAFeatures.forward: returns (edge_features, d_neighbor, e_idx)."""
    L, A, _ = xyz.shape
    dist_all = _pairwise_atom_distances(xyz)                    # (L, L, A*A)
    d_neighbor, e_idx = _dist_topk(xyz, mask, topk)
    K = e_idx.shape[1]
    # TODO(synk): data-dependent neighbor gather (gather_edges) stays in XLA.
    idx = jnp.broadcast_to(e_idx[:, :, None], (L, K, A * A))
    dist_g = jnp.take_along_axis(dist_all, idx, axis=1)         # (L, K, A*A)
    d_pos = _positional_index(residue_idx, chain_idx, e_idx)
    edge = fused_edge_features(d_pos, dist_g, params, n_rbf=n_rbf,
                               max_distance=max_distance, tile_m=tile_m)
    return edge, d_neighbor, e_idx


# ---------------------------------------------------------------------------
# Pure-JAX reference following the torch code path (full RBF, gather, concat)
# ---------------------------------------------------------------------------
def reference_forward(xyz, chain_idx, residue_idx, mask, params, *, topk=30,
                      n_rbf=N_DISTANCE, max_distance=MAX_DISTANCE, ln_eps=1e-5):
    L, A, _ = xyz.shape
    hi = jax.lax.Precision.HIGHEST
    dist_all = _pairwise_atom_distances(xyz)
    sigma = max_distance / n_rbf
    mu = jnp.arange(1, n_rbf + 1, dtype=jnp.float32) * sigma
    rbf = jnp.exp(-((dist_all[..., None] - mu) ** 2) / (2.0 * sigma * sigma))
    edge_full = rbf.reshape(L, L, A * A * n_rbf)
    d_neighbor, e_idx = _dist_topk(xyz, mask, topk)
    K = e_idx.shape[1]
    idx = jnp.broadcast_to(e_idx[:, :, None], (L, K, edge_full.shape[-1]))
    edge_g = jnp.take_along_axis(edge_full, idx, axis=1)
    d_pos = _positional_index(residue_idx, chain_idx, e_idx)
    onehot = jax.nn.one_hot(d_pos, params["w_pe_t"].shape[0], dtype=jnp.float32)
    e_position = jnp.dot(onehot, params["w_pe_t"], precision=hi) + params["b_pe"]
    cat = jnp.concatenate([e_position, edge_g], axis=-1)
    y = jnp.dot(cat, params["w_edge_t"], precision=hi)
    m = jnp.mean(y, axis=-1, keepdims=True)
    v = jnp.mean((y - m) ** 2, axis=-1, keepdims=True)
    out = (y - m) / jnp.sqrt(v + ln_eps) * params["ln_gamma"] + params["ln_beta"]
    return out, d_neighbor, e_idx


# ---------------------------------------------------------------------------
if __name__ == "__main__":
    # Small shapes consistent with the module: L residues, 5 atoms/residue
    # (-> 25 atom pairs * 32 RBF = 800 edge dims), pe_dim=16, edge_features=128.
    L, A = 16, 5
    edge_features = 128
    pe_dim = 16
    n_rbf = N_DISTANCE
    topk = 8
    max_rel = MAX_RELATIVE_FEATURE
    edge_in = pe_dim + (A * A) * n_rbf      # 16 + 800 = 816

    key = jax.random.PRNGKey(0)
    k_xyz, k_wpe, k_bpe, k_we, k_g, k_b = jax.random.split(key, 6)

    xyz = jax.random.normal(k_xyz, (L, A, 3), dtype=jnp.float32) * 5.0
    mask = jnp.ones((L,), dtype=jnp.float32)

    # Two chains of 8 residues each (host-side chain/residue bookkeeping of the
    # featurizer, done as plain data here).
    chain_idx = jnp.array([0] * 8 + [1] * 8, dtype=jnp.int32)
    residue_idx = jnp.array(list(range(8)) + list(range(8)), dtype=jnp.int32)

    params = {
        # PositionalEncodings.linear: weight (pe_dim, 66) stored transposed.
        "w_pe_t": jax.random.normal(k_wpe, (2 * max_rel + 2, pe_dim), jnp.float32) * 0.1,
        "b_pe": jax.random.normal(k_bpe, (pe_dim,), jnp.float32) * 0.1,
        # edge_embedding (bias-free): weight (E, 816) stored transposed.
        "w_edge_t": jax.random.normal(k_we, (edge_in, edge_features), jnp.float32) * 0.05,
        # norm_edges LayerNorm affine params.
        "ln_gamma": 1.0 + 0.1 * jax.random.normal(k_g, (edge_features,), jnp.float32),
        "ln_beta": 0.1 * jax.random.normal(k_b, (edge_features,), jnp.float32),
    }

    edge, d_neighbor, e_idx = rna_features_forward(
        xyz, chain_idx, residue_idx, mask, params, topk=topk, n_rbf=n_rbf)
    edge = jax.block_until_ready(edge)

    edge_ref, d_nb_ref, e_idx_ref = reference_forward(
        xyz, chain_idx, residue_idx, mask, params, topk=topk, n_rbf=n_rbf)

    K = min(topk, L)
    assert edge.shape == (L, K, edge_features)
    assert jnp.array_equal(e_idx, e_idx_ref)
    assert jnp.allclose(d_neighbor, d_nb_ref, atol=1e-5, rtol=1e-5)
    assert jnp.allclose(edge, edge_ref, atol=1e-3, rtol=1e-3), (
        float(jnp.max(jnp.abs(edge - edge_ref))))

    print("KERNEL_OK")
</pallas_src>

<mosaic_0001>
module attributes {stable_mosaic.version = 11 : i64} {
  func.func @_rna_edge_kernel(%arg0: i32, %arg1: memref<128x1xi32, #tpu.memory_space<vmem>>, %arg2: memref<128x25xf32, #tpu.memory_space<vmem>>, %arg3: memref<66x16xf32, #tpu.memory_space<vmem>>, %arg4: memref<1x16xf32, #tpu.memory_space<vmem>>, %arg5: memref<25x800xf32, #tpu.memory_space<vmem>>, %arg6: memref<1x800xf32, #tpu.memory_space<vmem>>, %arg7: memref<16x128xf32, #tpu.memory_space<vmem>>, %arg8: memref<800x128xf32, #tpu.memory_space<vmem>>, %arg9: memref<1x128xf32, #tpu.memory_space<vmem>>, %arg10: memref<1x128xf32, #tpu.memory_space<vmem>>, %arg11: memref<128x128xf32, #tpu.memory_space<vmem>>) attributes {dimension_semantics = [#tpu.dimension_semantics<parallel>], iteration_bounds = array<i64: 1>, scalar_prefetch = 0 : i64, scratch_operands = 0 : i64, tpu.core_type = #tpu.core_type<tc>, window_params = [{transform_indices = @transform_0, window_bounds = array<i64: 128, 1>}, {transform_indices = @transform_1, window_bounds = array<i64: 128, 25>}, {pipeline_mode = #tpu.pipeline_mode<synchronous>, transform_indices = @transform_2, window_bounds = array<i64: 66, 16>}, {pipeline_mode = #tpu.pipeline_mode<synchronous>, transform_indices = @transform_3, window_bounds = array<i64: 1, 16>}, {pipeline_mode = #tpu.pipeline_mode<synchronous>, transform_indices = @transform_4, window_bounds = array<i64: 25, 800>}, {pipeline_mode = #tpu.pipeline_mode<synchronous>, transform_indices = @transform_5, window_bounds = array<i64: 1, 800>}, {pipeline_mode = #tpu.pipeline_mode<synchronous>, transform_indices = @transform_6, window_bounds = array<i64: 16, 128>}, {pipeline_mode = #tpu.pipeline_mode<synchronous>, transform_indices = @transform_7, window_bounds = array<i64: 800, 128>}, {pipeline_mode = #tpu.pipeline_mode<synchronous>, transform_indices = @transform_8, window_bounds = array<i64: 1, 128>}, {pipeline_mode = #tpu.pipeline_mode<synchronous>, transform_indices = @transform_9, window_bounds = array<i64: 1, 128>}, {transform_indices = @transform_10, window_bounds = array<i64: 128, 128>}]} {
    %c0 = arith.constant 0 : index
    %c0_0 = arith.constant 0 : index
    %0 = vector.load %arg1[%c0, %c0_0] : memref<128x1xi32, #tpu.memory_space<vmem>>, vector<128x1xi32>
    %1 = tpu.iota {dimensions = array<i32: 1>} : vector<128x66xi32>
    %2 = vector.broadcast %0 : vector<128x1xi32> to vector<128x66xi32>
    %3 = arith.cmpi eq, %1, %2 : vector<128x66xi32>
    %4 = arith.extui %3 : vector<128x66xi1> to vector<128x66xi32>
    %5 = arith.sitofp %4 : vector<128x66xi32> to vector<128x66xf32>
    %c0_1 = arith.constant 0 : index
    %c0_2 = arith.constant 0 : index
    %6 = vector.load %arg3[%c0_1, %c0_2] : memref<66x16xf32, #tpu.memory_space<vmem>>, vector<66x16xf32>
    %cst = arith.constant dense<0.000000e+00> : vector<128x16xf32>
    %7 = tpu.matmul %5, %6, %cst {dimension_numbers = #tpu.dot_dimension_numbers<[1], [0], [0], [1], [0, 0, 1, 1], [], []>} : vector<128x66xf32>, vector<66x16xf32>, vector<128x16xf32> -> vector<128x16xf32>
    %c0_3 = arith.constant 0 : index
    %c0_4 = arith.constant 0 : index
    %8 = vector.load %arg4[%c0_3, %c0_4] : memref<1x16xf32, #tpu.memory_space<vmem>>, vector<1x16xf32>
    %9 = vector.broadcast %8 : vector<1x16xf32> to vector<128x16xf32>
    %10 = arith.addf %7, %9 : vector<128x16xf32>
    %c0_5 = arith.constant 0 : index
    %c0_6 = arith.constant 0 : index
    %11 = vector.load %arg2[%c0_5, %c0_6] : memref<128x25xf32, #tpu.memory_space<vmem>>, vector<128x25xf32>
    %c0_7 = arith.constant 0 : index
    %c0_8 = arith.constant 0 : index
    %12 = vector.load %arg5[%c0_7, %c0_8] : memref<25x800xf32, #tpu.memory_space<vmem>>, vector<25x800xf32>
    %cst_9 = arith.constant dense<0.000000e+00> : vector<128x800xf32>
    %13 = tpu.matmul %11, %12, %cst_9 {dimension_numbers = #tpu.dot_dimension_numbers<[1], [0], [0], [1], [0, 0, 1, 1], [], []>} : vector<128x25xf32>, vector<25x800xf32>, vector<128x800xf32> -> vector<128x800xf32>
    %c0_10 = arith.constant 0 : index
    %c0_11 = arith.constant 0 : index
    %14 = vector.load %arg6[%c0_10, %c0_11] : memref<1x800xf32, #tpu.memory_space<vmem>>, vector<1x800xf32>
    %15 = vector.broadcast %14 : vector<1x800xf32> to vector<128x800xf32>
    %16 = arith.subf %13, %15 : vector<128x800xf32>
    %17 = arith.mulf %16, %16 : vector<128x800xf32>
    %cst_12 = arith.constant 0.000000e+00 : f32
    %18 = vector.broadcast %cst_12 : f32 to vector<128x800xf32>
    %19 = arith.subf %18, %17 : vector<128x800xf32>
    %cst_13 = arith.constant 1.280000e+00 : f32
    %20 = vector.broadcast %cst_13 : f32 to vector<128x800xf32>
    %21 = arith.mulf %19, %20 : vector<128x800xf32>
    %22 = math.exp %21 : vector<128x800xf32>
    %c0_14 = arith.constant 0 : index
    %c0_15 = arith.constant 0 : index
    %23 = vector.load %arg7[%c0_14, %c0_15] : memref<16x128xf32, #tpu.memory_space<vmem>>, vector<16x128xf32>
    %cst_16 = arith.constant dense<0.000000e+00> : vector<128x128xf32>
    %24 = tpu.matmul %10, %23, %cst_16 {dimension_numbers = #tpu.dot_dimension_numbers<[1], [0], [0], [1], [0, 0, 1, 1], [], []>} : vector<128x16xf32>, vector<16x128xf32>, vector<128x128xf32> -> vector<128x128xf32>
    %c0_17 = arith.constant 0 : index
    %c0_18 = arith.constant 0 : index
    %25 = vector.load %arg8[%c0_17, %c0_18] : memref<800x128xf32, #tpu.memory_space<vmem>>, vector<800x128xf32>
    %cst_19 = arith.constant dense<0.000000e+00> : vector<128x128xf32>
    %26 = tpu.matmul %22, %25, %cst_19 {dimension_numbers = #tpu.dot_dimension_numbers<[1], [0], [0], [1], [0, 0, 1, 1], [], []>} : vector<128x800xf32>, vector<800x128xf32>, vector<128x128xf32> -> vector<128x128xf32>
    %27 = arith.addf %24, %26 : vector<128x128xf32>
    %cst_20 = arith.constant dense<0.000000e+00> : vector<128xf32>
    %28 = vector.multi_reduction <add>, %27, %cst_20 [1] : vector<128x128xf32> to vector<128xf32>
    %29 = vector.shape_cast %28 : vector<128xf32> to vector<128x1xf32>
    %cst_21 = arith.constant 1.280000e+02 : f32
    %30 = vector.broadcast %cst_21 : f32 to vector<128x1xf32>
    %31 = arith.divf %29, %30 : vector<128x1xf32>
    %32 = vector.broadcast %31 : vector<128x1xf32> to vector<128x128xf32>
    %33 = arith.subf %27, %32 : vector<128x128xf32>
    %34 = arith.mulf %33, %33 : vector<128x128xf32>
    %cst_22 = arith.constant dense<0.000000e+00> : vector<128xf32>
    %35 = vector.multi_reduction <add>, %34, %cst_22 [1] : vector<128x128xf32> to vector<128xf32>
    %36 = vector.shape_cast %35 : vector<128xf32> to vector<128x1xf32>
    %cst_23 = arith.constant 1.280000e+02 : f32
    %37 = vector.broadcast %cst_23 : f32 to vector<128x1xf32>
    %38 = arith.divf %36, %37 : vector<128x1xf32>
    %cst_24 = arith.constant 9.99999974E-6 : f32
    %39 = vector.broadcast %cst_24 : f32 to vector<128x1xf32>
    %40 = arith.addf %38, %39 : vector<128x1xf32>
    %41 = math.rsqrt %40 : vector<128x1xf32>
    %42 = vector.broadcast %41 : vector<128x1xf32> to vector<128x128xf32>
    %43 = arith.mulf %33, %42 : vector<128x128xf32>
    %c0_25 = arith.constant 0 : index
    %c0_26 = arith.constant 0 : index
    %44 = vector.load %arg9[%c0_25, %c0_26] : memref<1x128xf32, #tpu.memory_space<vmem>>, vector<1x128xf32>
    %45 = vector.broadcast %44 : vector<1x128xf32> to vector<128x128xf32>
    %46 = arith.mulf %43, %45 : vector<128x128xf32>
    %c0_27 = arith.constant 0 : index
    %c0_28 = arith.constant 0 : index
    %47 = vector.load %arg10[%c0_27, %c0_28] : memref<1x128xf32, #tpu.memory_space<vmem>>, vector<1x128xf32>
    %48 = vector.broadcast %47 : vector<1x128xf32> to vector<128x128xf32>
    %49 = arith.addf %46, %48 : vector<128x128xf32>
    %c0_29 = arith.constant 0 : index
    %c0_30 = arith.constant 0 : index
    %50 = vector.load %arg11[%c0_29, %c0_30] : memref<128x128xf32, #tpu.memory_space<vmem>>, vector<128x128xf32>
    tpu.vector_store %arg11[%c0_29, %c0_30], %49 {strides = array<i32>} : memref<128x128xf32, #tpu.memory_space<vmem>>, vector<128x128xf32>,
    return
  }
  func.func @transform_0(%arg0: i32) -> (i32, i32) {
    %c0_i32 = arith.constant 0 : i32
    %c0_i32_0 = arith.constant 0 : i32
    return %arg0, %c0_i32 : i32, i32
  }
  func.func @transform_1(%arg0: i32) -> (i32, i32) {
    %c0_i32 = arith.constant 0 : i32
    %c0_i32_0 = arith.constant 0 : i32
    return %arg0, %c0_i32 : i32, i32
  }
  func.func @transform_2(%arg0: i32) -> (i32, i32) {
    %c0_i32 = arith.constant 0 : i32
    %c0_i32_0 = arith.constant 0 : i32
    %c0_i32_1 = arith.constant 0 : i32
    return %c0_i32, %c0_i32_0 : i32, i32
  }
  func.func @transform_3(%arg0: i32) -> (i32, i32) {
    %c0_i32 = arith.constant 0 : i32
    %c0_i32_0 = arith.constant 0 : i32
    %c0_i32_1 = arith.constant 0 : i32
    return %c0_i32, %c0_i32_0 : i32, i32
  }
  func.func @transform_4(%arg0: i32) -> (i32, i32) {
    %c0_i32 = arith.constant 0 : i32
    %c0_i32_0 = arith.constant 0 : i32
    %c0_i32_1 = arith.constant 0 : i32
    return %c0_i32, %c0_i32_0 : i32, i32
  }
  func.func @transform_5(%arg0: i32) -> (i32, i32) {
    %c0_i32 = arith.constant 0 : i32
    %c0_i32_0 = arith.constant 0 : i32
    %c0_i32_1 = arith.constant 0 : i32
    return %c0_i32, %c0_i32_0 : i32, i32
  }
  func.func @transform_6(%arg0: i32) -> (i32, i32) {
    %c0_i32 = arith.constant 0 : i32
    %c0_i32_0 = arith.constant 0 : i32
    %c0_i32_1 = arith.constant 0 : i32
    return %c0_i32, %c0_i32_0 : i32, i32
  }
  func.func @transform_7(%arg0: i32) -> (i32, i32) {
    %c0_i32 = arith.constant 0 : i32
    %c0_i32_0 = arith.constant 0 : i32
    %c0_i32_1 = arith.constant 0 : i32
    return %c0_i32, %c0_i32_0 : i32, i32
  }
  func.func @transform_8(%arg0: i32) -> (i32, i32) {
    %c0_i32 = arith.constant 0 : i32
    %c0_i32_0 = arith.constant 0 : i32
    %c0_i32_1 = arith.constant 0 : i32
    return %c0_i32, %c0_i32_0 : i32, i32
  }
  func.func @transform_9(%arg0: i32) -> (i32, i32) {
    %c0_i32 = arith.constant 0 : i32
    %c0_i32_0 = arith.constant 0 : i32
    %c0_i32_1 = arith.constant 0 : i32
    return %c0_i32, %c0_i32_0 : i32, i32
  }
  func.func @transform_10(%arg0: i32) -> (i32, i32) {
    %c0_i32 = arith.constant 0 : i32
    %c0_i32_0 = arith.constant 0 : i32
    return %arg0, %c0_i32 : i32, i32
  }
}

</mosaic_0001>

<bundles_post_ra>
// kernel: tpu_custom_call.1
= control target key start
LH: loop header
LB: loop body
LE: loop exit
PB: predicated region body
PF: predicated region fallthrough
CT: control target
= control target key end

     0   :  { %15 = vsyncpa [#allocation3], 0  ;;  %s5129_s0 = inlined_call_operand.vmem [shape: s32[128,1], index: 0, kind: input, shape index: {}]   ;;  %s5130_s1 = inlined_call_operand.vmem [shape: f32[128,25], index: 1, kind: input, shape index: {}]   ;;  %s5131_s2 = inlined_call_operand.vmem [shape: f32[66,16], index: 2, kind: input, shape index: {}]   ;;  %s5132_s3 = inlined_call_operand.vmem [shape: f32[1,16], index: 3, kind: input, shape index: {}]   ;;  %s5133_s4 = inlined_call_operand.vmem [shape: f32[25,800], index: 4, kind: input, shape index: {}]   ;;  %s5134_s5 = inlined_call_operand.vmem [shape: f32[1,800], index: 5, kind: input, shape index: {}]   ;;  %s5135_s6 = inlined_call_operand.vmem [shape: f32[16,128], index: 6, kind: input, shape index: {}]   ;;  %s5136_s7 = inlined_call_operand.hbm [shape: f32[800,128], index: 7, kind: input, shape index: {}]   ;;  %s5137_s8 = inlined_call_operand.vmem [shape: f32[1,128], index: 8, kind: input, shape index: {}]   ;;  %s5138_s9 = inlined_call_operand.vmem [shape: f32[1,128], index: 9, kind: input, shape index: {}]   ;;  %s5139_s10 = inlined_call_operand.hbm [shape: f32[128,128], index: 10, kind: output, shape index: {}]  }
   0x1   :  { %16 = vsyncpa [#allocation4], 0  ;;  %s3924_s13 = smov [#allocation2]  }
   0x2   :  { %s36_s14 = sshll.u32 %s3924_s13, 4  ;;  %s37_s14 = int_to_ptr.vmem [resolvable:$true] %s36_s14 }
   0x3   :  { %s3888_s15 = scalar_lea.vmem %s37_s14, 12800  ;;  %p3893_p1 = scmp.lt.s32.totalorder %s37_s14, %s37_s14 }
   0x4   :  { %p3889_p0 = scmp.ne.s32.totalorder %s37_s14, %s3888_s15  ;;  %p3894_p2 = scmp.lt.s32.totalorder %s3888_s15, %s3888_s15 }
   0x6   :  { %p3895_p3 = por %p3894_p2, %p3893_p1 }
   0x8   :  { %p3896_p4 = pnand %p3895_p3, %p3889_p0 }
   0xa   :  { %3899 = shalt.err (!%p3896_p4)
}
   0xb   :  { %s3925_s16 = smov 128   ;;  %s3926_s17 = smov 8  }
   0xc   :  { %42 = dma.hbm_to_vmem [thread:$0]  %s5136_s7, 12800, %s37_s14, [#allocation3], %s3925_s16, %s3925_s16, %s3926_s17  }
   0xd   :  { %3920 = dma.done.wait [#allocation3], 12800  }
   0xe   :  { %3921 = vsyncadd [#allocation3], 4294954496  ;;  %v3927_v0 = vmov 0   ;;  %v3928_v1 = vmov 0.0   ;;  %v52_v2 = vld [vmem:[%s5129_s0 + $0x10] sm:$0xff]  ;;  %v50_v3 = vld [vmem:[%s5129_s0] sm:$0xff]  ;;  %v66_v60 = vlaneseq }
   0xf   :  { %3622 = vset.pattern.permute.xlu1 %v3927_v0  ;;  %3621 = vset.pattern.permute.xlu0 %v3927_v0  ;;  %v53_v4 = vld [vmem:[%s5129_s0 + $0x18] sm:$0xff]  ;;  %v51_v5 = vld [vmem:[%s5129_s0 + $0x8] sm:$0xff]  ;;  %vm471_vm0 = vcmask 1040384   ;;  %v416_v6 = vld [vmem:[%s5133_s4 + $0xb0] sm:$0x1]  ;;  %vm229_vm1 = vcmask 1041408  }
  0x10   :  { %557 = vmatprep.mubr.f32.mxu1 %v3928_v1  ;;  %75 = vperm.xlu1 %3622, %v52_v2   ;;  %v415_v7 = vld [vmem:[%s5133_s4 + $0xa8] sm:$0x1]  ;;  %v54_v9 = vld [vmem:[%s5129_s0 + $0x20] sm:$0xff]  ;;  %v409_v10 = vld [vmem:[%s5133_s4 + $0x78] sm:$0xff]  ;;  %vm422_vm2 = vcmask 203776   ;;  %v4284_v61 = vand.u32 127, %v66_v60 }
  0x11   :  { %69 = vperm.xlu0 %3621, %v50_v3   ;;  %v55_v8 = vld [vmem:[%s5129_s0 + $0x28] sm:$0xff]  ;;  %3045 = vmatprep.subr.msk.mxu1 %vm471_vm0, %v416_v6  ;;  %v408_v11 = vld [vmem:[%s5133_s4 + $0x70] sm:$0xff]  ;;  %v402_v12 = vld [vmem:[%s5133_s4 + $0x40] sm:$0xff]  ;;  %vm180_vm3 = vcmask 539648  }
  0x12   :  { %3046 = vmatpush1.msk.msra.mxu1 %vm471_vm0, %v415_v7  ;;  %v401_v13 = vld [vmem:[%s5133_s4 + $0x38] sm:$0xff]  ;;  %v172_v14 = vld [vmem:[%s5131_s2 + $0x40] sm:$0x3]  ;;  %v56_v17 = vld [vmem:[%s5129_s0 + $0x30] sm:$0xff] }
  0x13   :  { %519 = vmatprep.subr.mxu1 %v409_v10  ;;  %v171_v15 = vld [vmem:[%s5131_s2 + $0x38] sm:$0xff]  ;;  %3473 = vmatprep.subr.msk.mxu0 %vm229_vm1, %v172_v14  ;;  %v395_v18 = vld [vmem:[%s5133_s4 + $0x8] sm:$0xff]  ;;  %v394_v19 = vld [vmem:[%s5133_s4] sm:$0xff] }
  0x14   :  { %78 = vperm.xlu1 %3622, %v53_v4   ;;  %v57_v16 = vld [vmem:[%s5129_s0 + $0x38] sm:$0xff]  ;;  %520 = vmatpush1.msra.mxu1 %v408_v11  ;;  %v170_v20 = vld [vmem:[%s5131_s2 + $0x30] sm:$0xff]  ;;  %v4054_v21 = vld [vmem:[%s5130_s1] sm:$0xff] }
  0x15   :  { %72 = vperm.xlu0 %3621, %v51_v5   ;;  %521 = vmatprep.subr.mxu1 %v402_v12  ;;  %v59_v22 = vld [vmem:[%s5129_s0 + $0x48] sm:$0xff]  ;;  %v58_v23 = vld [vmem:[%s5129_s0 + $0x40] sm:$0xff]  ;;  %v61_v27 = vld [vmem:[%s5129_s0 + $0x58] sm:$0xff] }
  0x16   :  { %3474 = vmatpush3.msk.msra.mxu0 %vm229_vm1, %v172_v14  ;;  %522 = vmatpush1.msra.mxu1 %v401_v13  ;;  %v169_v24 = vld [vmem:[%s5131_s2 + $0x28] sm:$0xff]  ;;  %v168_v26 = vld [vmem:[%s5131_s2 + $0x20] sm:$0xff]  ;;  %v60_v28 = vld [vmem:[%s5129_s0 + $0x50] sm:$0xff] }
  0x17   :  { %3475 = vmatprep.subr.mxu0 %v171_v15  ;;  %523 = vmatprep.subr.mxu1 %v395_v18  ;;  %v4070_v25 = vld [vmem:[%s5130_s1 + $0x8] sm:$0xff]  ;;  %v167_v29 = vld [vmem:[%s5131_s2 + $0x18] sm:$0xff]  ;;  %v4090_v30 = vld [vmem:[%s5130_s1 + $0x10] sm:$0xff] }
  0x18   :  { %84 = vperm.xlu1 %3622, %v55_v8   ;;  %3476 = vmatpush3.msra.mxu0 %v171_v15  ;;  %v63_v31 = vld [vmem:[%s5129_s0 + $0x68] sm:$0xff]  ;;  %v62_v32 = vld [vmem:[%s5129_s0 + $0x60] sm:$0xff]  ;;  %v166_v33 = vld [vmem:[%s5131_s2 + $0x10] sm:$0xff] }
  0x19   :  { %81 = vperm.xlu0 %3621, %v54_v9   ;;  %524 = vmatpush1.msra.mxu1 %v394_v19  ;;  %v4107_v34 = vld [vmem:[%s5130_s1 + $0x18] sm:$0xff]  ;;  %v165_v35 = vld [vmem:[%s5131_s2 + $0x8] sm:$0xff]  ;;  %v64_v37 = vld [vmem:[%s5129_s0 + $0x70] sm:$0xff] }
  0x1a   :  { %3477 = vmatprep.subr.mxu0 %v170_v20  ;;  %3047 = vmatmul.mubr.msk.f32.vlgmr.msra.gmra.mxu1 %vm422_vm2, %v4054_v21  ;;  %v65_v36 = vld [vmem:[%s5129_s0 + $0x78] sm:$0xff]  ;;  %v164_v38 = vld [vmem:[%s5131_s2] sm:$0xff]  ;;  %v420_v39 = vld [vmem:[%s5133_s4 + $0xd0] sm:$0x1] }
  0x1b   :  { %3478 = vmatpush3.msra.mxu0 %v170_v20  ;;  %563 = vmatprep.mubr.f32.mxu1 %v3928_v1  ;;  %v4130_v40 = vld [vmem:[%s5130_s1 + $0x20] sm:$0xff]  ;;  %v419_v42 = vld [vmem:[%s5133_s4 + $0xc8] sm:$0x1]  ;;  %v413_v43 = vld [vmem:[%s5133_s4 + $0x98] sm:$0xff] }
  0x1c   :  { %90 = vperm.xlu1 %3622, %v57_v16   ;;  %3479 = vmatprep.subr.mxu0 %v169_v24  ;;  %v418_v41 = vld [vmem:[%s5133_s4 + $0xc0] sm:$0x1]  ;;  %v4149_v44 = vld [vmem:[%s5130_s1 + $0x28] sm:$0xff]  ;;  %v412_v45 = vld [vmem:[%s5133_s4 + $0x90] sm:$0xff] }
  0x1d   :  { %87 = vperm.xlu0 %3621, %v56_v17   ;;  %3480 = vmatpush3.msra.mxu0 %v169_v24  ;;  %v406_v46 = vld [vmem:[%s5133_s4 + $0x60] sm:$0xff]  ;;  %v405_v47 = vld [vmem:[%s5133_s4 + $0x58] sm:$0xff]  ;;  %v4168_v48 = vld [vmem:[%s5130_s1 + $0x30] sm:$0xff] }
  0x1e   :  { %3048 = vmatmul.mubr.msk.f32.gmra.mxu1 %vm422_vm2, %v4070_v25  ;;  %3481 = vmatprep.subr.mxu0 %v168_v26  ;;  %v399_v49 = vld [vmem:[%s5133_s4 + $0x28] sm:$0xff]  ;;  %v398_v50 = vld [vmem:[%s5133_s4 + $0x20] sm:$0xff]  ;;  %v4182_v51 = vld [vmem:[%s5130_s1 + $0x38] sm:$0xff] }
  0x1f   :  { %569 = vmatprep.mubr.f32.mxu1 %v3928_v1  ;;  %3482 = vmatpush3.msra.mxu0 %v168_v26  ;;  %v4190_v52 = vld [vmem:[%s5130_s1 + $0x40] sm:$0xff]  ;;  %v4198_v53 = vld [vmem:[%s5130_s1 + $0x48] sm:$0xff]  ;;  %v4206_v54 = vld [vmem:[%s5130_s1 + $0x50] sm:$0xff] }
  0x20   :  { %96 = vperm.xlu1 %3622, %v59_v22   ;;  %3483 = vmatprep.subr.mxu0 %v167_v29  ;;  %v4214_v55 = vld [vmem:[%s5130_s1 + $0x58] sm:$0xff]  ;;  %v4222_v56 = vld [vmem:[%s5130_s1 + $0x60] sm:$0xff]  ;;  %v4230_v57 = vld [vmem:[%s5130_s1 + $0x68] sm:$0xff] }
  0x21   :  { %93 = vperm.xlu0 %3621, %v58_v23   ;;  %3484 = vmatpush3.msra.mxu0 %v167_v29  ;;  %v4238_v58 = vld [vmem:[%s5130_s1 + $0x70] sm:$0xff]  ;;  %v4246_v59 = vld [vmem:[%s5130_s1 + $0x78] sm:$0xff]  ;;  %v411_v11 = vld [vmem:[%s5133_s4 + $0x88] sm:$0xff] }
  0x22   :  { %3049 = vmatmul.mubr.msk.f32.gmra.mxu1 %vm422_vm2, %v4090_v30  ;;  %3485 = vmatprep.subr.mxu0 %v166_v33  ;;  %v1863_v2 = vld [vmem:[#allocation2 + $0xf8] sm:$0xff]  ;;  %v1862_v4 = vld [vmem:[#allocation2 + $0xf0] sm:$0xff]  ;;  %v410_v12 = vld [vmem:[%s5133_s4 + $0x80] sm:$0xff] }
  0x23   :  { %575 = vmatprep.mubr.f32.mxu1 %v3928_v1  ;;  %3486 = vmatpush3.msra.mxu0 %v166_v33  ;;  %v1847_v3 = vld [vmem:[#allocation2 + $0x78] sm:$0xff]  ;;  %v1846_v7 = vld [vmem:[#allocation2 + $0x70] sm:$0xff]  ;;  %v403_v16 = vld [vmem:[%s5133_s4 + $0x48] sm:$0xff] }
  0x24   :  { %102 = vperm.xlu1 %3622, %v61_v27   ;;  %3487 = vmatprep.subr.mxu0 %v165_v35  ;;  %v417_v9 = vld [vmem:[%s5133_s4 + $0xb8] sm:$0x1]  ;;  %v404_v15 = vld [vmem:[%s5133_s4 + $0x50] sm:$0xff]  ;;  %v1861_v26 = vld [vmem:[#allocation2 + $0xe8] sm:$0xff] }
  0x25   :  { %99 = vperm.xlu0 %3621, %v60_v28   ;;  %3488 = vmatpush3.msra.mxu0 %v165_v35  ;;  %v397_v19 = vld [vmem:[%s5133_s4 + $0x18] sm:$0xff]  ;;  %v396_v20 = vld [vmem:[%s5133_s4 + $0x10] sm:$0xff]  ;;  %v1845_v29 = vld [vmem:[#allocation2 + $0x68] sm:$0xff] }
  0x26   :  { %3050 = vmatmul.mubr.msk.f32.gmra.mxu1 %vm422_vm2, %v4107_v34  ;;  %3489 = vmatprep.subr.mxu0 %v164_v38  ;;  %v4337_v24 = vld [vmem:[%s5133_s4 + $0xd8] sm:$0x1]  ;;  %v1860_v33 = vld [vmem:[#allocation2 + $0xe0] sm:$0xff] }
  0x27   :  { %581 = vmatprep.mubr.f32.mxu1 %v3928_v1  ;;  %3081 = vmatprep.subr.msk.mxu1 %vm471_vm0, %v420_v39  ;;  %v1844_v35 = vld [vmem:[#allocation2 + $0x60] sm:$0xff]  ;;  %v1843_v39 = vld [vmem:[#allocation2 + $0x58] sm:$0xff] }
  0x28   :  { %108 = vperm.xlu1 %3622, %v63_v31   ;;  %3490 = vmatpush3.msra.mxu0 %v164_v38  ;;  %v1859_v38 = vld [vmem:[#allocation2 + $0xd8] sm:$0xff] }
  0x29   :  { %105 = vperm.xlu0 %3621, %v62_v32   ;;  %3063 = vmatprep.subr.msk.mxu0 %vm471_vm0, %v418_v41 }
  0x2a   :  { %3051 = vmatmul.mubr.msk.f32.gmra.mxu1 %vm422_vm2, %v4130_v40 }
  0x2b   :  { %587 = vmatprep.mubr.f32.mxu1 %v3928_v1  ;;  %3082 = vmatpush1.msk.msra.mxu1 %vm471_vm0, %v419_v42 }
  0x2c   :  { %114 = vperm.xlu1 %3622, %v65_v36   ;;  %841 = vmatprep.subr.mxu1 %v413_v43  ;;  %v1858_v43 = vld [vmem:[#allocation2 + $0xd0] sm:$0xff] }
  0x2d   :  { %111 = vperm.xlu0 %3621, %v64_v37   ;;  %842 = vmatpush1.msra.mxu1 %v412_v45  ;;  %v1842_v45 = vld [vmem:[#allocation2 + $0x50] sm:$0xff] }
  0x2e   :  { %3052 = vmatmul.mubr.msk.f32.gmra.mxu1 %vm422_vm2, %v4149_v44  ;;  %843 = vmatprep.subr.mxu1 %v406_v46 }
  0x2f   :  { %593 = vmatprep.mubr.f32.mxu1 %v3928_v1  ;;  %844 = vmatpush1.msra.mxu1 %v405_v47 }
  0x30   :  { %845 = vmatprep.subr.mxu1 %v399_v49  ;;  %v1857_v49 = vld [vmem:[#allocation2 + $0xc8] sm:$0xff] }
  0x31   :  { %846 = vmatpush1.msra.mxu1 %v398_v50  ;;  %v1841_v50 = vld [vmem:[#allocation2 + $0x48] sm:$0xff] }
  0x32   :  { %3053 = vmatmul.mubr.msk.f32.gmra.mxu1 %vm422_vm2, %v4168_v48  ;;  %3195 = vmatprep.subr.mxu1 %v1863_v2  ;;  %v1840_v2 = vld [vmem:[#allocation2 + $0x40] sm:$0xff] }
  0x33   :  { %599 = vmatprep.mubr.f32.mxu1 %v3928_v1 }
  0x36   :  { %3054 = vmatmul.mubr.msk.f32.gmra.mxu1 %vm422_vm2, %v4182_v51 }
  0x37   :  { %605 = vmatprep.mubr.f32.mxu1 %v3928_v1 }
  0x3a   :  { %3055 = vmatmul.mubr.msk.f32.gmra.mxu1 %vm422_vm2, %v4190_v52 }
  0x3b   :  { %611 = vmatprep.mubr.f32.mxu1 %v3928_v1 }
  0x3e   :  { %3056 = vmatmul.mubr.msk.f32.gmra.mxu1 %vm422_vm2, %v4198_v53 }
  0x3f   :  { %617 = vmatprep.mubr.f32.mxu1 %v3928_v1 }
  0x42   :  { %3057 = vmatmul.mubr.msk.f32.gmra.mxu1 %vm422_vm2, %v4206_v54 }
  0x43   :  { %623 = vmatprep.mubr.f32.mxu1 %v3928_v1 }
  0x46   :  { %3058 = vmatmul.mubr.msk.f32.gmra.mxu1 %vm422_vm2, %v4214_v55 }
  0x47   :  { %629 = vmatprep.mubr.f32.mxu1 %v3928_v1 }
  0x4a   :  { %3059 = vmatmul.mubr.msk.f32.gmra.mxu1 %vm422_vm2, %v4222_v56 }
  0x4b   :  { %635 = vmatprep.mubr.f32.mxu1 %v3928_v1 }
  0x4e   :  { %3060 = vmatmul.mubr.msk.f32.gmra.mxu1 %vm422_vm2, %v4230_v57 }
  0x4f   :  { %641 = vmatprep.mubr.f32.mxu1 %v3928_v1 }
  0x52   :  { %3061 = vmatmul.mubr.msk.f32.gmra.mxu1 %vm422_vm2, %v4238_v58 }
  0x53   :  { %647 = vmatprep.mubr.f32.mxu1 %v3928_v1 }
  0x56   :  { %3062 = vmatmul.mubr.msk.f32.gmra.mxu1 %vm422_vm2, %v4246_v59 }
  0x57   :  { %879 = vmatprep.mubr.f32.mxu1 %v3928_v1 }
  0x5a   :  { %3083 = vmatmul.mubr.msk.f32.vlgmr.msra.gmra.mxu1 %vm422_vm2, %v4054_v21 }
  0x5b   :  { %885 = vmatprep.mubr.f32.mxu1 %v3928_v1  ;;  %3196 = vmatpush3.msra.mxu1 %v1847_v3 }
  0x5c   :  { %3197 = vmatprep.subr.mxu1 %v1862_v4 }
  0x5d   :  { %3198 = vmatpush3.msra.mxu1 %v1846_v7 }
  0x5e   :  { %3084 = vmatmul.mubr.msk.f32.gmra.mxu1 %vm422_vm2, %v4070_v25  ;;  %3199 = vmatprep.subr.mxu1 %v1861_v26  ;;  %v407_v26 = vld [vmem:[%s5133_s4 + $0x68] sm:$0xff] }
  0x5f   :  { %891 = vmatprep.mubr.f32.mxu1 %v3928_v1  ;;  %3200 = vmatpush3.msra.mxu1 %v1845_v29  ;;  %v1832_v29 = vld [vmem:[#allocation2] sm:$0xff] }
  0x60   :  { %3201 = vmatprep.subr.mxu1 %v1860_v33  ;;  %v4427_v33 = vld [vmem:[%s5134_s5] sm:$0x7f] }
  0x61   :  { %3202 = vmatpush3.msra.mxu1 %v1844_v35 }
  0x62   :  { %3085 = vmatmul.mubr.msk.f32.gmra.mxu1 %vm422_vm2, %v4090_v30  ;;  %3203 = vmatprep.subr.mxu1 %v1859_v38 }
  0x63   :  { %897 = vmatprep.mubr.f32.mxu1 %v3928_v1  ;;  %3204 = vmatpush3.msra.mxu1 %v1843_v39 }
  0x64   :  { %3205 = vmatprep.subr.mxu1 %v1858_v43 }
  0x65   :  { %3206 = vmatpush3.msra.mxu1 %v1842_v45 }
  0x66   :  { %3086 = vmatmul.mubr.msk.f32.gmra.mxu1 %vm422_vm2, %v4107_v34  ;;  %3207 = vmatprep.subr.mxu1 %v1857_v49 }
  0x67   :  { %903 = vmatprep.mubr.f32.mxu1 %v3928_v1  ;;  %3208 = vmatpush3.msra.mxu1 %v1841_v50 }
  0x6a   :  { %3087 = vmatmul.mubr.msk.f32.gmra.mxu1 %vm422_vm2, %v4130_v40 }
  0x6b   :  { %909 = vmatprep.mubr.f32.mxu1 %v3928_v1 }
  0x6e   :  { %3088 = vmatmul.mubr.msk.f32.gmra.mxu1 %vm422_vm2, %v4149_v44 }
  0x6f   :  { %915 = vmatprep.mubr.f32.mxu1 %v3928_v1 }
  0x72   :  { %3089 = vmatmul.mubr.msk.f32.gmra.mxu1 %vm422_vm2, %v4168_v48 }
  0x73   :  { %921 = vmatprep.mubr.f32.mxu1 %v3928_v1 }
  0x76   :  { %3090 = vmatmul.mubr.msk.f32.gmra.mxu1 %vm422_vm2, %v4182_v51 }
  0x77   :  { %927 = vmatprep.mubr.f32.mxu1 %v3928_v1 }
  0x7a   :  { %3091 = vmatmul.mubr.msk.f32.gmra.mxu1 %vm422_vm2, %v4190_v52 }
  0x7b   :  { %933 = vmatprep.mubr.f32.mxu1 %v3928_v1 }
  0x7e   :  { %3092 = vmatmul.mubr.msk.f32.gmra.mxu1 %vm422_vm2, %v4198_v53 }
  0x7f   :  { %939 = vmatprep.mubr.f32.mxu1 %v3928_v1 }
  0x82   :  { %3093 = vmatmul.mubr.msk.f32.gmra.mxu1 %vm422_vm2, %v4206_v54 }
  0x83   :  { %945 = vmatprep.mubr.f32.mxu1 %v3928_v1 }
  0x86   :  { %3094 = vmatmul.mubr.msk.f32.gmra.mxu1 %vm422_vm2, %v4214_v55 }
  0x87   :  { %951 = vmatprep.mubr.f32.mxu1 %v3928_v1 }
  0x8a   :  { %3095 = vmatmul.mubr.msk.f32.gmra.mxu1 %vm422_vm2, %v4222_v56 }
  0x8b   :  { %v76_v62 = vpop.permute.xlu1 %75  ;;  %957 = vmatprep.mubr.f32.mxu1 %v3928_v1 }
  0x8c   :  { %v70_v63 = vpop.permute.xlu0 %69  ;;  %vm118_vm5 = vcmp.eq.s32.totalorder %v4284_v61, %v76_v62 }
  0x8d   :  { %vm116_vm4 = vcmp.eq.s32.totalorder %v4284_v61, %v70_v63  ;;  %v3013_v8 = vsel %vm118_vm5, 1.0, %v3928_v1 }
  0x8e   :  { %v3011_v0 = vsel %vm116_vm4, 1.0, %v3928_v1  ;;  %3096 = vmatmul.mubr.msk.f32.gmra.mxu1 %vm422_vm2, %v4230_v57 }
  0x8f   :  { %3491 = vmatprep.mubr.msk.f32.mxu0 %vm180_vm3, %v3011_v0  ;;  %v79_v5 = vpop.permute.xlu1 %78  ;;  %963 = vmatprep.mubr.f32.mxu1 %v3928_v1  ;;  %v1856_v0 = vld [vmem:[#allocation2 + $0xc0] sm:$0xff] }
  0x90   :  { %v73_v6 = vpop.permute.xlu0 %72  ;;  %vm119_vm7 = vcmp.eq.s32.totalorder %v4284_v61, %v79_v5  ;;  %v1855_v5 = vld [vmem:[#allocation2 + $0xb8] sm:$0xff]  ;;  %3209 = vmatprep.subr.mxu1 %v1856_v0 }
  0x91   :  { %vm117_vm6 = vcmp.eq.s32.totalorder %v4284_v61, %v73_v6  ;;  %v3014_v17 = vsel %vm119_vm7, 1.0, %v3928_v1  ;;  %v1839_v6 = vld [vmem:[#allocation2 + $0x38] sm:$0xff]  ;;  %3210 = vmatpush3.msra.mxu1 %v1840_v2 }
  0x92   :  { %v3012_v10 = vsel %vm117_vm6, 1.0, %v3928_v1  ;;  %3097 = vmatmul.mubr.msk.f32.gmra.mxu1 %vm422_vm2, %v4238_v58  ;;  %3211 = vmatprep.subr.mxu1 %v1855_v5 }
  0x93   :  { %3492 = vmatmul.mubr.msk.f32.vlgmr.msra.gmra.mxu0 %vm180_vm3, %v3012_v10  ;;  %v85_v13 = vpop.permute.xlu1 %84  ;;  %969 = vmatprep.mubr.f32.mxu1 %v3928_v1  ;;  %v1838_v10 = vld [vmem:[#allocation2 + $0x30] sm:$0xff] }
  0x94   :  { %3064 = vmatpush1.msk.msra.mxu0 %vm471_vm0, %v417_v9  ;;  %3494 = vmatprep.mubr.msk.f32.mxu0 %vm180_vm3, %v3013_v8  ;;  %v82_v14 = vpop.permute.xlu0 %81  ;;  %vm121_vm9 = vcmp.eq.s32.totalorder %v4284_v61, %v85_v13  ;;  %v1854_v9 = vld [vmem:[#allocation2 + $0xb0] sm:$0xff]  ;;  %v1853_v13 = vld [vmem:[#allocation2 + $0xa8] sm:$0xff] }
  0x95   :  { %vm120_vm8 = vcmp.eq.s32.totalorder %v4284_v61, %v82_v14  ;;  %680 = vmatprep.subr.mxu0 %v411_v11  ;;  %v3016_v27 = vsel %vm121_vm9, 1.0, %v3928_v1  ;;  %3212 = vmatpush3.msra.mxu1 %v1839_v6  ;;  %v1837_v14 = vld [vmem:[#allocation2 + $0x28] sm:$0xff] }
  0x96   :  { %v3015_v18 = vsel %vm120_vm8, 1.0, %v3928_v1  ;;  %681 = vmatpush1.msra.mxu0 %v410_v12  ;;  %3098 = vmatmul.mubr.msk.f32.gmra.mxu1 %vm422_vm2, %v4246_v59 }
  0x97   :  { %3495 = vmatmul.mubr.msk.f32.gmra.mxu0 %vm180_vm3, %v3014_v17  ;;  %682 = vmatprep.subr.mxu0 %v404_v15  ;;  %v91_v22 = vpop.permute.xlu1 %90  ;;  %v1852_v15 = vld [vmem:[#allocation2 + $0xa0] sm:$0xff] }
  0x98   :  { %3497 = vmatprep.mubr.msk.f32.mxu0 %vm180_vm3, %v3015_v18  ;;  %v88_v23 = vpop.permute.xlu0 %87  ;;  %683 = vmatpush1.msra.mxu0 %v403_v16  ;;  %vm123_vm11 = vcmp.eq.s32.totalorder %v4284_v61, %v91_v22  ;;  %v1836_v16 = vld [vmem:[#allocation2 + $0x20] sm:$0xff]  ;;  %v1851_v18 = vld [vmem:[#allocation2 + $0x98] sm:$0xff]  ;;  %v1834_v22 = vld [vmem:[#allocation2 + $0x10] sm:$0xff] }
  0x99   :  { %vm122_vm10 = vcmp.eq.s32.totalorder %v4284_v61, %v88_v23  ;;  %684 = vmatprep.subr.mxu0 %v397_v19  ;;  %v3018_v36 = vsel %vm123_vm11, 1.0, %v3928_v1  ;;  %3213 = vmatprep.subr.mxu1 %v1854_v9  ;;  %v1835_v19 = vld [vmem:[#allocation2 + $0x18] sm:$0xff]  ;;  %v1849_v23 = vld [vmem:[#allocation2 + $0x88] sm:$0xff] }
  0x9a   :  { %v3017_v28 = vsel %vm122_vm10, 1.0, %v3928_v1  ;;  %685 = vmatpush1.msra.mxu0 %v396_v20  ;;  %3214 = vmatpush3.msra.mxu1 %v1838_v10  ;;  %v414_v20 = vld [vmem:[%s5133_s4 + $0xa0] sm:$0xff] }
  0x9b   :  { %3498 = vmatmul.mubr.msk.f32.gmra.mxu0 %vm180_vm3, %v3016_v27  ;;  %3515 = vmatprep.subr.msk.mxu0 %vm471_vm0, %v4337_v24  ;;  %v97_v31 = vpop.permute.xlu1 %96  ;;  %v400_v27 = vld [vmem:[%s5133_s4 + $0x30] sm:$0xff] }
  0x9c   :  { %3500 = vmatprep.mubr.msk.f32.mxu0 %vm180_vm3, %v3017_v28  ;;  %v94_v32 = vpop.permute.xlu0 %93  ;;  %vm125_vm13 = vcmp.eq.s32.totalorder %v4284_v61, %v97_v31  ;;  %3215 = vmatprep.subr.mxu1 %v1853_v13  ;;  %v1833_v28 = vld [vmem:[#allocation2 + $0x8] sm:$0xff]  ;;  %v4418_v31 = vshrl.u32 %v66_v60, 7 }
  0x9d   :  { %vm124_vm12 = vcmp.eq.s32.totalorder %v4284_v61, %v94_v32  ;;  %v3020_v46 = vsel %vm125_vm13, 1.0, %v3928_v1  ;;  %3216 = vmatpush3.msra.mxu1 %v1837_v14 }
  0x9e   :  { %v3019_v37 = vsel %vm124_vm12, 1.0, %v3928_v1  ;;  %3217 = vmatprep.subr.mxu1 %v1852_v15  ;;  %v1125_v32 = vsub.s32 0, %v4418_v31  ;;  %v1129_v35 = vsub.s32 1, %v4418_v31 }
  0x9f   :  { %3501 = vmatmul.mubr.msk.f32.gmra.mxu0 %vm180_vm3, %v3018_v36  ;;  %v103_v41 = vpop.permute.xlu1 %102  ;;  %3218 = vmatpush3.msra.mxu1 %v1836_v16 }
  0xa0   :  { %3503 = vmatprep.mubr.msk.f32.mxu0 %vm180_vm3, %v3019_v37  ;;  %v100_v42 = vpop.permute.xlu0 %99  ;;  %vm127_vm15 = vcmp.eq.s32.totalorder %v4284_v61, %v103_v41  ;;  %3219 = vmatprep.subr.mxu1 %v1851_v18  ;;  %v4434_v60 = vrot.slane %v4427_v33, %v1125_v32  ;;  %v4439_v36 = vrot.slane %v4427_v33, %v1129_v35 }
  0xa1   :  { %vm126_vm14 = vcmp.eq.s32.totalorder %v4284_v61, %v100_v42  ;;  %v3022_v3 = vsel %vm127_vm15, 1.0, %v3928_v1  ;;  %3220 = vmatpush3.msra.mxu1 %v1835_v19 }
  0xa2   :  { %v3021_v47 = vsel %vm126_vm14, 1.0, %v3928_v1 }
  0xa3   :  { %3504 = vmatmul.mubr.msk.f32.gmra.mxu0 %vm180_vm3, %v3020_v46  ;;  %v109_v62 = vpop.permute.xlu1 %108 }
  0xa4   :  { %3506 = vmatprep.mubr.msk.f32.mxu0 %vm180_vm3, %v3021_v47  ;;  %v106_v63 = vpop.permute.xlu0 %105  ;;  %vm129_vm4 = vcmp.eq.s32.totalorder %v4284_v61, %v109_v62 }
  0xa5   :  { %vm128_vm1 = vcmp.eq.s32.totalorder %v4284_v61, %v106_v63  ;;  %v3024_v11 = vsel %vm129_vm4, 1.0, %v3928_v1 }
  0xa6   :  { %v3023_v4 = vsel %vm128_vm1, 1.0, %v3928_v1 }
  0xa7   :  { %3507 = vmatmul.mubr.msk.f32.gmra.mxu0 %vm180_vm3, %v3022_v3  ;;  %v115_v7 = vpop.permute.xlu1 %114 }
  0xa8   :  { %3509 = vmatprep.mubr.msk.f32.mxu0 %vm180_vm3, %v3023_v4  ;;  %v112_v8 = vpop.permute.xlu0 %111  ;;  %vm131_vm6 = vcmp.eq.s32.totalorder %v4284_v61, %v115_v7 }
  0xa9   :  { %vm130_vm5 = vcmp.eq.s32.totalorder %v4284_v61, %v112_v8  ;;  %v3026_v17 = vsel %vm131_vm6, 1.0, %v3928_v1  ;;  %v1850_v61 = vld [vmem:[#allocation2 + $0x90] sm:$0xff] }
  0xaa   :  { %v3025_v12 = vsel %vm130_vm5, 1.0, %v3928_v1  ;;  %3221 = vmatprep.subr.mxu1 %v1850_v61 }
  0xab   :  { %3510 = vmatmul.mubr.msk.f32.gmra.mxu0 %vm180_vm3, %v3024_v11  ;;  %3222 = vmatpush3.msra.mxu1 %v1834_v22 }
  0xac   :  { %3512 = vmatprep.mubr.msk.f32.mxu0 %vm180_vm3, %v3025_v12  ;;  %3223 = vmatprep.subr.mxu1 %v1849_v23 }
  0xad   :  { %3224 = vmatpush3.msra.mxu1 %v1833_v28 }
  0xaf   :  { %3513 = vmatmul.mubr.msk.f32.gmra.mxu0 %vm180_vm3, %v3026_v17 }
  0xb0   :  { %718 = vmatprep.mubr.f32.mxu0 %v3928_v1 }
  0xb3   :  { %3065 = vmatmul.mubr.msk.f32.vlgmr.msra.gmra.mxu0 %vm422_vm2, %v4054_v21 }
  0xb4   :  { %3516 = vmatpush3.msk.msra.mxu0 %vm471_vm0, %v4337_v24  ;;  %724 = vmatprep.mubr.f32.mxu0 %v3928_v1  ;;  %v1848_v24 = vld [vmem:[#allocation2 + $0x80] sm:$0xff]  ;;  %vm1932_vm0 = vcmask 261120  }
  0xb5   :  { %3517 = vmatprep.subr.mxu0 %v414_v20  ;;  %3225 = vmatprep.subr.mxu1 %v1848_v24  ;;  %v1927_v24 = vld [vmem:[#allocation2 + $0x2f8] sm:$0xff] }
  0xb6   :  { %3518 = vmatpush3.msra.mxu0 %v414_v20  ;;  %3226 = vmatpush3.msra.mxu1 %v1832_v29  ;;  %v1895_v20 = vld [vmem:[#allocation2 + $0x1f8] sm:$0xff] }
  0xb7   :  { %3066 = vmatmul.mubr.msk.f32.gmra.mxu0 %vm422_vm2, %v4070_v25  ;;  %3519 = vmatprep.subr.mxu0 %v407_v26 }
  0xb8   :  { %730 = vmatprep.mubr.f32.mxu0 %v3928_v1  ;;  %3520 = vmatpush3.msra.mxu0 %v407_v26 }
  0xb9   :  { %3521 = vmatprep.subr.mxu0 %v400_v27  ;;  %3355 = vmatprep.subr.mxu1 %v1927_v24 }
  0xba   :  { %3522 = vmatpush3.msra.mxu0 %v400_v27 }
  0xbb   :  { %3067 = vmatmul.mubr.msk.f32.gmra.mxu0 %vm422_vm2, %v4090_v30  ;;  %3275 = vmatprep.subr.mxu0 %v1895_v20 }
  0xbc   :  { %736 = vmatprep.mubr.f32.mxu0 %v3928_v1 }
  0xbf   :  { %3068 = vmatmul.mubr.msk.f32.gmra.mxu0 %vm422_vm2, %v4107_v34 }
  0xc0   :  { %742 = vmatprep.mubr.f32.mxu0 %v3928_v1 }
  0xc3   :  { %3069 = vmatmul.mubr.msk.f32.gmra.mxu0 %vm422_vm2, %v4130_v40 }
  0xc4   :  { %748 = vmatprep.mubr.f32.mxu0 %v3928_v1 }
  0xc7   :  { %3070 = vmatmul.mubr.msk.f32.gmra.mxu0 %vm422_vm2, %v4149_v44 }
  0xc8   :  { %754 = vmatprep.mubr.f32.mxu0 %v3928_v1 }
  0xcb   :  { %3071 = vmatmul.mubr.msk.f32.gmra.mxu0 %vm422_vm2, %v4168_v48 }
  0xcc   :  { %760 = vmatprep.mubr.f32.mxu0 %v3928_v1 }
  0xcf   :  { %3072 = vmatmul.mubr.msk.f32.gmra.mxu0 %vm422_vm2, %v4182_v51 }
  0xd0   :  { %766 = vmatprep.mubr.f32.mxu0 %v3928_v1 }
  0xd3   :  { %3073 = vmatmul.mubr.msk.f32.gmra.mxu0 %vm422_vm2, %v4190_v52 }
  0xd4   :  { %772 = vmatprep.mubr.f32.mxu0 %v3928_v1 }
  0xd7   :  { %3074 = vmatmul.mubr.msk.f32.gmra.mxu0 %vm422_vm2, %v4198_v53 }
  0xd8   :  { %778 = vmatprep.mubr.f32.mxu0 %v3928_v1 }
  0xda   :  { %v559_v37 = vpop.f32.mrf.mxu1 }
  0xdb   :  { %3075 = vmatmul.mubr.msk.f32.gmra.mxu0 %vm422_vm2, %v4206_v54  ;;  %v1158_v38 = vsub.f32 %v559_v37, %v4434_v60  ;;  %v1879_v37 = vld [vmem:[#allocation2 + $0x178] sm:$0xff] }
  0xdc   :  { %784 = vmatprep.mubr.f32.mxu0 %v3928_v1  ;;  %v561_v39 = vpop.f32.mrf.mxu1 }
  0xdd   :  { %v1270_v41 = vmul.f32 %v1158_v38, %v1158_v38  ;;  %v1159_v42 = vsub.f32 %v561_v39, %v4439_v36 }
  0xde   :  { %v565_v43 = vpop.f32.mrf.mxu1 }
  0xdf   :  { %3076 = vmatmul.mubr.msk.f32.gmra.mxu0 %vm422_vm2, %v4214_v55  ;;  %v1382_v45 = vsub.f32 0.0, %v1270_v41  ;;  %v1271_v46 = vmul.f32 %v1159_v42, %v1159_v42  ;;  %v1165_v47 = vsub.f32 %v565_v43, %v4434_v60  ;;  %v1894_v42 = vld [vmem:[#allocation2 + $0x1f0] sm:$0xff] }
  0xe0   :  { %790 = vmatprep.mubr.f32.mxu0 %v3928_v1  ;;  %v567_v49 = vpop.f32.mrf.mxu1 }
  0xe1   :  { %v1494_v50 = vmul.f32 1.28, %v1382_v45  ;;  %v1383_v62 = vsub.f32 0.0, %v1271_v46  ;;  %v1277_v63 = vmul.f32 %v1165_v47, %v1165_v47  ;;  %v1166_v0 = vsub.f32 %v567_v49, %v4439_v36  ;;  %v1878_v47 = vld [vmem:[#allocation2 + $0x170] sm:$0xff] }
  0xe2   :  { %v571_v2 = vpop.f32.mrf.mxu1 }
  0xe3   :  { %3077 = vmatmul.mubr.msk.f32.gmra.mxu0 %vm422_vm2, %v4222_v56  ;;  %v1606_v3 = vmul.f32 1.442695, %v1494_v50  ;;  %v1495_v4 = vmul.f32 1.28, %v1383_v62  ;;  %v1389_v5 = vsub.f32 0.0, %v1277_v63  ;;  %v1278_v6 = vmul.f32 %v1166_v0, %v1166_v0  ;;  %v1893_v62 = vld [vmem:[#allocation2 + $0x1e8] sm:$0xff] }
  0xe4   :  { %796 = vmatprep.mubr.f32.mxu0 %v3928_v1  ;;  %v1172_v7 = vsub.f32 %v571_v2, %v4434_v60  ;;  %v573_v8 = vpop.f32.mrf.mxu1 }
  0xe5   :  { %v1608_v9 = vmul.f32 1.442695, %v1495_v4  ;;  %v1501_v10 = vmul.f32 1.28, %v1389_v5  ;;  %v1390_v11 = vsub.f32 0.0, %v1278_v6  ;;  %3623 = vpow2.f32 %v1606_v3  ;;  %v1892_v6 = vld [vmem:[#allocation2 + $0x1e0] sm:$0xff] }
  0xe6   :  { %v1284_v12 = vmul.f32 %v1172_v7, %v1172_v7  ;;  %v1173_v13 = vsub.f32 %v573_v8, %v4439_v36  ;;  %v577_v14 = vpop.f32.mrf.mxu1 }
  0xe7   :  { %3078 = vmatmul.mubr.msk.f32.gmra.mxu0 %vm422_vm2, %v4230_v57  ;;  %3625 = vpow2.f32 %v1608_v9  ;;  %v1620_v15 = vmul.f32 1.442695, %v1501_v10  ;;  %v1502_v16 = vmul.f32 1.28, %v1390_v11  ;;  %v1179_v17 = vsub.f32 %v577_v14, %v4434_v60  ;;  %v1876_v9 = vld [vmem:[#allocation2 + $0x160] sm:$0xff] }
  0xe8   :  { %802 = vmatprep.mubr.f32.mxu0 %v3928_v1  ;;  %v1396_v18 = vsub.f32 0.0, %v1284_v12  ;;  %v1285_v19 = vmul.f32 %v1173_v13, %v1173_v13  ;;  %v579_v61 = vpop.f32.mrf.mxu1 }
  0xe9   :  { %v1622_v22 = vmul.f32 1.442695, %v1502_v16  ;;  %v1291_v23 = vmul.f32 %v1179_v17, %v1179_v17  ;;  %3627 = vpow2.f32 %v1620_v15 }
  0xea   :  { %v1508_v26 = vmul.f32 1.28, %v1396_v18  ;;  %v1397_v27 = vsub.f32 0.0, %v1285_v19  ;;  %v583_v28 = vpop.f32.mrf.mxu1 }
  0xeb   :  { %3079 = vmatmul.mubr.msk.f32.gmra.mxu0 %vm422_vm2, %v4238_v58  ;;  %3629 = vpow2.f32 %v1622_v22  ;;  %v1403_v29 = vsub.f32 0.0, %v1291_v23  ;;  %v1186_v35 = vsub.f32 %v583_v28, %v4434_v60 }
  0xec   :  { %808 = vmatprep.mubr.f32.mxu0 %v3928_v1  ;;  %v1180_v1 = vsub.f32 %v579_v61, %v4439_v36  ;;  %v1634_v38 = vmul.f32 1.442695, %v1508_v26  ;;  %v1509_v39 = vmul.f32 1.28, %v1397_v27  ;;  %v585_v41 = vpop.f32.mrf.mxu1  ;;  %v1911_v61 = vld [vmem:[#allocation2 + $0x278] sm:$0xff] }
  0xed   :  { %v1298_v45 = vmul.f32 %v1186_v35, %v1186_v35  ;;  %v1187_v46 = vsub.f32 %v585_v41, %v4439_v36  ;;  %v1875_v26 = vld [vmem:[#allocation2 + $0x158] sm:$0xff] }
  0xee   :  { %v1292_v32 = vmul.f32 %v1180_v1, %v1180_v1  ;;  %3631 = vpow2.f32 %v1634_v38  ;;  %v1636_v49 = vmul.f32 1.442695, %v1509_v39  ;;  %v589_v50 = vpop.f32.mrf.mxu1  ;;  %v1926_v1 = vld [vmem:[#allocation2 + $0x2f0] sm:$0xff] }
  0xef   :  { %3080 = vmatmul.mubr.msk.f32.gmra.mxu0 %vm422_vm2, %v4246_v59  ;;  %v1410_v2 = vsub.f32 0.0, %v1298_v45  ;;  %v1299_v3 = vmul.f32 %v1187_v46, %v1187_v46  ;;  %v1193_v4 = vsub.f32 %v589_v50, %v4434_v60 }
  0xf0   :  { %3523 = vmatprep.mubr.msk.f32.mxu0 %vm422_vm2, %v4054_v21  ;;  %v1515_v21 = vmul.f32 1.28, %v1403_v29  ;;  %v1404_v43 = vsub.f32 0.0, %v1292_v32  ;;  %3633 = vpow2.f32 %v1636_v49  ;;  %v591_v5 = vpop.f32.mrf.mxu1  ;;  %v1874_v49 = vld [vmem:[#allocation2 + $0x150] sm:$0xff] }
  0xf1   :  { %v1522_v7 = vmul.f32 1.28, %v1410_v2  ;;  %v1411_v8 = vsub.f32 0.0, %v1299_v3  ;;  %v1305_v10 = vmul.f32 %v1193_v4, %v1193_v4  ;;  %v1194_v11 = vsub.f32 %v591_v5, %v4439_v36 }
  0xf2   :  { %v1648_v63 = vmul.f32 1.442695, %v1515_v21  ;;  %v1516_v0 = vmul.f32 1.28, %v1404_v43  ;;  %v595_v12 = vpop.f32.mrf.mxu1  ;;  %v3624_v13 = vpop.eup %3623 }
  0xf3   :  { %3524 = vmatmul.mubr.msk.f32.vlgmr.msra.gmra.mxu0 %vm422_vm2, %v4070_v25  ;;  %v1877_v25 = vld [vmem:[#allocation2 + $0x168] sm:$0xff]  ;;  %v1662_v14 = vmul.f32 1.442695, %v1522_v7  ;;  %v1523_v15 = vmul.f32 1.28, %v1411_v8  ;;  %v1417_v17 = vsub.f32 0.0, %v1305_v10  ;;  %v1306_v18 = vmul.f32 %v1194_v11, %v1194_v11 }
  0xf4   :  { %3526 = vmatprep.mubr.msk.f32.mxu0 %vm422_vm2, %v4090_v30  ;;  %3276 = vmatpush3.msra.mxu0 %v1879_v37  ;;  %v1650_v30 = vmul.f32 1.442695, %v1516_v0  ;;  %3635 = vpow2.f32 %v1648_v63  ;;  %v3626_v16 = vpop.eup %3625  ;;  %v597_v19 = vpop.f32.mrf.mxu1  ;;  %v1909_v63 = vld [vmem:[#allocation2 + $0x268] sm:$0xff] }
  0xf5   :  { %3277 = vmatprep.subr.mxu0 %v1894_v42  ;;  %v1664_v20 = vmul.f32 1.442695, %v1523_v15  ;;  %v1201_v23 = vsub.f32 %v597_v19, %v4439_v36  ;;  %2045 = vmatprep.mubr.f32.mxu1 %v3626_v16  ;;  %v1529_v27 = vmul.f32 1.28, %v1417_v17  ;;  %v1418_v28 = vsub.f32 0.0, %v1306_v18  ;;  %v1910_v42 = vld [vmem:[#allocation2 + $0x270] sm:$0xff] }
  0xf6   :  { %3278 = vmatpush3.msra.mxu0 %v1878_v47  ;;  %3637 = vpow2.f32 %v1650_v30  ;;  %v601_v24 = vpop.f32.mrf.mxu1  ;;  %2046 = vmatmul.mubr.f32.vlgmr.msra.gmra.mxu1 %v3624_v13  ;;  %v3628_v29 = vpop.eup %3627  ;;  %v1925_v47 = vld [vmem:[#allocation2 + $0x2e8] sm:$0xff]  ;;  %v1908_v30 = vld [vmem:[#allocation2 + $0x260] sm:$0xff]  ;;  %v1923_v16 = vld [vmem:[#allocation2 + $0x2d8] sm:$0xff] }
  0xf7   :  { %3527 = vmatmul.mubr.msk.f32.gmra.mxu0 %vm422_vm2, %v4107_v34  ;;  %3279 = vmatprep.subr.mxu0 %v1893_v62  ;;  %v1200_v34 = vsub.f32 %v595_v12, %v4434_v60  ;;  %3639 = vpow2.f32 %v1662_v14  ;;  %v1313_v35 = vmul.f32 %v1201_v23, %v1201_v23  ;;  %v1676_v38 = vmul.f32 1.442695, %v1529_v27  ;;  %v1889_v10 = vld [vmem:[#allocation2 + $0x1c8] sm:$0xff]  ;;  %v1907_v23 = vld [vmem:[#allocation2 + $0x258] sm:$0xff] }
  0xf8   :  { %3529 = vmatprep.mubr.msk.f32.mxu0 %vm422_vm2, %v4130_v40  ;;  %3280 = vmatpush3.msra.mxu0 %v1877_v25  ;;  %v1891_v40 = vld [vmem:[#allocation2 + $0x1d8] sm:$0xff]  ;;  %3641 = vpow2.f32 %v1664_v20  ;;  %v3630_v37 = vpop.eup %3629  ;;  %v1530_v39 = vmul.f32 1.28, %v1418_v28  ;;  %v603_v41 = vpop.f32.mrf.mxu1 }
  0xf9   :  { %3281 = vmatprep.subr.mxu0 %v1892_v6  ;;  %v1312_v22 = vmul.f32 %v1200_v34, %v1200_v34  ;;  %3356 = vmatpush3.msra.mxu1 %v1911_v61  ;;  %v1425_v43 = vsub.f32 0.0, %v1313_v35  ;;  %v1208_v46 = vsub.f32 %v603_v41, %v4439_v36  ;;  %3643 = vpow2.f32 %v1676_v38  ;;  %v1924_v6 = vld [vmem:[#allocation2 + $0x2e0] sm:$0xff]  ;;  %v1922_v35 = vld [vmem:[#allocation2 + $0x2d0] sm:$0xff] }
  0xfa   :  { %3282 = vmatpush3.msra.mxu0 %v1876_v9  ;;  %3357 = vmatprep.subr.mxu1 %v1926_v1  ;;  %v1678_v50 = vmul.f32 1.442695, %v1530_v39  ;;  %v607_v62 = vpop.f32.mrf.mxu1  ;;  %v1888_v1 = vld [vmem:[#allocation2 + $0x1c0] sm:$0xff] }
  0xfb   :  { %3530 = vmatmul.mubr.msk.f32.gmra.mxu0 %vm422_vm2, %v4149_v44  ;;  %v1424_v32 = vsub.f32 0.0, %v1312_v22  ;;  %v1207_v44 = vsub.f32 %v601_v24, %v4434_v60  ;;  %3283 = vmatprep.subr.mxu0 %v1891_v40  ;;  %v3632_v0 = vpop.eup %3631  ;;  %v1537_v3 = vmul.f32 1.28, %v1425_v43  ;;  %v1320_v25 = vmul.f32 %v1208_v46, %v1208_v46  ;;  %v1906_v43 = vld [vmem:[#allocation2 + $0x250] sm:$0xff] }
  0xfc   :  { %3532 = vmatprep.mubr.msk.f32.mxu0 %vm422_vm2, %v4168_v48  ;;  %3284 = vmatpush3.msra.mxu0 %v1875_v26  ;;  %v1890_v48 = vld [vmem:[#allocation2 + $0x1d0] sm:$0xff]  ;;  %3645 = vpow2.f32 %v1678_v50  ;;  %v1214_v4 = vsub.f32 %v607_v62, %v4434_v60  ;;  %v609_v5 = vpop.f32.mrf.mxu1 }
  0xfd   :  { %v1536_v21 = vmul.f32 1.28, %v1424_v32  ;;  %v1319_v45 = vmul.f32 %v1207_v44, %v1207_v44  ;;  %2050 = vmatprep.mubr.f32.mxu1 %v3630_v37  ;;  %3358 = vmatpush3.msra.mxu1 %v1910_v42  ;;  %v1692_v7 = vmul.f32 1.442695, %v1537_v3  ;;  %v1432_v9 = vsub.f32 0.0, %v1320_v25  ;;  %v1920_v25 = vld [vmem:[#allocation2 + $0x2c0] sm:$0xff] }
  0xfe   :  { %2051 = vmatmul.mubr.f32.gmra.mxu1 %v3628_v29  ;;  %3285 = vmatprep.subr.mxu0 %v1890_v48  ;;  %v1326_v11 = vmul.f32 %v1214_v4, %v1214_v4  ;;  %v1215_v12 = vsub.f32 %v609_v5, %v4439_v36  ;;  %v613_v13 = vpop.f32.mrf.mxu1 }
  0xff   :  { %3533 = vmatmul.mubr.msk.f32.gmra.mxu0 %vm422_vm2, %v4182_v51  ;;  %v1690_v2 = vmul.f32 1.442695, %v1536_v21  ;;  %v1431_v51 = vsub.f32 0.0, %v1319_v45  ;;  %3359 = vmatprep.subr.mxu1 %v1925_v47  ;;  %v1544_v34 = vmul.f32 1.28, %v1432_v9  ;;  %v1887_v45 = vld [vmem:[#allocation2 + $0x1b8] sm:$0xff] }
 0x100   :  { %3535 = vmatprep.mubr.msk.f32.mxu0 %vm422_vm2, %v4190_v52  ;;  %3286 = vmatpush3.msra.mxu0 %v1874_v49  ;;  %v3634_v52 = vpop.eup %3633  ;;  %v1438_v18 = vsub.f32 0.0, %v1326_v11  ;;  %v1327_v19 = vmul.f32 %v1215_v12, %v1215_v12  ;;  %v615_v61 = vpop.f32.mrf.mxu1  ;;  %v1921_v49 = vld [vmem:[#allocation2 + $0x2c8] sm:$0xff] }
 0x101   :  { %v1543_v8 = vmul.f32 1.28, %v1431_v51  ;;  %3360 = vmatpush3.msra.mxu1 %v1909_v63  ;;  %3647 = vpow2.f32 %v1690_v2  ;;  %2055 = vmatprep.mubr.f32.mxu1 %v3634_v52  ;;  %v3636_v14 = vpop.eup %3635  ;;  %v1706_v40 = vmul.f32 1.442695, %v1544_v34  ;;  %v1222_v22 = vsub.f32 %v615_v61, %v4439_v36  ;;  %v1905_v2 = vld [vmem:[#allocation2 + $0x248] sm:$0xff]  ;;  %v1886_v52 = vld [vmem:[#allocation2 + $0x1b0] sm:$0xff] }
 0x102   :  { %3649 = vpow2.f32 %v1692_v7  ;;  %2056 = vmatmul.mubr.f32.gmra.mxu1 %v3632_v0  ;;  %3361 = vmatprep.subr.mxu1 %v1924_v6  ;;  %v1550_v26 = vmul.f32 1.28, %v1438_v18  ;;  %v1439_v27 = vsub.f32 0.0, %v1327_v19  ;;  %v619_v28 = vpop.f32.mrf.mxu1  ;;  %v1885_v18 = vld [vmem:[#allocation2 + $0x1a8] sm:$0xff] }
 0x103   :  { %3536 = vmatmul.mubr.msk.f32.gmra.mxu0 %vm422_vm2, %v4198_v53  ;;  %v1704_v15 = vmul.f32 1.442695, %v1543_v8  ;;  %v1221_v53 = vsub.f32 %v613_v13, %v4434_v60  ;;  %v3638_v17 = vpop.eup %3637  ;;  %3362 = vmatpush3.msra.mxu1 %v1908_v30  ;;  %v1334_v32 = vmul.f32 %v1222_v22, %v1222_v22 }
 0x104   :  { %3538 = vmatprep.mubr.msk.f32.mxu0 %vm422_vm2, %v4206_v54  ;;  %3287 = vmatprep.subr.mxu0 %v1889_v10  ;;  %v1873_v54 = vld [vmem:[#allocation2 + $0x148] sm:$0xff]  ;;  %v3640_v24 = vpop.eup %3639  ;;  %v1718_v37 = vmul.f32 1.442695, %v1550_v26  ;;  %v1551_v38 = vmul.f32 1.28, %v1439_v27  ;;  %v621_v39 = vpop.f32.mrf.mxu1  ;;  %v1904_v10 = vld [vmem:[#allocation2 + $0x240] sm:$0xff] }
 0x105   :  { %v1333_v20 = vmul.f32 %v1221_v53, %v1221_v53  ;;  %2060 = vmatprep.mubr.f32.mxu1 %v3638_v17  ;;  %3651 = vpow2.f32 %v1704_v15  ;;  %3363 = vmatprep.subr.mxu1 %v1923_v16  ;;  %v3642_v44 = vpop.eup %3641  ;;  %v1446_v42 = vsub.f32 0.0, %v1334_v32  ;;  %v1229_v21 = vsub.f32 %v621_v39, %v4439_v36  ;;  %v1919_v15 = vld [vmem:[#allocation2 + $0x2b8] sm:$0xff]  ;;  %v1918_v26 = vld [vmem:[#allocation2 + $0x2b0] sm:$0xff]  ;;  %v1884_v32 = vld [vmem:[#allocation2 + $0x1a0] sm:$0xff] }
 0x106   :  { %3653 = vpow2.f32 %v1706_v40  ;;  %2061 = vmatmul.mubr.f32.gmra.mxu1 %v3636_v14  ;;  %3288 = vmatpush3.msra.mxu0 %v1873_v54  ;;  %v1720_v46 = vmul.f32 1.442695, %v1551_v38  ;;  %v625_v47 = vpop.f32.mrf.mxu1  ;;  %v3644_v50 = vpop.eup %3643  ;;  %v1903_v40 = vld [vmem:[#allocation2 + $0x238] sm:$0xff]  ;;  %v1868_v39 = vld [vmem:[#allocation2 + $0x120] sm:$0xff] }
 0x107   :  { %3539 = vmatmul.mubr.msk.f32.gmra.mxu0 %vm422_vm2, %v4214_v55  ;;  %v1445_v29 = vsub.f32 0.0, %v1333_v20  ;;  %v1228_v55 = vsub.f32 %v619_v28, %v4434_v60  ;;  %3364 = vmatpush3.msra.mxu1 %v1907_v23  ;;  %3655 = vpow2.f32 %v1718_v37  ;;  %v1558_v63 = vmul.f32 1.28, %v1446_v42  ;;  %v1869_v20 = vld [vmem:[#allocation2 + $0x128] sm:$0xff] }
 0x108   :  { %3541 = vmatprep.mubr.msk.f32.mxu0 %vm422_vm2, %v4222_v56  ;;  %3289 = vmatprep.subr.mxu0 %v1888_v1  ;;  %v1872_v56 = vld [vmem:[#allocation2 + $0x140] sm:$0xff]  ;;  %v1341_v0 = vmul.f32 %v1229_v21, %v1229_v21  ;;  %3657 = vpow2.f32 %v1720_v46  ;;  %v1235_v3 = vsub.f32 %v625_v47, %v4434_v60  ;;  %v627_v51 = vpop.f32.mrf.mxu1  ;;  %v1917_v21 = vld [vmem:[#allocation2 + $0x2a8] sm:$0xff]  ;;  %v1141_v47 = vsub.s32 4, %v4418_v31 }
 0x109   :  { %v1557_v41 = vmul.f32 1.28, %v1445_v29  ;;  %v1340_v48 = vmul.f32 %v1228_v55, %v1228_v55  ;;  %2065 = vmatprep.mubr.f32.mxu1 %v3642_v44  ;;  %3365 = vmatprep.subr.mxu1 %v1922_v35  ;;  %v3646_v4 = vpop.eup %3645  ;;  %v1734_v5 = vmul.f32 1.442695, %v1558_v63  ;;  %v1236_v8 = vsub.f32 %v627_v51, %v4439_v36  ;;  %v1902_v55 = vld [vmem:[#allocation2 + $0x230] sm:$0xff] }
 0x10a   :  { %2066 = vmatmul.mubr.f32.gmra.mxu1 %v3640_v24  ;;  %3290 = vmatpush3.msra.mxu0 %v1872_v56  ;;  %v1453_v30 = vsub.f32 0.0, %v1341_v0  ;;  %v1347_v7 = vmul.f32 %v1235_v3, %v1235_v3  ;;  %v631_v9 = vpop.f32.mrf.mxu1  ;;  %v1916_v3 = vld [vmem:[#allocation2 + $0x2a0] sm:$0xff] }
 0x10b   :  { %3542 = vmatmul.mubr.msk.f32.gmra.mxu0 %vm422_vm2, %v4230_v57  ;;  %v1732_v62 = vmul.f32 1.442695, %v1557_v41  ;;  %v1452_v57 = vsub.f32 0.0, %v1340_v48  ;;  %3366 = vmatpush3.msra.mxu1 %v1906_v43  ;;  %v1242_v14 = vsub.f32 %v631_v9, %v4434_v60  ;;  %v1348_v16 = vmul.f32 %v1236_v8, %v1236_v8  ;;  %v1883_v43 = vld [vmem:[#allocation2 + $0x198] sm:$0xff]  ;;  %v1866_v8 = vld [vmem:[#allocation2 + $0x110] sm:$0xff] }
 0x10c   :  { %3544 = vmatprep.mubr.msk.f32.mxu0 %vm422_vm2, %v4238_v58  ;;  %3291 = vmatprep.subr.mxu0 %v1887_v45  ;;  %v1871_v58 = vld [vmem:[#allocation2 + $0x138] sm:$0xff]  ;;  %v1565_v13 = vmul.f32 1.28, %v1453_v30  ;;  %v1459_v53 = vsub.f32 0.0, %v1347_v7  ;;  %v633_v17 = vpop.f32.mrf.mxu1 }
 0x10d   :  { %v1564_v6 = vmul.f32 1.28, %v1452_v57  ;;  %3367 = vmatprep.subr.mxu1 %v1921_v49  ;;  %3659 = vpow2.f32 %v1732_v62  ;;  %2070 = vmatprep.mubr.f32.mxu1 %v3646_v4  ;;  %v1354_v61 = vmul.f32 %v1242_v14, %v1242_v14  ;;  %v1243_v54 = vsub.f32 %v633_v17, %v4439_v36  ;;  %v1901_v49 = vld [vmem:[#allocation2 + $0x228] sm:$0xff]  ;;  %v1882_v4 = vld [vmem:[#allocation2 + $0x190] sm:$0xff] }
 0x10e   :  { %3368 = vmatpush3.msra.mxu1 %v1905_v2  ;;  %v3648_v11 = vpop.eup %3647  ;;  %3661 = vpow2.f32 %v1734_v5  ;;  %3292 = vmatpush3.msra.mxu0 %v1871_v58  ;;  %v1748_v19 = vmul.f32 1.442695, %v1565_v13  ;;  %v1571_v22 = vmul.f32 1.28, %v1459_v53  ;;  %v1460_v23 = vsub.f32 0.0, %v1348_v16  ;;  %v637_v1 = vpop.f32.mrf.mxu1  ;;  %v1900_v5 = vld [vmem:[#allocation2 + $0x220] sm:$0xff] }
 0x10f   :  { %3545 = vmatmul.mubr.msk.f32.gmra.mxu0 %vm422_vm2, %v4246_v59  ;;  %v1746_v12 = vmul.f32 1.442695, %v1564_v6  ;;  %2071 = vmatmul.mubr.f32.gmra.mxu1 %v3644_v50  ;;  %v1870_v59 = vld [vmem:[#allocation2 + $0x130] sm:$0xff]  ;;  %v3650_v34 = vpop.eup %3649  ;;  %v1466_v28 = vsub.f32 0.0, %v1354_v61  ;;  %v1355_v24 = vmul.f32 %v1243_v54, %v1243_v54  ;;  %v1249_v29 = vsub.f32 %v637_v1, %v4434_v60  ;;  %v1867_v50 = vld [vmem:[#allocation2 + $0x118] sm:$0xff]  ;;  %v1881_v53 = vld [vmem:[#allocation2 + $0x188] sm:$0xff] }
 0x110   :  { %3369 = vmatprep.subr.mxu1 %v1920_v25  ;;  %3293 = vmatprep.subr.mxu0 %v1886_v52  ;;  %v1760_v44 = vmul.f32 1.442695, %v1571_v22  ;;  %v1572_v37 = vmul.f32 1.28, %v1460_v23  ;;  %v639_v38 = vpop.f32.mrf.mxu1  ;;  %v1145_v25 = vsub.s32 5, %v4418_v31  ;;  %v1915_v13 = vld [vmem:[#allocation2 + $0x298] sm:$0xff] }
 0x111   :  { %2075 = vmatprep.mubr.f32.mxu1 %v3650_v34  ;;  %3370 = vmatpush3.msra.mxu1 %v1904_v10  ;;  %3663 = vpow2.f32 %v1746_v12  ;;  %v1578_v56 = vmul.f32 1.28, %v1466_v28  ;;  %v1467_v41 = vsub.f32 0.0, %v1355_v24  ;;  %v1361_v42 = vmul.f32 %v1249_v29, %v1249_v29  ;;  %v1899_v16 = vld [vmem:[#allocation2 + $0x218] sm:$0xff]  ;;  %v1865_v54 = vld [vmem:[#allocation2 + $0x108] sm:$0xff]  ;;  %v1880_v1 = vld [vmem:[#allocation2 + $0x180] sm:$0xff] }
 0x112   :  { %3294 = vmatpush3.msra.mxu0 %v1870_v59  ;;  %3371 = vmatprep.subr.mxu1 %v1919_v15  ;;  %v3652_v27 = vpop.eup %3651  ;;  %3665 = vpow2.f32 %v1748_v19  ;;  %v1250_v48 = vsub.f32 %v639_v38, %v4439_v36  ;;  %v1762_v45 = vmul.f32 1.442695, %v1572_v37  ;;  %v643_v46 = vpop.f32.mrf.mxu1  ;;  %v4518_v12 = vrot.slane %v4427_v33, %v1141_v47  ;;  %v1898_v24 = vld [vmem:[#allocation2 + $0x210] sm:$0xff]  ;;  %v1912_v47 = vld [vmem:[#allocation2 + $0x280] sm:$0xff] }
 0x113   :  { %2076 = vmatmul.mubr.f32.gmra.mxu1 %v3648_v11  ;;  %3295 = vmatprep.subr.mxu0 %v1885_v18  ;;  %v3654_v35 = vpop.eup %3653  ;;  %3667 = vpow2.f32 %v1760_v44  ;;  %v1774_v63 = vmul.f32 1.442695, %v1578_v56  ;;  %v1579_v57 = vmul.f32 1.28, %v1467_v41  ;;  %v1473_v0 = vsub.f32 0.0, %v1361_v42  ;;  %v4526_v56 = vld [vmem:[#allocation2 + $0x318] sm:$0xff] }
 0x114   :  { %3372 = vmatpush3.msra.mxu1 %v1903_v40  ;;  %3296 = vmatpush3.msra.mxu0 %v1869_v20  ;;  %v3656_v62 = vpop.eup %3655  ;;  %v1362_v2 = vmul.f32 %v1250_v48, %v1250_v48  ;;  %3669 = vpow2.f32 %v1762_v45  ;;  %v1256_v51 = vsub.f32 %v643_v46, %v4434_v60  ;;  %v645_v58 = vpop.f32.mrf.mxu1  ;;  %v4523_v23 = vrot.slane %v4427_v33, %v1145_v25  ;;  %v1864_v33 = vld [vmem:[#allocation2 + $0x100] sm:$0xff] }
 0x115   :  { %2080 = vmatprep.mubr.f32.mxu1 %v3654_v35  ;;  %3373 = vmatprep.subr.mxu1 %v1918_v26  ;;  %v3658_v6 = vpop.eup %3657  ;;  %v1776_v30 = vmul.f32 1.442695, %v1579_v57  ;;  %v1585_v52 = vmul.f32 1.28, %v1473_v0  ;;  %3671 = vpow2.f32 %v1774_v63  ;;  %v1257_v10 = vsub.f32 %v645_v58, %v4439_v36  ;;  %v1913_v35 = vld [vmem:[#allocation2 + $0x288] sm:$0xff]  ;;  %v1896_v0 = vld [vmem:[#allocation2 + $0x200] sm:$0xff] }
 0x116   :  { %3297 = vmatprep.subr.mxu0 %v1884_v32  ;;  %3374 = vmatpush3.msra.mxu1 %v1902_v55  ;;  %v1474_v7 = vsub.f32 0.0, %v1362_v2  ;;  %v1368_v9 = vmul.f32 %v1256_v51, %v1256_v51  ;;  %v649_v11 = vpop.f32.mrf.mxu1  ;;  %vm2561_vm2 = vcmask 130048  }
 0x117   :  { %2081 = vmatmul.mubr.f32.gmra.mxu1 %v3652_v27  ;;  %3298 = vmatpush3.msra.mxu0 %v1868_v39  ;;  %3673 = vpow2.f32 %v1776_v30  ;;  %v1788_v59 = vmul.f32 1.442695, %v1585_v52  ;;  %v1263_v34 = vsub.f32 %v649_v11, %v4434_v60  ;;  %v1369_v19 = vmul.f32 %v1257_v10, %v1257_v10  ;;  %v1914_v60 = vld [vmem:[#allocation2 + $0x290] sm:$0xff] }
 0x118   :  { %3375 = vmatprep.subr.mxu1 %v1917_v21  ;;  %3299 = vmatprep.subr.mxu0 %v1883_v43  ;;  %v1586_v15 = vmul.f32 1.28, %v1474_v7  ;;  %v1480_v18 = vsub.f32 0.0, %v1368_v9  ;;  %v651_v61 = vpop.f32.mrf.mxu1  ;;  %v1897_v43 = vld [vmem:[#allocation2 + $0x208] sm:$0xff] }
 0x119   :  { %3376 = vmatpush3.msra.mxu1 %v1901_v49  ;;  %3300 = vmatpush3.msra.mxu0 %v1867_v50  ;;  %v1375_v20 = vmul.f32 %v1263_v34, %v1263_v34  ;;  %v1264_v22 = vsub.f32 %v651_v61, %v4439_v36  ;;  %3675 = vpow2.f32 %v1788_v59  ;;  %v1481_v27 = vsub.f32 0.0, %v1369_v19 }
 0x11a   :  { %2085 = vmatprep.mubr.f32.mxu1 %v3658_v6  ;;  %3377 = vmatprep.subr.mxu1 %v1916_v3  ;;  %v3660_v14 = vpop.eup %3659  ;;  %v1790_v40 = vmul.f32 1.442695, %v1586_v15  ;;  %v1592_v26 = vmul.f32 1.28, %v1480_v18  ;;  %v881_v28 = vpop.f32.mrf.mxu1 }
 0x11b   :  { %2086 = vmatmul.mubr.f32.gmra.mxu1 %v3656_v62  ;;  %3301 = vmatprep.subr.mxu0 %v1882_v4  ;;  %v3662_v17 = vpop.eup %3661  ;;  %v1487_v32 = vsub.f32 0.0, %v1375_v20  ;;  %v1376_v55 = vmul.f32 %v1264_v22, %v1264_v22  ;;  %v1162_v36 = vsub.f32 %v881_v28, %v4518_v12  ;;  %v1593_v38 = vmul.f32 1.28, %v1481_v27 }
 0x11c   :  { %3378 = vmatpush3.msra.mxu1 %v1900_v5  ;;  %3302 = vmatpush3.msra.mxu0 %v1866_v8  ;;  %3677 = vpow2.f32 %v1790_v40  ;;  %v1802_v37 = vmul.f32 1.442695, %v1592_v26  ;;  %v883_v39 = vpop.f32.mrf.mxu1 }
 0x11d   :  { %2090 = vmatprep.mubr.f32.mxu1 %v3662_v17  ;;  %3379 = vmatprep.subr.mxu1 %v1915_v13  ;;  %v1599_v41 = vmul.f32 1.28, %v1487_v32  ;;  %v1488_v42 = vsub.f32 0.0, %v1376_v55  ;;  %v1274_v48 = vmul.f32 %v1162_v36, %v1162_v36  ;;  %v1163_v21 = vsub.f32 %v883_v39, %v4523_v23 }
 0x11e   :  { %3303 = vmatprep.subr.mxu0 %v1881_v53  ;;  %3380 = vmatpush3.msra.mxu1 %v1899_v16  ;;  %v3664_v29 = vpop.eup %3663  ;;  %3679 = vpow2.f32 %v1802_v37  ;;  %v1804_v45 = vmul.f32 1.442695, %v1593_v38  ;;  %v887_v46 = vpop.f32.mrf.mxu1 }
 0x11f   :  { %2091 = vmatmul.mubr.f32.gmra.mxu1 %v3660_v14  ;;  %3304 = vmatpush3.msra.mxu0 %v1865_v54  ;;  %v3666_v44 = vpop.eup %3665  ;;  %v1816_v50 = vmul.f32 1.442695, %v1599_v41  ;;  %v1600_v62 = vmul.f32 1.28, %v1488_v42  ;;  %v1386_v63 = vsub.f32 0.0, %v1274_v48  ;;  %v1275_v57 = vmul.f32 %v1163_v21, %v1163_v21 }
 0x120   :  { %3381 = vmatprep.subr.mxu1 %v1914_v60  ;;  %3305 = vmatprep.subr.mxu0 %v1880_v1  ;;  %v3668_v49 = vpop.eup %3667  ;;  %3681 = vpow2.f32 %v1804_v45  ;;  %v1169_v2 = vsub.f32 %v887_v46, %v4518_v12  ;;  %v889_v3 = vpop.f32.mrf.mxu1 }
 0x121   :  { %2095 = vmatprep.mubr.f32.mxu1 %v3666_v44  ;;  %3382 = vmatpush3.msra.mxu1 %v1898_v24  ;;  %v3670_v51 = vpop.eup %3669  ;;  %v1818_v58 = vmul.f32 1.442695, %v1600_v62  ;;  %v1498_v25 = vmul.f32 1.28, %v1386_v63  ;;  %v1387_v4 = vsub.f32 0.0, %v1275_v57  ;;  %3683 = vpow2.f32 %v1816_v50 }
 0x122   :  { %3306 = vmatpush3.msra.mxu0 %v1864_v33  ;;  %3383 = vmatprep.subr.mxu1 %v1913_v35  ;;  %v1281_v5 = vmul.f32 %v1169_v2, %v1169_v2  ;;  %v1170_v6 = vsub.f32 %v889_v3, %v4523_v23  ;;  %v893_v30 = vpop.f32.mrf.mxu1  ;;  %v3672_v52 = vpop.eup %3671 }
 0x123   :  { %2096 = vmatmul.mubr.f32.gmra.mxu1 %v3664_v29  ;;  %3547 = vmatprep.subr.mxu0 %v4526_v56  ;;  %3685 = vpow2.f32 %v1818_v58  ;;  %v1614_v7 = vmul.f32 1.442695, %v1498_v25  ;;  %v1499_v8 = vmul.f32 1.28, %v1387_v4  ;;  %v1176_v9 = vsub.f32 %v893_v30, %v4518_v12 }
 0x124   :  { %3384 = vmatpush3.msra.mxu1 %v1897_v43  ;;  %2100 = vmatprep.mubr.f32.mxu1 %v3670_v51  ;;  %v3674_v10 = vpop.eup %3673  ;;  %v1393_v11 = vsub.f32 0.0, %v1281_v5  ;;  %v1282_v13 = vmul.f32 %v1170_v6, %v1170_v6  ;;  %v895_v14 = vpop.f32.mrf.mxu1 }
 0x125   :  { %3385 = vmatprep.subr.mxu1 %v1912_v47  ;;  %v1616_v59 = vmul.f32 1.442695, %v1499_v8  ;;  %v1288_v15 = vmul.f32 %v1176_v9, %v1176_v9  ;;  %v1177_v34 = vsub.f32 %v895_v14, %v4523_v23  ;;  %3687 = vpow2.f32 %v1614_v7 }
 0x126   :  { %3386 = vmatpush3.msra.mxu1 %v1896_v0  ;;  %v1505_v53 = vmul.f32 1.28, %v1393_v11  ;;  %v1394_v16 = vsub.f32 0.0, %v1282_v13  ;;  %v899_v17 = vpop.f32.mrf.mxu1  ;;  %v3676_v18 = vpop.eup %3675 }
 0x127   :  { %2101 = vmatmul.mubr.f32.gmra.mxu1 %v3668_v49  ;;  %3607 = vmatprep.subr.mxu1 %v4526_v56  ;;  %3689 = vpow2.f32 %v1616_v59  ;;  %v1400_v19 = vsub.f32 0.0, %v1288_v15  ;;  %v1289_v61 = vmul.f32 %v1177_v34, %v1177_v34  ;;  %v1183_v54 = vsub.f32 %v899_v17, %v4518_v12 }
 0x128   :  { %2105 = vmatprep.mubr.f32.mxu1 %v3674_v10  ;;  %v1628_v20 = vmul.f32 1.442695, %v1505_v53  ;;  %v1506_v22 = vmul.f32 1.28, %v1394_v16  ;;  %v901_v60 = vpop.f32.mrf.mxu1 }
 0x129   :  { %v3678_v40 = vpop.eup %3677  ;;  %v1512_v1 = vmul.f32 1.28, %v1400_v19  ;;  %v1401_v26 = vsub.f32 0.0, %v1289_v61  ;;  %v1295_v27 = vmul.f32 %v1183_v54, %v1183_v54  ;;  %v1184_v28 = vsub.f32 %v901_v60, %v4523_v23  ;;  %v4544_v54 = vld [vmem:[#allocation2 + $0x310] sm:$0xff] }
 0x12a   :  { %3691 = vpow2.f32 %v1628_v20  ;;  %v1630_v24 = vmul.f32 1.442695, %v1506_v22  ;;  %v905_v29 = vpop.f32.mrf.mxu1 }
 0x12b   :  { %2106 = vmatmul.mubr.f32.gmra.mxu1 %v3672_v52  ;;  %v3680_v32 = vpop.eup %3679  ;;  %v1642_v55 = vmul.f32 1.442695, %v1512_v1  ;;  %v1513_v36 = vmul.f32 1.28, %v1401_v26  ;;  %v1407_v33 = vsub.f32 0.0, %v1295_v27  ;;  %v1296_v35 = vmul.f32 %v1184_v28, %v1184_v28  ;;  %v4549_v28 = vld [vmem:[#allocation2 + $0x308] sm:$0xff] }
 0x12c   :  { %2110 = vmatprep.mubr.f32.mxu1 %v3678_v40  ;;  %3693 = vpow2.f32 %v1630_v24  ;;  %v1190_v44 = vsub.f32 %v905_v29, %v4518_v12  ;;  %v907_v37 = vpop.f32.mrf.mxu1 }
 0x12d   :  { %v3682_v38 = vpop.eup %3681  ;;  %v1644_v39 = vmul.f32 1.442695, %v1513_v36  ;;  %v1519_v41 = vmul.f32 1.28, %v1407_v33  ;;  %v1408_v42 = vsub.f32 0.0, %v1296_v35  ;;  %3695 = vpow2.f32 %v1642_v55 }
 0x12e   :  { %v1302_v48 = vmul.f32 %v1190_v44, %v1190_v44  ;;  %v1191_v21 = vsub.f32 %v907_v37, %v4523_v23  ;;  %v911_v43 = vpop.f32.mrf.mxu1  ;;  %v3684_v45 = vpop.eup %3683 }
 0x12f   :  { %2111 = vmatmul.mubr.f32.gmra.mxu1 %v3676_v18  ;;  %3697 = vpow2.f32 %v1644_v39  ;;  %v1656_v46 = vmul.f32 1.442695, %v1519_v41  ;;  %v1520_v47 = vmul.f32 1.28, %v1408_v42  ;;  %v1197_v49 = vsub.f32 %v911_v43, %v4518_v12 }
 0x130   :  { %2115 = vmatprep.mubr.f32.mxu1 %v3682_v38  ;;  %v3686_v50 = vpop.eup %3685  ;;  %v1414_v62 = vsub.f32 0.0, %v1302_v48  ;;  %v1303_v63 = vmul.f32 %v1191_v21, %v1191_v21  ;;  %v913_v57 = vpop.f32.mrf.mxu1 }
 0x131   :  { %v1658_v0 = vmul.f32 1.442695, %v1520_v47  ;;  %v1309_v2 = vmul.f32 %v1197_v49, %v1197_v49  ;;  %v1198_v3 = vsub.f32 %v913_v57, %v4523_v23  ;;  %3699 = vpow2.f32 %v1656_v46 }
 0x132   :  { %v1526_v51 = vmul.f32 1.28, %v1414_v62  ;;  %v1415_v58 = vsub.f32 0.0, %v1303_v63  ;;  %v917_v25 = vpop.f32.mrf.mxu1  ;;  %v3688_v4 = vpop.eup %3687 }
 0x133   :  { %2116 = vmatmul.mubr.f32.gmra.mxu1 %v3680_v32  ;;  %3701 = vpow2.f32 %v1658_v0  ;;  %v1421_v5 = vsub.f32 0.0, %v1309_v2  ;;  %v1310_v6 = vmul.f32 %v1198_v3, %v1198_v3  ;;  %v1204_v30 = vsub.f32 %v917_v25, %v4518_v12 }
 0x134   :  { %2120 = vmatprep.mubr.f32.mxu1 %v3686_v50  ;;  %v3690_v52 = vpop.eup %3689  ;;  %v1670_v7 = vmul.f32 1.442695, %v1526_v51  ;;  %v1527_v8 = vmul.f32 1.28, %v1415_v58  ;;  %v919_v9 = vpop.f32.mrf.mxu1  ;;  %v4558_v58 = vld [vmem:[#allocation2 + $0x300] sm:$0xff] }
 0x135   :  { %v1533_v10 = vmul.f32 1.28, %v1421_v5  ;;  %v1422_v11 = vsub.f32 0.0, %v1310_v6  ;;  %v1316_v13 = vmul.f32 %v1204_v30, %v1204_v30  ;;  %v1205_v14 = vsub.f32 %v919_v9, %v4523_v23 }
 0x136   :  { %3703 = vpow2.f32 %v1670_v7  ;;  %v1672_v59 = vmul.f32 1.442695, %v1527_v8  ;;  %v923_v15 = vpop.f32.mrf.mxu1 }
 0x137   :  { %2121 = vmatmul.mubr.f32.gmra.mxu1 %v3684_v45  ;;  %v3692_v34 = vpop.eup %3691  ;;  %v1684_v53 = vmul.f32 1.442695, %v1533_v10  ;;  %v1534_v16 = vmul.f32 1.28, %v1422_v11  ;;  %v1428_v17 = vsub.f32 0.0, %v1316_v13  ;;  %v1317_v18 = vmul.f32 %v1205_v14, %v1205_v14 }
 0x138   :  { %2335 = vmatprep.mubr.f32.mxu1 %v3690_v52  ;;  %3705 = vpow2.f32 %v1672_v59  ;;  %v1211_v19 = vsub.f32 %v923_v15, %v4518_v12  ;;  %v925_v61 = vpop.f32.mrf.mxu1 }
 0x139   :  { %v3694_v40 = vpop.eup %3693  ;;  %v1686_v20 = vmul.f32 1.442695, %v1534_v16  ;;  %v1540_v22 = vmul.f32 1.28, %v1428_v17  ;;  %v1429_v60 = vsub.f32 0.0, %v1317_v18  ;;  %3707 = vpow2.f32 %v1684_v53 }
 0x13a   :  { %v1323_v1 = vmul.f32 %v1211_v19, %v1211_v19  ;;  %v1212_v26 = vsub.f32 %v925_v61, %v4523_v23  ;;  %v929_v27 = vpop.f32.mrf.mxu1  ;;  %v3696_v24 = vpop.eup %3695 }
 0x13b   :  { %2336 = vmatmul.mubr.f32.vlgmr.msra.gmra.mxu1 %v3688_v4  ;;  %3709 = vpow2.f32 %v1686_v20  ;;  %v1698_v29 = vmul.f32 1.442695, %v1540_v22  ;;  %v1541_v32 = vmul.f32 1.28, %v1429_v60  ;;  %v1218_v55 = vsub.f32 %v929_v27, %v4518_v12 }
 0x13c   :  { %3611 = vmatpush3.msra.mxu1 %v4526_v56  ;;  %2340 = vmatprep.mubr.f32.mxu1 %v3694_v40  ;;  %v3698_v36 = vpop.eup %3697  ;;  %v1435_v33 = vsub.f32 0.0, %v1323_v1  ;;  %v1324_v35 = vmul.f32 %v1212_v26, %v1212_v26  ;;  %v931_v44 = vpop.f32.mrf.mxu1 }
 0x13d   :  { %3608 = vmatprep.subr.mxu1 %v4544_v54  ;;  %v1700_v37 = vmul.f32 1.442695, %v1541_v32  ;;  %v1330_v38 = vmul.f32 %v1218_v55, %v1218_v55  ;;  %v1219_v39 = vsub.f32 %v931_v44, %v4523_v23  ;;  %3711 = vpow2.f32 %v1698_v29 }
 0x13e   :  { %3612 = vmatpush3.msra.mxu1 %v4544_v54  ;;  %v1547_v41 = vmul.f32 1.28, %v1435_v33  ;;  %v1436_v42 = vsub.f32 0.0, %v1324_v35  ;;  %v935_v48 = vpop.f32.mrf.mxu1  ;;  %v3700_v21 = vpop.eup %3699 }
 0x13f   :  { %2341 = vmatmul.mubr.f32.gmra.mxu1 %v3692_v34  ;;  %3609 = vmatprep.subr.mxu1 %v4549_v28  ;;  %3713 = vpow2.f32 %v1700_v37  ;;  %v1442_v43 = vsub.f32 0.0, %v1330_v38  ;;  %v1331_v45 = vmul.f32 %v1219_v39, %v1219_v39  ;;  %v1225_v46 = vsub.f32 %v935_v48, %v4518_v12 }
 0x140   :  { %3613 = vmatpush3.msra.mxu1 %v4549_v28  ;;  %2345 = vmatprep.mubr.f32.mxu1 %v3698_v36  ;;  %v3702_v47 = vpop.eup %3701  ;;  %v1712_v49 = vmul.f32 1.442695, %v1547_v41  ;;  %v1548_v50 = vmul.f32 1.28, %v1436_v42  ;;  %v937_v62 = vpop.f32.mrf.mxu1 }
 0x141   :  { %v1554_v63 = vmul.f32 1.28, %v1442_v43  ;;  %v1443_v57 = vsub.f32 0.0, %v1331_v45  ;;  %v1337_v0 = vmul.f32 %v1225_v46, %v1225_v46  ;;  %v1226_v2 = vsub.f32 %v937_v62, %v4523_v23  ;;  %3610 = vmatprep.subr.mxu1 %v4558_v58 }
 0x142   :  { %3715 = vpow2.f32 %v1712_v49  ;;  %v1714_v3 = vmul.f32 1.442695, %v1548_v50  ;;  %v941_v51 = vpop.f32.mrf.mxu1  ;;  %3614 = vmatpush3.msra.mxu1 %v4558_v58 }
 0x143   :  { %2346 = vmatmul.mubr.f32.gmra.mxu1 %v3696_v24  ;;  %v3704_v25 = vpop.eup %3703  ;;  %v1726_v4 = vmul.f32 1.442695, %v1554_v63  ;;  %v1555_v5 = vmul.f32 1.28, %v1443_v57  ;;  %v1449_v6 = vsub.f32 0.0, %v1337_v0  ;;  %v1338_v30 = vmul.f32 %v1226_v2, %v1226_v2 }
 0x144   :  { %2350 = vmatprep.mubr.f32.mxu1 %v3702_v47  ;;  %3717 = vpow2.f32 %v1714_v3  ;;  %v1232_v52 = vsub.f32 %v941_v51, %v4518_v12  ;;  %v943_v7 = vpop.f32.mrf.mxu1 }
 0x145   :  { %v3706_v8 = vpop.eup %3705  ;;  %v1728_v9 = vmul.f32 1.442695, %v1555_v5  ;;  %v1561_v10 = vmul.f32 1.28, %v1449_v6  ;;  %v1450_v11 = vsub.f32 0.0, %v1338_v30  ;;  %3719 = vpow2.f32 %v1726_v4 }
 0x146   :  { %v1344_v13 = vmul.f32 %v1232_v52, %v1232_v52  ;;  %v1233_v14 = vsub.f32 %v943_v7, %v4523_v23  ;;  %v947_v59 = vpop.f32.mrf.mxu1  ;;  %v3708_v15 = vpop.eup %3707 }
 0x147   :  { %2351 = vmatmul.mubr.f32.gmra.mxu1 %v3700_v21  ;;  %3721 = vpow2.f32 %v1728_v9  ;;  %v1740_v34 = vmul.f32 1.442695, %v1561_v10  ;;  %v1562_v53 = vmul.f32 1.28, %v1450_v11  ;;  %v1239_v16 = vsub.f32 %v947_v59, %v4518_v12 }
 0x148   :  { %2355 = vmatprep.mubr.f32.mxu1 %v3706_v8  ;;  %v3710_v17 = vpop.eup %3709  ;;  %v1456_v18 = vsub.f32 0.0, %v1344_v13  ;;  %v1345_v19 = vmul.f32 %v1233_v14, %v1233_v14  ;;  %v949_v61 = vpop.f32.mrf.mxu1 }
 0x149   :  { %v1742_v40 = vmul.f32 1.442695, %v1562_v53  ;;  %v1351_v20 = vmul.f32 %v1239_v16, %v1239_v16  ;;  %v1240_v22 = vsub.f32 %v949_v61, %v4523_v23  ;;  %3723 = vpow2.f32 %v1740_v34 }
 0x14a   :  { %v1568_v60 = vmul.f32 1.28, %v1456_v18  ;;  %v1457_v1 = vsub.f32 0.0, %v1345_v19  ;;  %v953_v26 = vpop.f32.mrf.mxu1  ;;  %v3712_v27 = vpop.eup %3711 }
 0x14b   :  { %2356 = vmatmul.mubr.f32.gmra.mxu1 %v3704_v25  ;;  %3725 = vpow2.f32 %v1742_v40  ;;  %v1463_v24 = vsub.f32 0.0, %v1351_v20  ;;  %v1352_v29 = vmul.f32 %v1240_v22, %v1240_v22  ;;  %v1246_v32 = vsub.f32 %v953_v26, %v4518_v12 }
 0x14c   :  { %2360 = vmatprep.mubr.f32.mxu1 %v3710_v17  ;;  %v3714_v55 = vpop.eup %3713  ;;  %v1754_v36 = vmul.f32 1.442695, %v1568_v60  ;;  %v1569_v33 = vmul.f32 1.28, %v1457_v1  ;;  %v955_v35 = vpop.f32.mrf.mxu1 }
 0x14d   :  { %v1575_v37 = vmul.f32 1.28, %v1463_v24  ;;  %v1464_v38 = vsub.f32 0.0, %v1352_v29  ;;  %v1358_v39 = vmul.f32 %v1246_v32, %v1246_v32  ;;  %v1247_v41 = vsub.f32 %v955_v35, %v4523_v23 }
 0x14e   :  { %3727 = vpow2.f32 %v1754_v36  ;;  %v1756_v42 = vmul.f32 1.442695, %v1569_v33  ;;  %v959_v49 = vpop.f32.mrf.mxu1 }
 0x14f   :  { %2361 = vmatmul.mubr.f32.gmra.mxu1 %v3708_v15  ;;  %v3716_v48 = vpop.eup %3715  ;;  %v1768_v43 = vmul.f32 1.442695, %v1575_v37  ;;  %v1576_v45 = vmul.f32 1.28, %v1464_v38  ;;  %v1470_v46 = vsub.f32 0.0, %v1358_v39  ;;  %v1359_v47 = vmul.f32 %v1247_v41, %v1247_v41 }
 0x150   :  { %2365 = vmatprep.mubr.f32.mxu1 %v3714_v55  ;;  %3729 = vpow2.f32 %v1756_v42  ;;  %v1253_v50 = vsub.f32 %v959_v49, %v4518_v12  ;;  %v961_v3 = vpop.f32.mrf.mxu1 }
 0x151   :  { %v3718_v62 = vpop.eup %3717  ;;  %v1770_v57 = vmul.f32 1.442695, %v1576_v45  ;;  %v1582_v0 = vmul.f32 1.28, %v1470_v46  ;;  %v1471_v2 = vsub.f32 0.0, %v1359_v47  ;;  %3731 = vpow2.f32 %v1768_v43 }
 0x152   :  { %v1365_v51 = vmul.f32 %v1253_v50, %v1253_v50  ;;  %v1254_v25 = vsub.f32 %v961_v3, %v4523_v23  ;;  %v3720_v4 = vpop.eup %3719  ;;  %v965_v52 = vpop.f32.mrf.mxu1 }
 0x153   :  { %v4567_v44 = vpop.f32.mrf.mxu0  ;;  %2366 = vmatmul.mubr.f32.gmra.mxu1 %v3712_v27  ;;  %3733 = vpow2.f32 %v1770_v57  ;;  %v1782_v6 = vmul.f32 1.442695, %v1582_v0  ;;  %v1583_v30 = vmul.f32 1.28, %v1471_v2  ;;  %v1260_v10 = vsub.f32 %v965_v52, %v4518_v12 }
 0x154   :  { %2370 = vmatprep.mubr.f32.mxu1 %v3718_v62  ;;  %v3722_v7 = vpop.eup %3721  ;;  %v1477_v8 = vsub.f32 0.0, %v1365_v51  ;;  %v1366_v9 = vmul.f32 %v1254_v25, %v1254_v25  ;;  %v967_v14 = vpop.f32.mrf.mxu1  ;;  %v1133_v51 = vsub.s32 2, %v4418_v31 }
 0x155   :  { %v4570_v21 = vpop.f32.mrf.mxu0  ;;  %v1784_v13 = vmul.f32 1.442695, %v1583_v30  ;;  %3735 = vpow2.f32 %v1782_v6  ;;  %v1372_v34 = vmul.f32 %v1260_v10, %v1260_v10  ;;  %v1261_v17 = vsub.f32 %v967_v14, %v4523_v23 }
 0x156   :  { %v1589_v59 = vmul.f32 1.28, %v1477_v8  ;;  %v1478_v15 = vsub.f32 0.0, %v1366_v9  ;;  %v3724_v53 = vpop.eup %3723  ;;  %v971_v18 = vpop.f32.mrf.mxu1  ;;  %v1137_v6 = vsub.s32 3, %v4418_v31 }
 0x157   :  { %v4573_v63 = vpop.f32.mrf.mxu0  ;;  %2371 = vmatmul.mubr.f32.gmra.mxu1 %v3716_v48  ;;  %3737 = vpow2.f32 %v1784_v13  ;;  %v1484_v20 = vsub.f32 0.0, %v1372_v34  ;;  %v1373_v60 = vmul.f32 %v1261_v17, %v1261_v17  ;;  %v1267_v1 = vsub.f32 %v971_v18, %v4518_v12 }
 0x158   :  { %2375 = vmatprep.mubr.f32.mxu1 %v3722_v7  ;;  %v3726_v19 = vpop.eup %3725  ;;  %v1796_v61 = vmul.f32 1.442695, %v1589_v59  ;;  %v1590_v40 = vmul.f32 1.28, %v1478_v15  ;;  %v973_v26 = vpop.f32.mrf.mxu1  ;;  %v4609_v7 = vld [vmem:[%s5134_s5] sm:$0x7f] }
 0x159   :  { %v4576_v5 = vpop.f32.mrf.mxu0  ;;  %v1596_v24 = vmul.f32 1.28, %v1484_v20  ;;  %v1485_v55 = vsub.f32 0.0, %v1373_v60  ;;  %v1379_v36 = vmul.f32 %v1267_v1, %v1267_v1  ;;  %v1268_v33 = vsub.f32 %v973_v26, %v4523_v23 }
 0x15a   :  { %v1798_v27 = vmul.f32 1.442695, %v1590_v40  ;;  %3739 = vpow2.f32 %v1796_v61  ;;  %v4612_v8 = vrot.slane %v4609_v7, %v1133_v51  ;;  %v4617_v10 = vrot.slane %v4609_v7, %v1137_v6 }
 0x15b   :  { %v4579_v11 = vpop.f32.mrf.mxu0  ;;  %2376 = vmatmul.mubr.f32.gmra.mxu1 %v3720_v4  ;;  %v3728_v29 = vpop.eup %3727  ;;  %v1810_v35 = vmul.f32 1.442695, %v1596_v24  ;;  %v1597_v39 = vmul.f32 1.28, %v1485_v55  ;;  %v1491_v12 = vsub.f32 0.0, %v1379_v36  ;;  %v1380_v41 = vmul.f32 %v1268_v33, %v1268_v33 }
 0x15c   :  { %2380 = vmatprep.mubr.f32.mxu1 %v3726_v19  ;;  %3741 = vpow2.f32 %v1798_v27 }
 0x15d   :  { %v4581_v16 = vpop.f32.mrf.mxu0  ;;  %v3730_v37 = vpop.eup %3729  ;;  %v1812_v43 = vmul.f32 1.442695, %v1597_v39  ;;  %v1603_v45 = vmul.f32 1.28, %v1491_v12  ;;  %v1492_v46 = vsub.f32 0.0, %v1380_v41  ;;  %3743 = vpow2.f32 %v1810_v35 }
 0x15e   :  { %v3732_v42 = vpop.eup %3731 }
 0x15f   :  { %v4584_v22 = vpop.f32.mrf.mxu0  ;;  %2381 = vmatmul.mubr.f32.gmra.mxu1 %v3724_v53  ;;  %3745 = vpow2.f32 %v1812_v43  ;;  %v1824_v49 = vmul.f32 1.442695, %v1603_v45  ;;  %v1604_v50 = vmul.f32 1.28, %v1492_v46 }
 0x160   :  { %2385 = vmatprep.mubr.f32.mxu1 %v3730_v37  ;;  %v3734_v47 = vpop.eup %3733 }
 0x161   :  { %v4587_v32 = vpop.f32.mrf.mxu0  ;;  %v1826_v0 = vmul.f32 1.442695, %v1604_v50  ;;  %3747 = vpow2.f32 %v1824_v49 }
 0x162   :  { %v3736_v62 = vpop.eup %3735 }
 0x163   :  { %v4590_v38 = vpop.f32.mrf.mxu0  ;;  %2386 = vmatmul.mubr.f32.gmra.mxu1 %v3728_v29  ;;  %3749 = vpow2.f32 %v1826_v0 }
 0x164   :  { %2390 = vmatprep.mubr.f32.mxu1 %v3734_v47  ;;  %v3738_v2 = vpop.eup %3737 }
 0x165   :  { %v4592_v48 = vpop.f32.mrf.mxu0 }
 0x167   :  { %v4594_v23 = vpop.f32.mrf.mxu0  ;;  %2391 = vmatmul.mubr.f32.gmra.mxu1 %v3732_v42  ;;  %v3740_v4 = vpop.eup %3739 }
 0x168   :  { %2395 = vmatprep.mubr.f32.mxu1 %v3738_v2 }
 0x169   :  { %v4596_v57 = vpop.f32.mrf.mxu0  ;;  %v3742_v30 = vpop.eup %3741 }
 0x16a   :  { %v3744_v13 = vpop.eup %3743 }
 0x16b   :  { %v4598_v3 = vpop.f32.mrf.mxu0  ;;  %2396 = vmatmul.mubr.f32.gmra.mxu1 %v3736_v62 }
 0x16c   :  { %2400 = vmatprep.mubr.f32.mxu1 %v3742_v30  ;;  %v3746_v59 = vpop.eup %3745 }
 0x16d   :  { %v4601_v25 = vpop.f32.mrf.mxu0 }
 0x16e   :  { %v3748_v18 = vpop.eup %3747 }
 0x16f   :  { %v4604_v52 = vpop.f32.mrf.mxu0  ;;  %2401 = vmatmul.mubr.f32.gmra.mxu1 %v3740_v4 }
 0x170   :  { %2405 = vmatprep.mubr.f32.mxu1 %v3746_v59  ;;  %v3750_v61 = vpop.eup %3749 }
 0x171   :  { %v4614_v9 = vpop.f32.mrf.mxu0 }
 0x173   :  { %v720_v14 = vpop.f32.mrf.mxu0  ;;  %2406 = vmatmul.mubr.f32.gmra.mxu1 %v3744_v13 }
 0x174   :  { %v1160_v15 = vsub.f32 %v720_v14, %v4612_v8  ;;  %2410 = vmatprep.mubr.f32.mxu1 %v3750_v61 }
 0x175   :  { %v722_v34 = vpop.f32.mrf.mxu0 }
 0x176   :  { %v1272_v53 = vmul.f32 %v1160_v15, %v1160_v15  ;;  %v1161_v17 = vsub.f32 %v722_v34, %v4617_v10 }
 0x177   :  { %v726_v19 = vpop.f32.mrf.mxu0  ;;  %2411 = vmatmul.mubr.f32.gmra.mxu1 %v3748_v18 }
 0x178   :  { %v1384_v40 = vsub.f32 0.0, %v1272_v53  ;;  %v1273_v20 = vmul.f32 %v1161_v17, %v1161_v17  ;;  %v1167_v60 = vsub.f32 %v726_v19, %v4612_v8 }
 0x179   :  { %v728_v1 = vpop.f32.mrf.mxu0 }
 0x17a   :  { %v1496_v26 = vmul.f32 1.28, %v1384_v40  ;;  %v1385_v27 = vsub.f32 0.0, %v1273_v20  ;;  %v1279_v24 = vmul.f32 %v1167_v60, %v1167_v60  ;;  %v1168_v29 = vsub.f32 %v728_v1, %v4617_v10 }
 0x17b   :  { %v732_v55 = vpop.f32.mrf.mxu0 }
 0x17c   :  { %v1497_v36 = vmul.f32 1.28, %v1385_v27  ;;  %v1391_v33 = vsub.f32 0.0, %v1279_v24  ;;  %v1280_v35 = vmul.f32 %v1168_v29, %v1168_v29  ;;  %v1610_v37 = vmul.f32 1.442695, %v1496_v26 }
 0x17d   :  { %v1174_v39 = vsub.f32 %v732_v55, %v4612_v8  ;;  %v734_v12 = vpop.f32.mrf.mxu0 }
 0x17e   :  { %v1612_v41 = vmul.f32 1.442695, %v1497_v36  ;;  %v1503_v42 = vmul.f32 1.28, %v1391_v33  ;;  %v1392_v43 = vsub.f32 0.0, %v1280_v35  ;;  %v1175_v46 = vsub.f32 %v734_v12, %v4617_v10 }
 0x17f   :  { %v1286_v45 = vmul.f32 %v1174_v39, %v1174_v39  ;;  %v738_v47 = vpop.f32.mrf.mxu0 }
 0x180   :  { %3751 = vpow2.f32 %v1612_v41  ;;  %v1504_v49 = vmul.f32 1.28, %v1392_v43  ;;  %v1181_v50 = vsub.f32 %v738_v47, %v4612_v8  ;;  %v1624_v62 = vmul.f32 1.442695, %v1503_v42 }
 0x181   :  { %3753 = vpow2.f32 %v1610_v37  ;;  %v1398_v0 = vsub.f32 0.0, %v1286_v45  ;;  %v1287_v2 = vmul.f32 %v1175_v46, %v1175_v46  ;;  %v740_v51 = vpop.f32.mrf.mxu0 }
 0x182   :  { %v1626_v4 = vmul.f32 1.442695, %v1504_v49  ;;  %v1293_v6 = vmul.f32 %v1181_v50, %v1181_v50  ;;  %v1182_v30 = vsub.f32 %v740_v51, %v4617_v10 }
 0x183   :  { %v1510_v13 = vmul.f32 1.28, %v1398_v0  ;;  %v1399_v14 = vsub.f32 0.0, %v1287_v2  ;;  %v744_v59 = vpop.f32.mrf.mxu0 }
 0x184   :  { %3755 = vpow2.f32 %v1626_v4  ;;  %v1405_v15 = vsub.f32 0.0, %v1293_v6  ;;  %v1294_v34 = vmul.f32 %v1182_v30, %v1182_v30  ;;  %v1188_v53 = vsub.f32 %v744_v59, %v4612_v8 }
 0x185   :  { %3757 = vpow2.f32 %v1624_v62  ;;  %v1638_v17 = vmul.f32 1.442695, %v1510_v13  ;;  %v1511_v18 = vmul.f32 1.28, %v1399_v14  ;;  %v746_v19 = vpop.f32.mrf.mxu0 }
 0x186   :  { %v1517_v61 = vmul.f32 1.28, %v1405_v15  ;;  %v1406_v40 = vsub.f32 0.0, %v1294_v34  ;;  %v1300_v20 = vmul.f32 %v1188_v53, %v1188_v53  ;;  %v1189_v60 = vsub.f32 %v746_v19, %v4617_v10 }
 0x187   :  { %v1640_v1 = vmul.f32 1.442695, %v1511_v18  ;;  %v750_v26 = vpop.f32.mrf.mxu0 }
 0x188   :  { %v1518_v27 = vmul.f32 1.28, %v1406_v40  ;;  %v1412_v24 = vsub.f32 0.0, %v1300_v20  ;;  %v1301_v29 = vmul.f32 %v1189_v60, %v1189_v60  ;;  %v1652_v55 = vmul.f32 1.442695, %v1517_v61 }
 0x189   :  { %3759 = vpow2.f32 %v1640_v1  ;;  %v1195_v36 = vsub.f32 %v750_v26, %v4612_v8  ;;  %v752_v33 = vpop.f32.mrf.mxu0 }
 0x18a   :  { %3761 = vpow2.f32 %v1638_v17  ;;  %v1654_v35 = vmul.f32 1.442695, %v1518_v27  ;;  %v1524_v37 = vmul.f32 1.28, %v1412_v24  ;;  %v1413_v39 = vsub.f32 0.0, %v1301_v29  ;;  %v4643_v29 = vld [vmem:[%s5135_s6 + $0x8] sm:$0xff] }
 0x18b   :  { %v1307_v12 = vmul.f32 %v1195_v36, %v1195_v36  ;;  %v1196_v41 = vsub.f32 %v752_v33, %v4617_v10  ;;  %v756_v42 = vpop.f32.mrf.mxu0 }
 0x18c   :  { %3763 = vpow2.f32 %v1654_v35  ;;  %v1525_v43 = vmul.f32 1.28, %v1413_v39  ;;  %v1202_v45 = vsub.f32 %v756_v42, %v4612_v8  ;;  %v1666_v47 = vmul.f32 1.442695, %v1524_v37 }
 0x18d   :  { %v3752_v46 = vpop.eup %3751  ;;  %v1419_v49 = vsub.f32 0.0, %v1307_v12  ;;  %v1308_v50 = vmul.f32 %v1196_v41, %v1196_v41  ;;  %v758_v62 = vpop.f32.mrf.mxu0  ;;  %3765 = vpow2.f32 %v1652_v55 }
 0x18e   :  { %v3754_v0 = vpop.eup %3753  ;;  %v1668_v2 = vmul.f32 1.442695, %v1525_v43  ;;  %v1314_v51 = vmul.f32 %v1202_v45, %v1202_v45  ;;  %v1203_v4 = vsub.f32 %v758_v62, %v4617_v10  ;;  %2190 = vmatprep.mubr.f32.mxu0 %v3752_v46 }
 0x18f   :  { %v1531_v6 = vmul.f32 1.28, %v1419_v49  ;;  %v1420_v30 = vsub.f32 0.0, %v1308_v50  ;;  %v762_v13 = vpop.f32.mrf.mxu0  ;;  %2191 = vmatmul.mubr.f32.vlgmr.msra.gmra.mxu0 %v3754_v0 }
 0x190   :  { %3767 = vpow2.f32 %v1668_v2  ;;  %v1426_v14 = vsub.f32 0.0, %v1314_v51  ;;  %v1315_v59 = vmul.f32 %v1203_v4, %v1203_v4  ;;  %v1209_v15 = vsub.f32 %v762_v13, %v4612_v8  ;;  %3548 = vmatpush3.msra.mxu0 %v4526_v56 }
 0x191   :  { %v3756_v34 = vpop.eup %3755  ;;  %3769 = vpow2.f32 %v1666_v47  ;;  %v1680_v53 = vmul.f32 1.442695, %v1531_v6  ;;  %v1532_v17 = vmul.f32 1.28, %v1420_v30  ;;  %v764_v18 = vpop.f32.mrf.mxu0  ;;  %3549 = vmatprep.subr.mxu0 %v4544_v54 }
 0x192   :  { %v3758_v19 = vpop.eup %3757  ;;  %v1538_v61 = vmul.f32 1.28, %v1426_v14  ;;  %v1427_v40 = vsub.f32 0.0, %v1315_v59  ;;  %v1321_v20 = vmul.f32 %v1209_v15, %v1209_v15  ;;  %v1210_v60 = vsub.f32 %v764_v18, %v4617_v10  ;;  %2195 = vmatprep.mubr.f32.mxu0 %v3756_v34  ;;  %3550 = vmatpush3.msra.mxu0 %v4544_v54 }
 0x193   :  { %v1682_v1 = vmul.f32 1.442695, %v1532_v17  ;;  %v768_v26 = vpop.f32.mrf.mxu0  ;;  %2196 = vmatmul.mubr.f32.gmra.mxu0 %v3758_v19  ;;  %3551 = vmatprep.subr.mxu0 %v4549_v28 }
 0x194   :  { %v1539_v56 = vmul.f32 1.28, %v1427_v40  ;;  %v1433_v27 = vsub.f32 0.0, %v1321_v20  ;;  %v1322_v24 = vmul.f32 %v1210_v60, %v1210_v60  ;;  %3552 = vmatpush3.msra.mxu0 %v4549_v28  ;;  %v1694_v55 = vmul.f32 1.442695, %v1538_v61 }
 0x195   :  { %3771 = vpow2.f32 %v1682_v1  ;;  %v1216_v36 = vsub.f32 %v768_v26, %v4612_v8  ;;  %v770_v54 = vpop.f32.mrf.mxu0  ;;  %3553 = vmatprep.subr.mxu0 %v4558_v58 }
 0x196   :  { %v3760_v33 = vpop.eup %3759  ;;  %3773 = vpow2.f32 %v1680_v53  ;;  %v1696_v35 = vmul.f32 1.442695, %v1539_v56  ;;  %v1545_v37 = vmul.f32 1.28, %v1433_v27  ;;  %v1434_v39 = vsub.f32 0.0, %v1322_v24  ;;  %3554 = vmatpush3.msra.mxu0 %v4558_v58 }
 0x197   :  { %v3762_v28 = vpop.eup %3761  ;;  %v1328_v12 = vmul.f32 %v1216_v36, %v1216_v36  ;;  %v1217_v41 = vsub.f32 %v770_v54, %v4617_v10  ;;  %2200 = vmatprep.mubr.f32.mxu0 %v3760_v33  ;;  %v774_v42 = vpop.f32.mrf.mxu0  ;;  %3579 = vmatprep.subr.mxu0 %v4643_v29 }
 0x198   :  { %3775 = vpow2.f32 %v1696_v35  ;;  %v1546_v43 = vmul.f32 1.28, %v1434_v39  ;;  %v1223_v45 = vsub.f32 %v774_v42, %v4612_v8  ;;  %2201 = vmatmul.mubr.f32.gmra.mxu0 %v3762_v28  ;;  %v1708_v47 = vmul.f32 1.442695, %v1545_v37 }
 0x199   :  { %v3764_v46 = vpop.eup %3763  ;;  %v1440_v49 = vsub.f32 0.0, %v1328_v12  ;;  %v1329_v50 = vmul.f32 %v1217_v41, %v1217_v41  ;;  %v776_v62 = vpop.f32.mrf.mxu0  ;;  %3777 = vpow2.f32 %v1694_v55 }
 0x19a   :  { %v1710_v58 = vmul.f32 1.442695, %v1546_v43  ;;  %v1335_v0 = vmul.f32 %v1223_v45, %v1223_v45  ;;  %v1224_v2 = vsub.f32 %v776_v62, %v4617_v10  ;;  %2205 = vmatprep.mubr.f32.mxu0 %v3764_v46  ;;  %v3766_v51 = vpop.eup %3765 }
 0x19b   :  { %v1552_v4 = vmul.f32 1.28, %v1440_v49  ;;  %v1441_v6 = vsub.f32 0.0, %v1329_v50  ;;  %v780_v30 = vpop.f32.mrf.mxu0 }
 0x19c   :  { %3779 = vpow2.f32 %v1710_v58  ;;  %v1447_v13 = vsub.f32 0.0, %v1335_v0  ;;  %v1336_v14 = vmul.f32 %v1224_v2, %v1224_v2  ;;  %v1230_v59 = vsub.f32 %v780_v30, %v4612_v8  ;;  %2206 = vmatmul.mubr.f32.gmra.mxu0 %v3766_v51 }
 0x19d   :  { %v3768_v15 = vpop.eup %3767  ;;  %3781 = vpow2.f32 %v1708_v47  ;;  %v1722_v34 = vmul.f32 1.442695, %v1552_v4  ;;  %v1553_v53 = vmul.f32 1.28, %v1441_v6  ;;  %v782_v17 = vpop.f32.mrf.mxu0 }
 0x19e   :  { %v3770_v18 = vpop.eup %3769  ;;  %v1559_v19 = vmul.f32 1.28, %v1447_v13  ;;  %v1448_v61 = vsub.f32 0.0, %v1336_v14  ;;  %v1342_v40 = vmul.f32 %v1230_v59, %v1230_v59  ;;  %v1231_v20 = vsub.f32 %v782_v17, %v4617_v10  ;;  %2210 = vmatprep.mubr.f32.mxu0 %v3768_v15 }
 0x19f   :  { %v1724_v60 = vmul.f32 1.442695, %v1553_v53  ;;  %v786_v1 = vpop.f32.mrf.mxu0 }
 0x1a0   :  { %v1560_v26 = vmul.f32 1.28, %v1448_v61  ;;  %v1454_v56 = vsub.f32 0.0, %v1342_v40  ;;  %v1343_v27 = vmul.f32 %v1231_v20, %v1231_v20  ;;  %2211 = vmatmul.mubr.f32.gmra.mxu0 %v3770_v18  ;;  %v1736_v24 = vmul.f32 1.442695, %v1559_v19 }
 0x1a1   :  { %3783 = vpow2.f32 %v1724_v60  ;;  %v1237_v55 = vsub.f32 %v786_v1, %v4612_v8  ;;  %v788_v36 = vpop.f32.mrf.mxu0 }
 0x1a2   :  { %v3772_v54 = vpop.eup %3771  ;;  %3785 = vpow2.f32 %v1722_v34  ;;  %v1738_v33 = vmul.f32 1.442695, %v1560_v26  ;;  %v1566_v35 = vmul.f32 1.28, %v1454_v56  ;;  %v1455_v37 = vsub.f32 0.0, %v1343_v27 }
 0x1a3   :  { %v3774_v39 = vpop.eup %3773  ;;  %v1349_v28 = vmul.f32 %v1237_v55, %v1237_v55  ;;  %v1238_v12 = vsub.f32 %v788_v36, %v4617_v10  ;;  %2215 = vmatprep.mubr.f32.mxu0 %v3772_v54  ;;  %v792_v41 = vpop.f32.mrf.mxu0  ;;  %v1149_v27 = vsub.s32 6, %v4418_v31 }
 0x1a4   :  { %3787 = vpow2.f32 %v1738_v33  ;;  %v1567_v42 = vmul.f32 1.28, %v1455_v37  ;;  %v1244_v43 = vsub.f32 %v792_v41, %v4612_v8  ;;  %2216 = vmatmul.mubr.f32.gmra.mxu0 %v3774_v39  ;;  %v1750_v46 = vmul.f32 1.442695, %v1566_v35 }
 0x1a5   :  { %v3776_v45 = vpop.eup %3775  ;;  %v1461_v47 = vsub.f32 0.0, %v1349_v28  ;;  %v1350_v49 = vmul.f32 %v1238_v12, %v1238_v12  ;;  %v794_v50 = vpop.f32.mrf.mxu0  ;;  %3789 = vpow2.f32 %v1736_v24 }
 0x1a6   :  { %v1752_v62 = vmul.f32 1.442695, %v1567_v42  ;;  %v1356_v58 = vmul.f32 %v1244_v43, %v1244_v43  ;;  %v1245_v0 = vsub.f32 %v794_v50, %v4617_v10  ;;  %2220 = vmatprep.mubr.f32.mxu0 %v3776_v45  ;;  %v3778_v2 = vpop.eup %3777  ;;  %v4665_v43 = vrot.slane %v4609_v7, %v1149_v27 }
 0x1a7   :  { %v1573_v51 = vmul.f32 1.28, %v1461_v47  ;;  %v1462_v4 = vsub.f32 0.0, %v1350_v49  ;;  %v798_v6 = vpop.f32.mrf.mxu0 }
 0x1a8   :  { %3791 = vpow2.f32 %v1752_v62  ;;  %v1468_v30 = vsub.f32 0.0, %v1356_v58  ;;  %v1357_v13 = vmul.f32 %v1245_v0, %v1245_v0  ;;  %v1251_v14 = vsub.f32 %v798_v6, %v4612_v8  ;;  %2221 = vmatmul.mubr.f32.gmra.mxu0 %v3778_v2 }
 0x1a9   :  { %v3780_v59 = vpop.eup %3779  ;;  %3793 = vpow2.f32 %v1750_v46  ;;  %v1764_v15 = vmul.f32 1.442695, %v1573_v51  ;;  %v1574_v34 = vmul.f32 1.28, %v1462_v4  ;;  %v800_v53 = vpop.f32.mrf.mxu0 }
 0x1aa   :  { %v3782_v17 = vpop.eup %3781  ;;  %v1580_v18 = vmul.f32 1.28, %v1468_v30  ;;  %v1469_v19 = vsub.f32 0.0, %v1357_v13  ;;  %v1363_v61 = vmul.f32 %v1251_v14, %v1251_v14  ;;  %v1252_v40 = vsub.f32 %v800_v53, %v4617_v10  ;;  %2225 = vmatprep.mubr.f32.mxu0 %v3780_v59 }
 0x1ab   :  { %v1766_v20 = vmul.f32 1.442695, %v1574_v34  ;;  %v804_v60 = vpop.f32.mrf.mxu0 }
 0x1ac   :  { %v1581_v1 = vmul.f32 1.28, %v1469_v19  ;;  %v1475_v26 = vsub.f32 0.0, %v1363_v61  ;;  %v1364_v56 = vmul.f32 %v1252_v40, %v1252_v40  ;;  %2226 = vmatmul.mubr.f32.gmra.mxu0 %v3782_v17  ;;  %v1778_v24 = vmul.f32 1.442695, %v1580_v18 }
 0x1ad   :  { %3795 = vpow2.f32 %v1766_v20  ;;  %v1258_v55 = vsub.f32 %v804_v60, %v4612_v8  ;;  %v806_v36 = vpop.f32.mrf.mxu0 }
 0x1ae   :  { %v3784_v54 = vpop.eup %3783  ;;  %3797 = vpow2.f32 %v1764_v15  ;;  %v1780_v33 = vmul.f32 1.442695, %v1581_v1  ;;  %v1587_v35 = vmul.f32 1.28, %v1475_v26  ;;  %v1476_v37 = vsub.f32 0.0, %v1364_v56 }
 0x1af   :  { %v3786_v39 = vpop.eup %3785  ;;  %v1370_v28 = vmul.f32 %v1258_v55, %v1258_v55  ;;  %v1259_v12 = vsub.f32 %v806_v36, %v4617_v10  ;;  %2230 = vmatprep.mubr.f32.mxu0 %v3784_v54  ;;  %v810_v41 = vpop.f32.mrf.mxu0 }
 0x1b0   :  { %3799 = vpow2.f32 %v1780_v33  ;;  %v1588_v42 = vmul.f32 1.28, %v1476_v37  ;;  %v1265_v31 = vsub.f32 %v810_v41, %v4612_v8  ;;  %2231 = vmatmul.mubr.f32.gmra.mxu0 %v3786_v39  ;;  %v1792_v46 = vmul.f32 1.442695, %v1587_v35 }
 0x1b1   :  { %v3788_v45 = vpop.eup %3787  ;;  %v1482_v47 = vsub.f32 0.0, %v1370_v28  ;;  %v1371_v49 = vmul.f32 %v1259_v12, %v1259_v12  ;;  %v812_v50 = vpop.f32.mrf.mxu0  ;;  %3801 = vpow2.f32 %v1778_v24 }
 0x1b2   :  { %v1794_v62 = vmul.f32 1.442695, %v1588_v42  ;;  %v1377_v58 = vmul.f32 %v1265_v31, %v1265_v31  ;;  %v1266_v0 = vsub.f32 %v812_v50, %v4617_v10  ;;  %2235 = vmatprep.mubr.f32.mxu0 %v3788_v45  ;;  %v3790_v2 = vpop.eup %3789 }
 0x1b3   :  { %v1594_v51 = vmul.f32 1.28, %v1482_v47  ;;  %v1483_v4 = vsub.f32 0.0, %v1371_v49  ;;  %v3525_v6 = vpop.f32.mrf.mxu0 }
 0x1b4   :  { %3803 = vpow2.f32 %v1794_v62  ;;  %v1489_v8 = vsub.f32 0.0, %v1377_v58  ;;  %v1378_v30 = vmul.f32 %v1266_v0, %v1266_v0  ;;  %v1171_v7 = vsub.f32 %v3525_v6, %v4665_v43  ;;  %2236 = vmatmul.mubr.f32.gmra.mxu0 %v3790_v2 }
 0x1b5   :  { %v3792_v13 = vpop.eup %3791  ;;  %3805 = vpow2.f32 %v1792_v46  ;;  %v1806_v14 = vmul.f32 1.442695, %v1594_v51  ;;  %v1595_v59 = vmul.f32 1.28, %v1483_v4  ;;  %v1042_v15 = vpop.f32.mrf.mxu0 }
 0x1b6   :  { %v3794_v34 = vpop.eup %3793  ;;  %v1601_v53 = vmul.f32 1.28, %v1489_v8  ;;  %v1490_v17 = vsub.f32 0.0, %v1378_v30  ;;  %v1283_v10 = vmul.f32 %v1171_v7, %v1171_v7  ;;  %v1164_v18 = vsub.f32 %v1042_v15, %v4665_v43  ;;  %2240 = vmatprep.mubr.f32.mxu0 %v3792_v13  ;;  %v3227_v12 = vpop.f32.mrf.mxu1 }
 0x1b7   :  { %v1808_v19 = vmul.f32 1.442695, %v1595_v59  ;;  %v3528_v61 = vpop.f32.mrf.mxu0 }
 0x1b8   :  { %v1602_v40 = vmul.f32 1.28, %v1490_v17  ;;  %v1395_v20 = vsub.f32 0.0, %v1283_v10  ;;  %v1276_v60 = vmul.f32 %v1164_v18, %v1164_v18  ;;  %2241 = vmatmul.mubr.f32.gmra.mxu0 %v3794_v34  ;;  %v1820_v1 = vmul.f32 1.442695, %v1601_v53  ;;  %v3228_v62 = vpop.f32.mrf.mxu1 }
 0x1b9   :  { %3807 = vpow2.f32 %v1808_v19  ;;  %v1185_v26 = vsub.f32 %v3528_v61, %v4665_v43  ;;  %v1052_v56 = vpop.f32.mrf.mxu0  ;;  %v4674_v4 = vadd.f32 %v3228_v62, %v3227_v12 }
 0x1ba   :  { %v3796_v27 = vpop.eup %3795  ;;  %3809 = vpow2.f32 %v1806_v14  ;;  %v1822_v24 = vmul.f32 1.442695, %v1602_v40  ;;  %v1507_v55 = vmul.f32 1.28, %v1395_v20  ;;  %v1388_v36 = vsub.f32 0.0, %v1276_v60 }
 0x1bb   :  { %v3798_v54 = vpop.eup %3797  ;;  %v1297_v33 = vmul.f32 %v1185_v26, %v1185_v26  ;;  %v1178_v35 = vsub.f32 %v1052_v56, %v4665_v43  ;;  %2245 = vmatprep.mubr.f32.mxu0 %v3796_v27  ;;  %v3531_v37 = vpop.f32.mrf.mxu0 }
 0x1bc   :  { %3811 = vpow2.f32 %v1822_v24  ;;  %v1500_v39 = vmul.f32 1.28, %v1388_v36  ;;  %v1199_v28 = vsub.f32 %v3531_v37, %v4665_v43  ;;  %2246 = vmatmul.mubr.f32.gmra.mxu0 %v3798_v54  ;;  %v1632_v42 = vmul.f32 1.442695, %v1507_v55 }
 0x1bd   :  { %v3800_v41 = vpop.eup %3799  ;;  %v1409_v31 = vsub.f32 0.0, %v1297_v33  ;;  %v1290_v45 = vmul.f32 %v1178_v35, %v1178_v35  ;;  %v1062_v46 = vpop.f32.mrf.mxu0  ;;  %3813 = vpow2.f32 %v1820_v1 }
 0x1be   :  { %v1618_v47 = vmul.f32 1.442695, %v1500_v39  ;;  %v1311_v49 = vmul.f32 %v1199_v28, %v1199_v28  ;;  %v1192_v50 = vsub.f32 %v1062_v46, %v4665_v43  ;;  %2250 = vmatprep.mubr.f32.mxu0 %v3800_v41  ;;  %v3802_v58 = vpop.eup %3801  ;;  %v3230_v7 = vpop.f32.mrf.mxu1 }
 0x1bf   :  { %v1521_v0 = vmul.f32 1.28, %v1409_v31  ;;  %v1402_v2 = vsub.f32 0.0, %v1290_v45  ;;  %v3534_v51 = vpop.f32.mrf.mxu0 }
 0x1c0   :  { %3815 = vpow2.f32 %v1618_v47  ;;  %v1423_v6 = vsub.f32 0.0, %v1311_v49  ;;  %v1304_v8 = vmul.f32 %v1192_v50, %v1192_v50  ;;  %v1213_v30 = vsub.f32 %v3534_v51, %v4665_v43  ;;  %2251 = vmatmul.mubr.f32.gmra.mxu0 %v3802_v58  ;;  %v3231_v19 = vpop.f32.mrf.mxu1 }
 0x1c1   :  { %v3804_v13 = vpop.eup %3803  ;;  %3817 = vpow2.f32 %v1632_v42  ;;  %v1660_v14 = vmul.f32 1.442695, %v1521_v0  ;;  %v1514_v59 = vmul.f32 1.28, %v1402_v2  ;;  %v1072_v15 = vpop.f32.mrf.mxu0  ;;  %v4678_v20 = vadd.f32 %v3231_v19, %v3230_v7 }
 0x1c2   :  { %v3806_v34 = vpop.eup %3805  ;;  %v1535_v53 = vmul.f32 1.28, %v1423_v6  ;;  %v1416_v17 = vsub.f32 0.0, %v1304_v8  ;;  %v1325_v10 = vmul.f32 %v1213_v30, %v1213_v30  ;;  %v1206_v18 = vsub.f32 %v1072_v15, %v4665_v43  ;;  %2255 = vmatprep.mubr.f32.mxu0 %v3804_v13  ;;  %v3233_v55 = vpop.f32.mrf.mxu1 }
 0x1c3   :  { %v1646_v61 = vmul.f32 1.442695, %v1514_v59  ;;  %v3537_v40 = vpop.f32.mrf.mxu0 }
 0x1c4   :  { %v1528_v60 = vmul.f32 1.28, %v1416_v17  ;;  %v1437_v1 = vsub.f32 0.0, %v1325_v10  ;;  %v1318_v26 = vmul.f32 %v1206_v18, %v1206_v18  ;;  %2256 = vmatmul.mubr.f32.gmra.mxu0 %v3806_v34  ;;  %v1688_v56 = vmul.f32 1.442695, %v1535_v53  ;;  %v3234_v41 = vpop.f32.mrf.mxu1 }
 0x1c5   :  { %3819 = vpow2.f32 %v1646_v61  ;;  %v1227_v27 = vsub.f32 %v3537_v40, %v4665_v43  ;;  %v1082_v24 = vpop.f32.mrf.mxu0  ;;  %v4683_v62 = vadd.f32 %v3234_v41, %v3233_v55 }
 0x1c6   :  { %v3808_v36 = vpop.eup %3807  ;;  %3821 = vpow2.f32 %v1660_v14  ;;  %v1674_v54 = vmul.f32 1.442695, %v1528_v60  ;;  %v1549_v33 = vmul.f32 1.28, %v1437_v1  ;;  %v1430_v35 = vsub.f32 0.0, %v1318_v26  ;;  %v3236_v58 = vpop.f32.mrf.mxu1 }
 0x1c7   :  { %v3810_v37 = vpop.eup %3809  ;;  %v1339_v39 = vmul.f32 %v1227_v27, %v1227_v27  ;;  %v1220_v28 = vsub.f32 %v1082_v24, %v4665_v43  ;;  %2260 = vmatprep.mubr.f32.mxu0 %v3808_v36  ;;  %v3540_v12 = vpop.f32.mrf.mxu0  ;;  %v1830_v24 = vld [vmem:[%s5135_s6] sm:$0xff] }
 0x1c8   :  { %3823 = vpow2.f32 %v1674_v54  ;;  %v1542_v42 = vmul.f32 1.28, %v1430_v35  ;;  %v1241_v31 = vsub.f32 %v3540_v12, %v4665_v43  ;;  %2261 = vmatmul.mubr.f32.gmra.mxu0 %v3810_v37  ;;  %v1716_v46 = vmul.f32 1.442695, %v1549_v33  ;;  %v3237_v13 = vpop.f32.mrf.mxu1 }
 0x1c9   :  { %v3812_v45 = vpop.eup %3811  ;;  %v1451_v47 = vsub.f32 0.0, %v1339_v39  ;;  %v1332_v49 = vmul.f32 %v1220_v28, %v1220_v28  ;;  %v1092_v50 = vpop.f32.mrf.mxu0  ;;  %3825 = vpow2.f32 %v1688_v56  ;;  %v4687_v18 = vadd.f32 %v3237_v13, %v3236_v58 }
 0x1ca   :  { %v1702_v0 = vmul.f32 1.442695, %v1542_v42  ;;  %v1353_v2 = vmul.f32 %v1241_v31, %v1241_v31  ;;  %v1234_v51 = vsub.f32 %v1092_v50, %v4665_v43  ;;  %2265 = vmatprep.mubr.f32.mxu0 %v3812_v45  ;;  %v3814_v6 = vpop.eup %3813  ;;  %v3239_v19 = vpop.f32.mrf.mxu1 }
 0x1cb   :  { %v1563_v8 = vmul.f32 1.28, %v1451_v47  ;;  %v1444_v30 = vsub.f32 0.0, %v1332_v49  ;;  %v3543_v7 = vpop.f32.mrf.mxu0 }
 0x1cc   :  { %3827 = vpow2.f32 %v1702_v0  ;;  %v1465_v14 = vsub.f32 0.0, %v1353_v2  ;;  %v1346_v59 = vmul.f32 %v1234_v51, %v1234_v51  ;;  %v1255_v15 = vsub.f32 %v3543_v7, %v4665_v43  ;;  %2266 = vmatmul.mubr.f32.gmra.mxu0 %v3814_v6  ;;  %v3240_v55 = vpop.f32.mrf.mxu1 }
 0x1cd   :  { %v3816_v34 = vpop.eup %3815  ;;  %3829 = vpow2.f32 %v1716_v46  ;;  %v1744_v53 = vmul.f32 1.442695, %v1563_v8  ;;  %v1556_v17 = vmul.f32 1.28, %v1444_v30  ;;  %v1102_v10 = vpop.f32.mrf.mxu0  ;;  %v4697_v28 = vadd.f32 %v3240_v55, %v3239_v19 }
 0x1ce   :  { %v3818_v61 = vpop.eup %3817  ;;  %v1577_v40 = vmul.f32 1.28, %v1465_v14  ;;  %v1458_v60 = vsub.f32 0.0, %v1346_v59  ;;  %v1367_v1 = vmul.f32 %v1255_v15, %v1255_v15  ;;  %v1248_v26 = vsub.f32 %v1102_v10, %v4665_v43  ;;  %3555 = vmatprep.mubr.msk.f32.mxu0 %vm1932_vm0, %v3816_v34 }
 0x1cf   :  { %v1730_v56 = vmul.f32 1.442695, %v1556_v17  ;;  %v3546_v27 = vpop.f32.mrf.mxu0  ;;  %v3242_v12 = vpop.f32.mrf.mxu1 }
 0x1d0   :  { %v1570_v36 = vmul.f32 1.28, %v1458_v60  ;;  %v1479_v54 = vsub.f32 0.0, %v1367_v1  ;;  %v1360_v33 = vmul.f32 %v1248_v26, %v1248_v26  ;;  %3556 = vmatmul.mubr.msk.f32.vlgmr.msra.gmra.mxu0 %vm1932_vm0, %v3818_v61  ;;  %v1772_v35 = vmul.f32 1.442695, %v1577_v40 }
 0x1d1   :  { %3831 = vpow2.f32 %v1730_v56  ;;  %v1269_v37 = vsub.f32 %v3546_v27, %v4665_v43  ;;  %3580 = vmatpush3.msra.mxu0 %v4643_v29  ;;  %v1112_v39 = vpop.f32.mrf.mxu0  ;;  %v3243_v50 = vpop.f32.mrf.mxu1 }
 0x1d2   :  { %v3820_v41 = vpop.eup %3819  ;;  %3833 = vpow2.f32 %v1744_v53  ;;  %v1758_v42 = vmul.f32 1.442695, %v1570_v36  ;;  %v1591_v31 = vmul.f32 1.28, %v1479_v54  ;;  %v1472_v45 = vsub.f32 0.0, %v1360_v33  ;;  %3581 = vmatprep.subr.mxu0 %v1830_v24 }
 0x1d3   :  { %v3822_v46 = vpop.eup %3821  ;;  %v1381_v47 = vmul.f32 %v1269_v37, %v1269_v37  ;;  %v1262_v49 = vsub.f32 %v1112_v39, %v4665_v43  ;;  %3558 = vmatprep.mubr.msk.f32.mxu0 %vm1932_vm0, %v3820_v41  ;;  %3582 = vmatpush3.msra.mxu0 %v1830_v24  ;;  %v4702_v58 = vadd.f32 %v3243_v50, %v3242_v12  ;;  %v3245_v6 = vpop.f32.mrf.mxu1  ;;  %v3027_v39 = vld [vmem:[%s5132_s3] ss:$0 sm:$0xff] }
 0x1d4   :  { %3835 = vpow2.f32 %v1758_v42  ;;  %v1584_v29 = vmul.f32 1.28, %v1472_v45  ;;  %3559 = vmatmul.mubr.msk.f32.gmra.mxu0 %vm1932_vm0, %v3822_v46  ;;  %v1800_v8 = vmul.f32 1.442695, %v1591_v31  ;;  %v300_v41 = vadd.f32 %v3027_v39, %v4570_v21 }
 0x1d5   :  { %v3824_v0 = vpop.eup %3823  ;;  %v1493_v2 = vsub.f32 0.0, %v1381_v47  ;;  %v1374_v51 = vmul.f32 %v1262_v49, %v1262_v49  ;;  %3837 = vpow2.f32 %v1772_v35  ;;  %v3246_v14 = vpop.f32.mrf.mxu1  ;;  %v305_v49 = vadd.f32 %v4567_v44, %v3027_v39 }
 0x1d6   :  { %v1786_v30 = vmul.f32 1.442695, %v1584_v29  ;;  %3561 = vmatprep.mubr.msk.f32.mxu0 %vm1932_vm0, %v3824_v0  ;;  %v3826_v43 = vpop.eup %3825  ;;  %v4706_v59 = vadd.f32 %v3246_v14, %v3245_v6  ;;  %v310_v50 = vadd.f32 %v3027_v39, %v4576_v5 }
 0x1d7   :  { %v1605_v7 = vmul.f32 1.28, %v1493_v2  ;;  %v1486_v13 = vsub.f32 0.0, %v1374_v51  ;;  %v3248_v17 = vpop.f32.mrf.mxu1  ;;  %v315_v2 = vadd.f32 %v4573_v63, %v3027_v39  ;;  %v320_v51 = vadd.f32 %v3027_v39, %v4581_v16 }
 0x1d8   :  { %3839 = vpow2.f32 %v1786_v30  ;;  %3562 = vmatmul.mubr.msk.f32.gmra.mxu0 %vm1932_vm0, %v3826_v43  ;;  %v330_v30 = vadd.f32 %v3027_v39, %v4587_v32  ;;  %v335_v16 = vadd.f32 %v4584_v22, %v3027_v39  ;;  %v345_v32 = vadd.f32 %v4590_v38, %v3027_v39 }
 0x1d9   :  { %v3828_v15 = vpop.eup %3827  ;;  %v1828_v34 = vmul.f32 1.442695, %v1605_v7  ;;  %v1598_v53 = vmul.f32 1.28, %v1486_v13  ;;  %3841 = vpow2.f32 %v1800_v8  ;;  %v3249_v61 = vpop.f32.mrf.mxu1  ;;  %v325_v8 = vadd.f32 %v4579_v11, %v3027_v39 }
 0x1da   :  { %v3830_v10 = vpop.eup %3829  ;;  %3564 = vmatprep.mubr.msk.f32.mxu0 %vm1932_vm0, %v3828_v15  ;;  %v4710_v40 = vadd.f32 %v3249_v61, %v3248_v17  ;;  %v340_v13 = vadd.f32 %v3027_v39, %v4592_v48  ;;  %v355_v22 = vadd.f32 %v4594_v23, %v3027_v39  ;;  %v360_v48 = vadd.f32 %v3027_v39, %v4601_v25 }
 0x1db   :  { %v1814_v19 = vmul.f32 1.442695, %v1598_v53  ;;  %3843 = vpow2.f32 %v1828_v34  ;;  %v3251_v60 = vpop.f32.mrf.mxu1  ;;  %v350_v34 = vadd.f32 %v3027_v39, %v4596_v57  ;;  %v370_v38 = vadd.f32 %v3027_v39, %v4614_v9 }
 0x1dc   :  { %3565 = vmatmul.mubr.msk.f32.gmra.mxu0 %vm1932_vm0, %v3830_v10  ;;  %v365_v10 = vadd.f32 %v4598_v3, %v3027_v39  ;;  %v375_v57 = vadd.f32 %v4604_v52, %v3027_v39 }
 0x1dd   :  { %3845 = vpow2.f32 %v1814_v19  ;;  %v3252_v56 = vpop.f32.mrf.mxu1 }
 0x1de   :  { %v3832_v1 = vpop.eup %3831  ;;  %v4714_v27 = vadd.f32 %v3252_v56, %v3251_v60 }
 0x1df   :  { %v3834_v26 = vpop.eup %3833  ;;  %3567 = vmatprep.mubr.msk.f32.mxu0 %vm1932_vm0, %v3832_v1  ;;  %v3254_v55 = vpop.f32.mrf.mxu1 }
 0x1e0   :  { %3568 = vmatmul.mubr.msk.f32.gmra.mxu0 %vm1932_vm0, %v3834_v26 }
 0x1e1   :  { %v3836_v24 = vpop.eup %3835  ;;  %v3255_v54 = vpop.f32.mrf.mxu1 }
 0x1e2   :  { %3570 = vmatprep.mubr.msk.f32.mxu0 %vm1932_vm0, %v3836_v24  ;;  %v3838_v36 = vpop.eup %3837  ;;  %v4718_v33 = vadd.f32 %v3255_v54, %v3254_v55 }
 0x1e3   :  { %v3257_v37 = vpop.f32.mrf.mxu1 }
 0x1e4   :  { %3571 = vmatmul.mubr.msk.f32.gmra.mxu0 %vm1932_vm0, %v3838_v36 }
 0x1e5   :  { %v3840_v35 = vpop.eup %3839  ;;  %v3258_v42 = vpop.f32.mrf.mxu1 }
 0x1e6   :  { %3573 = vmatprep.mubr.msk.f32.mxu0 %vm1932_vm0, %v3840_v35  ;;  %v3842_v12 = vpop.eup %3841  ;;  %v4726_v31 = vadd.f32 %v3258_v42, %v3257_v37 }
 0x1e7   :  { %v3260_v46 = vpop.f32.mrf.mxu1 }
 0x1e8   :  { %3574 = vmatmul.mubr.msk.f32.gmra.mxu0 %vm1932_vm0, %v3842_v12  ;;  %v3844_v45 = vpop.eup %3843 }
 0x1e9   :  { %3583 = vmatprep.mubr.msk.f32.mxu0 %vm2561_vm2, %v300_v41  ;;  %v3261_v29 = vpop.f32.mrf.mxu1 }
 0x1ea   :  { %v3846_v47 = vpop.eup %3845  ;;  %v4734_v21 = vadd.f32 %v3261_v29, %v3260_v46 }
 0x1eb   :  { %3576 = vmatprep.mubr.msk.f32.mxu1 %vm1932_vm0, %v3846_v47  ;;  %v3263_v0 = vpop.f32.mrf.mxu1 }
 0x1ec   :  { %3577 = vmatmul.mubr.msk.f32.vlgmr.msra.gmra.mxu1 %vm1932_vm0, %v3844_v45  ;;  %3584 = vmatmul.mubr.msk.f32.vlgmr.msra.gmra.mxu0 %vm2561_vm2, %v305_v49 }
 0x1ed   :  { %3586 = vmatprep.mubr.msk.f32.mxu0 %vm2561_vm2, %v310_v50  ;;  %v3264_v6 = vpop.f32.mrf.mxu1 }
 0x1ee   :  { %v4740_v44 = vadd.f32 %v3264_v6, %v3263_v0 }
 0x1ef   :  { %v3266_v5 = vpop.f32.mrf.mxu1 }
 0x1f0   :  { %3587 = vmatmul.mubr.msk.f32.gmra.mxu0 %vm2561_vm2, %v315_v2 }
 0x1f1   :  { %3589 = vmatprep.mubr.msk.f32.mxu0 %vm2561_vm2, %v320_v51  ;;  %v3267_v43 = vpop.f32.mrf.mxu1 }
 0x1f2   :  { %v4746_v7 = vadd.f32 %v3267_v43, %v3266_v5 }
 0x1f3   :  { %v3269_v63 = vpop.f32.mrf.mxu1 }
 0x1f4   :  { %3590 = vmatmul.mubr.msk.f32.gmra.mxu0 %vm2561_vm2, %v325_v8  ;;  %5140 = vst [vmem:[#allocation8_spill] sm:$0xff] %v4746_v7 }
 0x1f5   :  { %3592 = vmatprep.mubr.msk.f32.mxu0 %vm2561_vm2, %v330_v30  ;;  %v3270_v14 = vpop.f32.mrf.mxu1 }
 0x1f6   :  { %v4752_v15 = vadd.f32 %v3270_v14, %v3269_v63 }
 0x1f7   :  { %v3272_v11 = vpop.f32.mrf.mxu1 }
 0x1f8   :  { %3593 = vmatmul.mubr.msk.f32.gmra.mxu0 %vm2561_vm2, %v335_v16  ;;  %5141 = vst [vmem:[#allocation9_spill] sm:$0xff] %v4752_v15 }
 0x1f9   :  { %3595 = vmatprep.mubr.msk.f32.mxu0 %vm2561_vm2, %v340_v13  ;;  %v3273_v53 = vpop.f32.mrf.mxu1 }
 0x1fa   :  { %v4758_v17 = vadd.f32 %v3273_v53, %v3272_v11 }
 0x1fb   :  { %v4771_v19 = vpop.f32.mrf.mxu1 }
 0x1fc   :  { %3596 = vmatmul.mubr.msk.f32.gmra.mxu0 %vm2561_vm2, %v345_v32  ;;  %5142 = vst [vmem:[#allocation10_spill] sm:$0xff] %v4758_v17 }
 0x1fd   :  { %3598 = vmatprep.mubr.msk.f32.mxu0 %vm2561_vm2, %v350_v34  ;;  %v4773_v23 = vpop.f32.mrf.mxu1 }
 0x1ff   :  { %v4775_v25 = vpop.f32.mrf.mxu1 }
 0x200   :  { %3599 = vmatmul.mubr.msk.f32.gmra.mxu0 %vm2561_vm2, %v355_v22 }
 0x201   :  { %3601 = vmatprep.mubr.msk.f32.mxu0 %vm2561_vm2, %v360_v48  ;;  %v4777_v60 = vpop.f32.mrf.mxu1 }
 0x203   :  { %v4782_v56 = vpop.f32.mrf.mxu1 }
 0x204   :  { %3602 = vmatmul.mubr.msk.f32.gmra.mxu0 %vm2561_vm2, %v365_v10 }
 0x205   :  { %3604 = vmatprep.mubr.msk.f32.mxu0 %vm2561_vm2, %v370_v38  ;;  %v4787_v54 = vpop.f32.mrf.mxu1 }
 0x207   :  { %v4789_v12 = vpop.f32.mrf.mxu1 }
 0x208   :  { %3605 = vmatmul.mubr.msk.f32.gmra.mxu0 %vm2561_vm2, %v375_v57 }
 0x209   :  { %v4794_v46 = vpop.f32.mrf.mxu1 }
 0x20a   :  { %v3398_v15 = vadd.f32 %v4794_v46, %v4789_v12 }
 0x20b   :  { %v4799_v50 = vpop.f32.mrf.mxu1 }
 0x24f   :  { %v3307_v61 = vpop.f32.mrf.mxu0 }
 0x251   :  { %v3308_v3 = vpop.f32.mrf.mxu0 }
 0x252   :  { %v3309_v1 = vadd.f32 %v3308_v3, %v3307_v61 }
 0x253   :  { %v3310_v9 = vpop.f32.mrf.mxu0 }
 0x254   :  { %v4780_v26 = vadd.f32 %v3309_v1, %v4674_v4 }
 0x255   :  { %v3311_v52 = vpop.f32.mrf.mxu0 }
 0x256   :  { %v3312_v24 = vadd.f32 %v3311_v52, %v3310_v9 }
 0x258   :  { %v4785_v55 = vadd.f32 %v3312_v24, %v4678_v20  ;;  %v3313_v36 = vpop.f32.mrf.mxu0 }
 0x25a   :  { %v3314_v35 = vpop.f32.mrf.mxu0 }
 0x25b   :  { %v3315_v37 = vadd.f32 %v3314_v35, %v3313_v36 }
 0x25c   :  { %v3316_v39 = vpop.f32.mrf.mxu0 }
 0x25d   :  { %v4792_v41 = vadd.f32 %v3315_v37, %v4683_v62  ;;  %v4804_v62 = vpop.f32.mrf.mxu1 }
 0x25e   :  { %v3317_v4 = vpop.f32.mrf.mxu0 }
 0x25f   :  { %v3318_v42 = vadd.f32 %v3317_v4, %v3316_v39 }
 0x260   :  { %v3319_v45 = vpop.f32.mrf.mxu0 }
 0x261   :  { %v4797_v47 = vadd.f32 %v3318_v42, %v4687_v18  ;;  %v4809_v18 = vpop.f32.mrf.mxu1 }
 0x262   :  { %v3320_v20 = vpop.f32.mrf.mxu0 }
 0x263   :  { %v3321_v49 = vadd.f32 %v3320_v20, %v3319_v45 }
 0x264   :  { %v3322_v29 = vpop.f32.mrf.mxu0 }
 0x265   :  { %v4802_v0 = vadd.f32 %v3321_v49, %v4697_v28  ;;  %v4814_v28 = vpop.f32.mrf.mxu1 }
 0x266   :  { %v3323_v2 = vpop.f32.mrf.mxu0 }
 0x267   :  { %v3324_v51 = vadd.f32 %v3323_v2, %v3322_v29 }
 0x268   :  { %v3325_v6 = vpop.f32.mrf.mxu0 }
 0x269   :  { %v4807_v5 = vadd.f32 %v3324_v51, %v4702_v58  ;;  %v4819_v58 = vpop.f32.mrf.mxu1 }
 0x26a   :  { %v3326_v8 = vpop.f32.mrf.mxu0 }
 0x26b   :  { %v3327_v30 = vadd.f32 %v3326_v8, %v3325_v6 }
 0x26c   :  { %v3328_v43 = vpop.f32.mrf.mxu0 }
 0x26d   :  { %v4812_v63 = vadd.f32 %v3327_v30, %v4706_v59  ;;  %v4824_v59 = vpop.f32.mrf.mxu1 }
 0x26e   :  { %v3329_v16 = vpop.f32.mrf.mxu0 }
 0x26f   :  { %v3330_v13 = vadd.f32 %v3329_v16, %v3328_v43 }
 0x270   :  { %v3331_v14 = vpop.f32.mrf.mxu0 }
 0x271   :  { %v4817_v11 = vadd.f32 %v3330_v13, %v4710_v40  ;;  %v4829_v40 = vpop.f32.mrf.mxu1 }
 0x272   :  { %v3332_v32 = vpop.f32.mrf.mxu0 }
 0x273   :  { %v3333_v34 = vadd.f32 %v3332_v32, %v3331_v14 }
 0x274   :  { %v3334_v53 = vpop.f32.mrf.mxu0 }
 0x275   :  { %v4822_v22 = vadd.f32 %v3333_v34, %v4714_v27  ;;  %v4834_v27 = vpop.f32.mrf.mxu1 }
 0x276   :  { %v3335_v48 = vpop.f32.mrf.mxu0 }
 0x277   :  { %v3336_v10 = vadd.f32 %v3335_v48, %v3334_v53 }
 0x278   :  { %v3337_v38 = vpop.f32.mrf.mxu0 }
 0x279   :  { %v4827_v57 = vadd.f32 %v3336_v10, %v4718_v33  ;;  %v3411_v33 = vpop.f32.mrf.mxu1 }
 0x27a   :  { %v3338_v61 = vpop.f32.mrf.mxu0 }
 0x27b   :  { %v3339_v3 = vadd.f32 %v3338_v61, %v3337_v38  ;;  %v3412_v42 = vpop.f32.mrf.mxu1 }
 0x27c   :  { %v3340_v1 = vpop.f32.mrf.mxu0 }
 0x27d   :  { %v4832_v9 = vadd.f32 %v3339_v3, %v4726_v31  ;;  %v4851_v20 = vpop.f32.mrf.mxu1  ;;  %v3392_v3 = vadd.f32 %v4777_v60, %v4775_v25 }
 0x27e   :  { %v3341_v52 = vpop.f32.mrf.mxu0 }
 0x27f   :  { %v3342_v24 = vadd.f32 %v3341_v52, %v3340_v1  ;;  %v3389_v52 = vadd.f32 %v4773_v23, %v4771_v19  ;;  %v3395_v23 = vadd.f32 %v4787_v54, %v4782_v56  ;;  %v3407_v56 = vadd.f32 %v4824_v59, %v4819_v58 }
 0x280   :  { %v4836_v36 = vpop.f32.mrf.mxu0 }
 0x281   :  { %v4839_v35 = vadd.f32 %v3342_v24, %v4734_v21  ;;  %v4857_v21 = vpop.f32.mrf.mxu1  ;;  %v2348_v54 = vadd.f32 %v3395_v23, %v4792_v41  ;;  %v2368_v58 = vadd.f32 %v3407_v56, %v4812_v63 }
 0x282   :  { %v4841_v37 = vpop.f32.mrf.mxu0 }
 0x283   :  { %5143 = vst [vmem:[#allocation11_spill] sm:$0xff] %v4839_v35  ;;  %v4859_v6 = vpop.f32.mrf.mxu1 }
 0x284   :  { %v4843_v39 = vpop.f32.mrf.mxu0 }
 0x285   :  { %v3418_v43 = vpop.f32.mrf.mxu1 }
 0x286   :  { %v4845_v4 = vpop.f32.mrf.mxu0 }
 0x287   :  { %v4861_v14 = vpop.f32.mrf.mxu1 }
 0x288   :  { %v4847_v45 = vpop.f32.mrf.mxu0 }
 0x289   :  { %v4865_v53 = vpop.f32.mrf.mxu1 }
 0x28a   :  { %v4849_v31 = vpop.f32.mrf.mxu0 }
 0x28b   :  { %v4871_v38 = vpop.f32.mrf.mxu1 }
 0x28c   :  { %v4853_v49 = vpop.f32.mrf.mxu0 }
 0x28d   :  { %5144 = vst [vmem:[#allocation12_spill] sm:$0xff] %v4853_v49  ;;  %v3424_v24 = vpop.f32.mrf.mxu1 }
 0x28e   :  { %v4855_v29 = vpop.f32.mrf.mxu0 }
 0x28f   :  { %5145 = vst [vmem:[#allocation13_spill] sm:$0xff] %v4855_v29  ;;  %v2343_v29 = vadd.f32 %v3392_v3, %v4785_v55  ;;  %v4889_v7 = vpop.f32.mrf.mxu1  ;;  %v3401_v55 = vadd.f32 %v4804_v62, %v4799_v50  ;;  %v2353_v3 = vadd.f32 %v3398_v15, %v4797_v47 }
 0x290   :  { %v3557_v2 = vpop.f32.mrf.mxu0 }
 0x291   :  { %v2488_v35 = vadd.f32 %v3557_v2, %v2343_v29  ;;  %v2358_v15 = vadd.f32 %v3401_v55, %v4802_v0 }
 0x292   :  { %v2482_v51 = vpop.f32.mrf.mxu0 }
 0x294   :  { %v3560_v8 = vpop.f32.mrf.mxu0 }
 0x295   :  { %v2498_v46 = vadd.f32 %v3560_v8, %v2353_v3  ;;  %v3410_v8 = vadd.f32 %v4834_v27, %v4829_v40  ;;  %v3416_v40 = vadd.f32 %v4857_v21, %v4851_v20  ;;  %v3419_v27 = vadd.f32 %v3418_v43, %v4859_v6 }
 0x296   :  { %v2492_v30 = vpop.f32.mrf.mxu0  ;;  %v3351_v43 = vadd.f32 %v4849_v31, %v4847_v45 }
 0x297   :  { %v2493_v2 = vadd.f32 %v2492_v30, %v2348_v54 }
 0x298   :  { %v3563_v16 = vpop.f32.mrf.mxu0 }
 0x29a   :  { %v2502_v13 = vpop.f32.mrf.mxu0 }
 0x29c   :  { %v4863_v32 = vpop.f32.mrf.mxu0 }
 0x29e   :  { %v2512_v34 = vpop.f32.mrf.mxu0 }
 0x29f   :  { %v2513_v30 = vadd.f32 %v2512_v34, %v2368_v58 }
 0x2a0   :  { %v4867_v48 = vpop.f32.mrf.mxu0 }
 0x2a2   :  { %v4869_v10 = vpop.f32.mrf.mxu0 }
 0x2a4   :  { %v4873_v61 = vpop.f32.mrf.mxu0 }
 0x2a5   :  { %5146 = vst [vmem:[#allocation14_spill] sm:$0xff] %v4873_v61  ;;  %v2338_v61 = vadd.f32 %v3389_v52, %v4780_v26  ;;  %v3427_v26 = vpop.f32.mrf.mxu1 }
 0x2a6   :  { %v4877_v1 = vpop.f32.mrf.mxu0 }
 0x2a7   :  { %5147 = vst [vmem:[#allocation15_spill] sm:$0xff] %v4877_v1  ;;  %v2483_v60 = vadd.f32 %v2482_v51, %v2338_v61  ;;  %v3429_v50 = vpop.f32.mrf.mxu1  ;;  %v2503_v51 = vadd.f32 %v2502_v13, %v2358_v15 }
 0x2a8   :  { %v4881_v17 = vpop.f32.mrf.mxu0 }
 0x2a9   :  { %5148 = vst [vmem:[#allocation16_spill] sm:$0xff] %v4881_v17  ;;  %v3430_v59 = vpop.f32.mrf.mxu1 }
 0x2aa   :  { %v4884_v49 = vpop.f32.mrf.mxu0  ;;  %v3431_v45 = vadd.f32 %v3430_v59, %v3429_v50 }
 0x2ab   :  { %v3432_v34 = vpop.f32.mrf.mxu1 }
 0x2ac   :  { %v3585_v25 = vpop.f32.mrf.mxu0  ;;  %v5155_v15 = vld [vmem:[#allocation14_spill] sm:$0xff] }
 0x2ad   :  { %v4891_v1 = vadd.f32 %v3585_v25, %v2488_v35  ;;  %v3404_v35 = vadd.f32 %v4814_v28, %v4809_v18  ;;  %v3413_v18 = vadd.f32 %v3412_v42, %v3411_v33  ;;  %v2373_v33 = vadd.f32 %v3410_v8, %v4817_v11 }
 0x2ae   :  { %v2676_v19 = vpop.f32.mrf.mxu0 }
 0x2af   :  { %v4898_v17 = vadd.f32 %v2676_v19, %v2483_v60  ;;  %2757 = vadd.xlane.f32.xlu1 %v4891_v1  ;;  %v2363_v61 = vadd.f32 %v3404_v35, %v4807_v5  ;;  %v3345_v5 = vadd.f32 %v4841_v37, %v4836_v36  ;;  %v2378_v42 = vadd.f32 %v3413_v18, %v4822_v22 }
 0x2b0   :  { %v3588_v12 = vpop.f32.mrf.mxu0  ;;  %v3422_v19 = vadd.f32 %v4865_v53, %v4861_v14  ;;  %v2518_v20 = vadd.f32 %v4863_v32, %v2373_v33  ;;  %v3425_v22 = vadd.f32 %v3424_v24, %v4871_v38  ;;  %v3348_v36 = vadd.f32 %v4845_v4, %v4843_v39  ;;  %v5149_v24 = vld [vmem:[#allocation15_spill] sm:$0xff] }
 0x2b1   :  { %2755 = vadd.xlane.f32.xlu0 %v4898_v17  ;;  %v4908_v47 = vadd.f32 %v3588_v12, %v2498_v46  ;;  %v2508_v25 = vadd.f32 %v3563_v16, %v2363_v61  ;;  %v2523_v21 = vadd.f32 %v4869_v10, %v2378_v42  ;;  %v2253_v11 = vadd.f32 %v3345_v5, %v4740_v44  ;;  %v3433_v10 = vpop.f32.mrf.mxu1  ;;  %v5152_v46 = vld [vmem:[#allocation9_spill] sm:$0xff] }
 0x2b2   :  { %v2686_v29 = vpop.f32.mrf.mxu0  ;;  %v2383_v37 = vadd.f32 %v3416_v40, %v4827_v57  ;;  %v2388_v14 = vadd.f32 %v3419_v27, %v4832_v9  ;;  %v3428_v44 = vadd.f32 %v3427_v26, %v4889_v7  ;;  %v5150_v57 = vld [vmem:[#allocation8_spill] sm:$0xff]  ;;  %v5151_v9 = vld [vmem:[#allocation11_spill] sm:$0xff]  ;;  %v2263_v35 = vadd.f32 %v3351_v43, %v5152_v46  ;;  %v5154_v7 = vld [vmem:[#allocation13_spill] sm:$0xff] }
 0x2b3   :  { %v4915_v41 = vadd.f32 %v2686_v29, %v2493_v2  ;;  %v2258_v4 = vadd.f32 %v3348_v36, %v5150_v57  ;;  %v2393_v31 = vadd.f32 %v3422_v19, %v5151_v9  ;;  %v2398_v55 = vadd.f32 %v3425_v22, %v2253_v11  ;;  %v3578_v3 = vpop.f32.mrf.mxu1  ;;  %v5153_v29 = vld [vmem:[#allocation12_spill] sm:$0xff] }
 0x2b4   :  { %v3591_v62 = vpop.f32.mrf.mxu0  ;;  %v2528_v38 = vadd.f32 %v4867_v48, %v2383_v37  ;;  %v2533_v39 = vadd.f32 %v5149_v24, %v2388_v14  ;;  %v3354_v26 = vadd.f32 %v5154_v7, %v5153_v29  ;;  %v3434_v50 = vadd.f32 %v3433_v10, %v3432_v34 }
 0x2b5   :  { %2761 = vadd.xlane.f32.xlu0 %v4908_v47  ;;  %v4928_v13 = vadd.f32 %v3591_v62, %v2508_v25  ;;  %v2538_v62 = vadd.f32 %v5155_v15, %v2393_v31  ;;  %v2543_v2 = vadd.f32 %v4884_v49, %v2398_v55  ;;  %v2552_v8 = vpop.f32.mrf.mxu1  ;;  %v2408_v58 = vadd.f32 %v3431_v45, %v2263_v35 }
 0x2b6   :  { %v2696_v28 = vpop.f32.mrf.mxu0 }
 0x2b7   :  { %v4917_v0 = vadd.f32 %v2696_v28, %v2503_v51  ;;  %v2403_v51 = vadd.f32 %v3428_v44, %v2258_v4  ;;  %v5156_v28 = vld [vmem:[#allocation10_spill] sm:$0xff]  ;;  %v2553_v27 = vadd.f32 %v2552_v8, %v2408_v58 }
 0x2b8   :  { %v3594_v52 = vpop.f32.mrf.mxu0  ;;  %v2268_v61 = vadd.f32 %v3354_v26, %v5156_v28 }
 0x2b9   :  { %2763 = vadd.xlane.f32.xlu1 %v4917_v0  ;;  %2759 = vadd.xlane.f32.xlu0 %v4915_v41  ;;  %v4946_v32 = vadd.f32 %v3594_v52, %v2518_v20 }
 0x2ba   :  { %v2706_v63 = vpop.f32.mrf.mxu0  ;;  %v2413_v5 = vadd.f32 %v3434_v50, %v2268_v61 }
 0x2bb   :  { %v4930_v16 = vadd.f32 %v2706_v63, %v2513_v30  ;;  %v5157_v30 = vld [vmem:[#allocation16_spill] sm:$0xff] }
 0x2bc   :  { %v3597_v60 = vpop.f32.mrf.mxu0  ;;  %v2548_v40 = vadd.f32 %v5157_v30, %v2403_v51  ;;  %v2558_v42 = vadd.f32 %v3578_v3, %v2413_v5 }
 0x2bd   :  { %2767 = vadd.xlane.f32.xlu1 %v4930_v16  ;;  %2765 = vadd.xlane.f32.xlu0 %v4928_v13  ;;  %v4960_v48 = vadd.f32 %v3597_v60, %v2528_v38 }
 0x2be   :  { %v2716_v6 = vpop.f32.mrf.mxu0 }
 0x2bf   :  { %v4948_v53 = vadd.f32 %v2716_v6, %v2523_v21 }
 0x2c0   :  { %v3600_v23 = vpop.f32.mrf.mxu0 }
 0x2c1   :  { %2771 = vadd.xlane.f32.xlu1 %v4948_v53  ;;  %2769 = vadd.xlane.f32.xlu0 %v4946_v32  ;;  %v4969_v59 = vadd.f32 %v3600_v23, %v2538_v62 }
 0x2c2   :  { %v2726_v12 = vpop.f32.mrf.mxu0 }
 0x2c3   :  { %v4962_v56 = vadd.f32 %v2726_v12, %v2533_v39 }
 0x2c4   :  { %v3603_v54 = vpop.f32.mrf.mxu0 }
 0x2c5   :  { %2775 = vadd.xlane.f32.xlu1 %v4962_v56  ;;  %2773 = vadd.xlane.f32.xlu0 %v4960_v48  ;;  %v4976_v63 = vadd.f32 %v3603_v54, %v2548_v40 }
 0x2c6   :  { %v2736_v18 = vpop.f32.mrf.mxu0 }
 0x2c7   :  { %v4971_v52 = vadd.f32 %v2736_v18, %v2543_v2 }
 0x2c8   :  { %v3606_v25 = vpop.f32.mrf.mxu0 }
 0x2c9   :  { %2779 = vadd.xlane.f32.xlu1 %v4971_v52  ;;  %2777 = vadd.xlane.f32.xlu0 %v4969_v59  ;;  %v4982_v34 = vadd.f32 %v3606_v25, %v2558_v42 }
 0x2ca   :  { %v2746_v49 = vpop.f32.mrf.mxu0 }
 0x2cb   :  { %v4978_v33 = vadd.f32 %v2746_v49, %v2553_v27 }
 0x2cd   :  { %2781 = vadd.xlane.f32.xlu0 %v4976_v63  ;;  %2783 = vadd.xlane.f32.xlu1 %v4978_v33 }
 0x2d1   :  { %2785 = vadd.xlane.f32.xlu0 %v4982_v34 }
 0x338   :  { %v2758_v60 = vpop.xlane.xlu1 %2757 }
 0x339   :  { %v2789_v19 = vmul.f32 0.0078125, %v2758_v60 }
 0x33a   :  { %v2756_v20 = vpop.xlane.xlu0 %2755 }
 0x33b   :  { %v4986_v21 = vsub.f32 %v4891_v1, %v2789_v19  ;;  %v2788_v11 = vmul.f32 0.0078125, %v2756_v20 }
 0x33d   :  { %v4989_v22 = vsub.f32 %v4898_v17, %v2788_v11  ;;  %v2821_v36 = vmul.f32 %v4986_v21, %v4986_v21 }
 0x33e   :  { %v2762_v37 = vpop.xlane.xlu0 %2761 }
 0x33f   :  { %v2791_v6 = vmul.f32 0.0078125, %v2762_v37  ;;  %2838 = vadd.xlane.f32.xlu0 %v2821_v36  ;;  %v2820_v43 = vmul.f32 %v4989_v22, %v4989_v22 }
 0x341   :  { %v4996_v14 = vsub.f32 %v4908_v47, %v2791_v6  ;;  %2836 = vadd.xlane.f32.xlu1 %v2820_v43 }
 0x342   :  { %v2764_v10 = vpop.xlane.xlu1 %2763  ;;  %v2760_v1 = vpop.xlane.xlu0 %2759 }
 0x343   :  { %v2792_v23 = vmul.f32 0.0078125, %v2764_v10  ;;  %v2790_v44 = vmul.f32 0.0078125, %v2760_v1  ;;  %v2823_v17 = vmul.f32 %v4996_v14, %v4996_v14 }
 0x345   :  { %v5001_v38 = vsub.f32 %v4915_v41, %v2790_v44  ;;  %2842 = vadd.xlane.f32.xlu0 %v2823_v17  ;;  %v5004_v57 = vsub.f32 %v4917_v0, %v2792_v23 }
 0x346   :  { %v2768_v24 = vpop.xlane.xlu1 %2767  ;;  %v2766_v39 = vpop.xlane.xlu0 %2765 }
 0x347   :  { %v2794_v4 = vmul.f32 0.0078125, %v2768_v24  ;;  %v2793_v47 = vmul.f32 0.0078125, %v2766_v39  ;;  %v2822_v45 = vmul.f32 %v5001_v38, %v5001_v38  ;;  %v2824_v46 = vmul.f32 %v5004_v57, %v5004_v57 }
 0x349   :  { %v5009_v9 = vsub.f32 %v4928_v13, %v2793_v47  ;;  %2840 = vadd.xlane.f32.xlu1 %v2822_v45  ;;  %v5012_v31 = vsub.f32 %v4930_v16, %v2794_v4 }
 0x34a   :  { %v2772_v41 = vpop.xlane.xlu1 %2771  ;;  %v2770_v55 = vpop.xlane.xlu0 %2769 }
 0x34b   :  { %v2796_v3 = vmul.f32 0.0078125, %v2772_v41  ;;  %v2795_v12 = vmul.f32 0.0078125, %v2770_v55  ;;  %v2825_v0 = vmul.f32 %v5009_v9, %v5009_v9  ;;  %v2826_v16 = vmul.f32 %v5012_v31, %v5012_v31  ;;  %v5068_v55 = vld [vmem:[%s5137_s8] ss:$0 sm:$0xff]  ;;  %s3929_s8 = smov [#allocation5]  }
 0x34d   :  { %v5019_v35 = vsub.f32 %v4946_v32, %v2795_v12  ;;  %2846 = vadd.xlane.f32.xlu0 %v2825_v0  ;;  %2844 = vadd.xlane.f32.xlu1 %v2824_v46  ;;  %v5024_v7 = vsub.f32 %v4948_v53, %v2796_v3 }
 0x34e   :  { %v2776_v13 = vpop.xlane.xlu1 %2775  ;;  %v2774_v29 = vpop.xlane.xlu0 %2773 }
 0x34f   :  { %v2798_v26 = vmul.f32 0.0078125, %v2776_v13  ;;  %v2797_v54 = vmul.f32 0.0078125, %v2774_v29  ;;  %v2827_v15 = vmul.f32 %v5019_v35, %v5019_v35  ;;  %v2828_v18 = vmul.f32 %v5024_v7, %v5024_v7 }
 0x351   :  { %v5029_v62 = vsub.f32 %v4960_v48, %v2797_v54  ;;  %2850 = vadd.xlane.f32.xlu0 %v2827_v15  ;;  %2848 = vadd.xlane.f32.xlu1 %v2826_v16  ;;  %v5032_v32 = vsub.f32 %v4962_v56, %v2798_v26  ;;  %v5074_v16 = vld [vmem:[%s5138_s9] ss:$0 sm:$0xff]  ;;  %s2999_s9 = sshll.u32 %s3929_s8, 4  ;;  %s3000_s9 = int_to_ptr.vmem [resolvable:$true] %s2999_s9 }
 0x352   :  { %v2780_v2 = vpop.xlane.xlu1 %2779  ;;  %v2778_v50 = vpop.xlane.xlu0 %2777  ;;  %s3900_s7 = scalar_lea.vmem %s3000_s9, 2048  ;;  %p3905_p6 = scmp.lt.s32.totalorder %s3000_s9, %s3000_s9 }
 0x353   :  { %v2800_v51 = vmul.f32 0.0078125, %v2780_v2  ;;  %v2799_v8 = vmul.f32 0.0078125, %v2778_v50  ;;  %v2829_v53 = vmul.f32 %v5029_v62, %v5029_v62  ;;  %v2830_v56 = vmul.f32 %v5032_v32, %v5032_v32  ;;  %p3901_p5 = scmp.ne.s32.totalorder %s3000_s9, %s3900_s7  ;;  %p3906_p7 = scmp.lt.s32.totalorder %s3900_s7, %s3900_s7 }
 0x355   :  { %v5039_v28 = vsub.f32 %v4969_v59, %v2799_v8  ;;  %2854 = vadd.xlane.f32.xlu0 %v2829_v53  ;;  %2852 = vadd.xlane.f32.xlu1 %v2828_v18  ;;  %v5044_v58 = vsub.f32 %v4971_v52, %v2800_v51  ;;  %p3907_p8 = por %p3906_p7, %p3905_p6 }
 0x356   :  { %v2782_v48 = vpop.xlane.xlu0 %2781  ;;  %v2784_v61 = vpop.xlane.xlu1 %2783 }
 0x357   :  { %v2801_v25 = vmul.f32 0.0078125, %v2782_v48  ;;  %v2802_v30 = vmul.f32 0.0078125, %v2784_v61  ;;  %v2831_v40 = vmul.f32 %v5039_v28, %v5039_v28  ;;  %v2832_v52 = vmul.f32 %v5044_v58, %v5044_v58  ;;  %p3908_p9 = pnand %p3907_p8, %p3901_p5 }
 0x359   :  { %v5049_v27 = vsub.f32 %v4976_v63, %v2801_v25  ;;  %2858 = vadd.xlane.f32.xlu0 %v2831_v40  ;;  %2856 = vadd.xlane.f32.xlu1 %v2830_v56  ;;  %v5052_v49 = vsub.f32 %v4978_v33, %v2802_v30 }
 0x35a   :  { %v2786_v59 = vpop.xlane.xlu0 %2785 }
 0x35b   :  { %v2803_v5 = vmul.f32 0.0078125, %v2786_v59  ;;  %v2833_v42 = vmul.f32 %v5049_v27, %v5049_v27  ;;  %v2834_v19 = vmul.f32 %v5052_v49, %v5052_v49 }
 0x35d   :  { %v5059_v60 = vsub.f32 %v4982_v34, %v2803_v5  ;;  %2862 = vadd.xlane.f32.xlu0 %v2833_v42  ;;  %2860 = vadd.xlane.f32.xlu1 %v2832_v52 }
 0x35f   :  { %v2835_v63 = vmul.f32 %v5059_v60, %v5059_v60 }
 0x361   :  { %2866 = vadd.xlane.f32.xlu0 %v2835_v63  ;;  %2864 = vadd.xlane.f32.xlu1 %v2834_v19 }
 0x3c8   :  { %v2839_v33 = vpop.xlane.xlu0 %2838 }
 0x3c9   :  { %v2869_v20 = vmul.f32 0.0078125, %v2839_v33 }
 0x3ca   :  { %v2837_v11 = vpop.xlane.xlu1 %2836 }
 0x3cb   :  { %v2885_v36 = vadd.f32 1e-05, %v2869_v20  ;;  %v2868_v37 = vmul.f32 0.0078125, %v2837_v11 }
 0x3cd   :  { %3847 = vrsqrt.f32 %v2885_v36  ;;  %v2884_v6 = vadd.f32 1e-05, %v2868_v37 }
 0x3ce   :  { %v2843_v43 = vpop.xlane.xlu0 %2842 }
 0x3cf   :  { %3849 = vrsqrt.f32 %v2884_v6  ;;  %v2871_v34 = vmul.f32 0.0078125, %v2843_v43 }
 0x3d1   :  { %v2887_v10 = vadd.f32 1e-05, %v2871_v34 }
 0x3d2   :  { %v2841_v1 = vpop.xlane.xlu1 %2840 }
 0x3d3   :  { %3851 = vrsqrt.f32 %v2887_v10  ;;  %v2870_v23 = vmul.f32 0.0078125, %v2841_v1 }
 0x3d5   :  { %v2886_v44 = vadd.f32 1e-05, %v2870_v23 }
 0x3d6   :  { %v2847_v17 = vpop.xlane.xlu0 %2846  ;;  %v2845_v24 = vpop.xlane.xlu1 %2844 }
 0x3d7   :  { %3853 = vrsqrt.f32 %v2886_v44  ;;  %v2873_v39 = vmul.f32 0.0078125, %v2847_v17  ;;  %v2872_v4 = vmul.f32 0.0078125, %v2845_v24 }
 0x3d9   :  { %v2889_v47 = vadd.f32 1e-05, %v2873_v39  ;;  %v2888_v45 = vadd.f32 1e-05, %v2872_v4 }
 0x3da   :  { %v3848_v41 = vpop.eup %3847  ;;  %v2851_v3 = vpop.xlane.xlu0 %2850 }
 0x3db   :  { %v2849_v12 = vpop.xlane.xlu1 %2848  ;;  %v2917_v0 = vmul.f32 %v3848_v41, %v4986_v21  ;;  %3855 = vrsqrt.f32 %v2889_v47  ;;  %v2875_v46 = vmul.f32 0.0078125, %v2851_v3 }
 0x3dc   :  { %v2874_v13 = vmul.f32 0.0078125, %v2849_v12  ;;  %v3850_v29 = vpop.eup %3849  ;;  %3857 = vrsqrt.f32 %v2888_v45 }
 0x3dd   :  { %v2940_v26 = vmul.f32 %v5068_v55, %v2917_v0  ;;  %v2916_v54 = vmul.f32 %v3850_v29, %v4989_v22  ;;  %v2891_v15 = vadd.f32 1e-05, %v2875_v46 }
 0x3de   :  { %v2890_v2 = vadd.f32 1e-05, %v2874_v13  ;;  %v2855_v50 = vpop.xlane.xlu0 %2854 }
 0x3df   :  { %v2853_v51 = vpop.xlane.xlu1 %2852  ;;  %v2963_v21 = vadd.f32 %v5074_v16, %v2940_v26  ;;  %v2939_v8 = vmul.f32 %v5068_v55, %v2916_v54  ;;  %3859 = vrsqrt.f32 %v2891_v15  ;;  %v2877_v53 = vmul.f32 0.0078125, %v2855_v50 }
 0x3e0   :  { %v3852_v18 = vpop.eup %3851  ;;  %3861 = vrsqrt.f32 %v2890_v2  ;;  %v2876_v48 = vmul.f32 0.0078125, %v2853_v51 }
 0x3e1   :  { %2979 = vst [vmem:[#allocation5 + $0x8] sm:$0xff] %v2963_v21  ;;  %v2962_v61 = vadd.f32 %v5074_v16, %v2939_v8  ;;  %v2919_v56 = vmul.f32 %v3852_v18, %v4996_v14  ;;  %v2893_v25 = vadd.f32 1e-05, %v2877_v53 }
 0x3e2   :  { %v2892_v22 = vadd.f32 1e-05, %v2876_v48  ;;  %v2859_v30 = vpop.xlane.xlu0 %2858 }
 0x3e3   :  { %v2857_v40 = vpop.xlane.xlu1 %2856  ;;  %2978 = vst [vmem:[#allocation5] sm:$0xff] %v2962_v61  ;;  %v2942_v59 = vmul.f32 %v5068_v55, %v2919_v56  ;;  %3863 = vrsqrt.f32 %v2893_v25  ;;  %v2879_v5 = vmul.f32 0.0078125, %v2859_v30 }
 0x3e4   :  { %v2878_v42 = vmul.f32 0.0078125, %v2857_v40  ;;  %v3854_v52 = vpop.eup %3853  ;;  %3865 = vrsqrt.f32 %v2892_v22 }
 0x3e5   :  { %v2965_v63 = vadd.f32 %v5074_v16, %v2942_v59  ;;  %v2918_v19 = vmul.f32 %v3854_v52, %v5001_v38  ;;  %v2895_v33 = vadd.f32 1e-05, %v2879_v5 }
 0x3e6   :  { %v2894_v20 = vadd.f32 1e-05, %v2878_v42  ;;  %v2863_v11 = vpop.xlane.xlu0 %2862 }
 0x3e7   :  { %v2861_v14 = vpop.xlane.xlu1 %2860  ;;  %2981 = vst [vmem:[#allocation5 + $0x18] sm:$0xff] %v2965_v63  ;;  %v2941_v36 = vmul.f32 %v5068_v55, %v2918_v19  ;;  %3867 = vrsqrt.f32 %v2895_v33  ;;  %v2881_v37 = vmul.f32 0.0078125, %v2863_v11 }
 0x3e8   :  { %v2880_v6 = vmul.f32 0.0078125, %v2861_v14  ;;  %v3856_v43 = vpop.eup %3855  ;;  %3869 = vrsqrt.f32 %v2894_v20 }
 0x3e9   :  { %v3858_v34 = vpop.eup %3857  ;;  %v2964_v10 = vadd.f32 %v5074_v16, %v2941_v36  ;;  %v2921_v1 = vmul.f32 %v3856_v43, %v5009_v9  ;;  %v2897_v23 = vadd.f32 1e-05, %v2881_v37 }
 0x3ea   :  { %v2896_v44 = vadd.f32 1e-05, %v2880_v6  ;;  %v2920_v38 = vmul.f32 %v3858_v34, %v5004_v57  ;;  %v2867_v17 = vpop.xlane.xlu0 %2866 }
 0x3eb   :  { %v2865_v24 = vpop.xlane.xlu1 %2864  ;;  %2980 = vst [vmem:[#allocation5 + $0x10] sm:$0xff] %v2964_v10  ;;  %v2944_v39 = vmul.f32 %v5068_v55, %v2921_v1  ;;  %3871 = vrsqrt.f32 %v2897_v23  ;;  %v2883_v4 = vmul.f32 0.0078125, %v2867_v17 }
 0x3ec   :  { %v2882_v47 = vmul.f32 0.0078125, %v2865_v24  ;;  %v3860_v45 = vpop.eup %3859  ;;  %v2943_v41 = vmul.f32 %v5068_v55, %v2920_v38  ;;  %3873 = vrsqrt.f32 %v2896_v44 }
 0x3ed   :  { %v3862_v3 = vpop.eup %3861  ;;  %v2967_v12 = vadd.f32 %v5074_v16, %v2944_v39  ;;  %v2923_v9 = vmul.f32 %v3860_v45, %v5019_v35  ;;  %v2899_v0 = vadd.f32 1e-05, %v2883_v4 }
 0x3ee   :  { %v2898_v46 = vadd.f32 1e-05, %v2882_v47  ;;  %v2966_v57 = vadd.f32 %v5074_v16, %v2943_v41  ;;  %v2922_v13 = vmul.f32 %v3862_v3, %v5012_v31 }
 0x3ef   :  { %2983 = vst [vmem:[#allocation5 + $0x28] sm:$0xff] %v2967_v12  ;;  %v2946_v29 = vmul.f32 %v5068_v55, %v2923_v9  ;;  %3875 = vrsqrt.f32 %v2899_v0 }
 0x3f0   :  { %v3864_v26 = vpop.eup %3863  ;;  %2982 = vst [vmem:[#allocation5 + $0x20] sm:$0xff] %v2966_v57  ;;  %v2945_v54 = vmul.f32 %v5068_v55, %v2922_v13  ;;  %3877 = vrsqrt.f32 %v2898_v46 }
 0x3f1   :  { %v3866_v15 = vpop.eup %3865  ;;  %v2969_v2 = vadd.f32 %v5074_v16, %v2946_v29  ;;  %v2925_v35 = vmul.f32 %v3864_v26, %v5029_v62 }
 0x3f2   :  { %v2968_v50 = vadd.f32 %v5074_v16, %v2945_v54  ;;  %v2924_v51 = vmul.f32 %v3866_v15, %v5024_v7 }
 0x3f3   :  { %2985 = vst [vmem:[#allocation5 + $0x38] sm:$0xff] %v2969_v2  ;;  %v2948_v31 = vmul.f32 %v5068_v55, %v2925_v35 }
 0x3f4   :  { %v3868_v21 = vpop.eup %3867  ;;  %2984 = vst [vmem:[#allocation5 + $0x30] sm:$0xff] %v2968_v50  ;;  %v2947_v8 = vmul.f32 %v5068_v55, %v2924_v51 }
 0x3f5   :  { %v3870_v53 = vpop.eup %3869  ;;  %v2971_v18 = vadd.f32 %v5074_v16, %v2948_v31  ;;  %v2927_v48 = vmul.f32 %v3868_v21, %v5039_v28 }
 0x3f6   :  { %v2970_v61 = vadd.f32 %v5074_v16, %v2947_v8  ;;  %v2926_v62 = vmul.f32 %v3870_v53, %v5032_v32 }
 0x3f7   :  { %2987 = vst [vmem:[#allocation5 + $0x48] sm:$0xff] %v2971_v18  ;;  %v2950_v56 = vmul.f32 %v5068_v55, %v2927_v48 }
 0x3f8   :  { %v3872_v7 = vpop.eup %3871  ;;  %2986 = vst [vmem:[#allocation5 + $0x40] sm:$0xff] %v2970_v61  ;;  %v2949_v25 = vmul.f32 %v5068_v55, %v2926_v62 }
 0x3f9   :  { %v3874_v22 = vpop.eup %3873  ;;  %v2973_v30 = vadd.f32 %v5074_v16, %v2950_v56  ;;  %v2929_v40 = vmul.f32 %v3872_v7, %v5049_v27 }
 0x3fa   :  { %v2972_v59 = vadd.f32 %v5074_v16, %v2949_v25  ;;  %v2928_v28 = vmul.f32 %v3874_v22, %v5044_v58 }
 0x3fb   :  { %2989 = vst [vmem:[#allocation5 + $0x58] sm:$0xff] %v2973_v30  ;;  %v2952_v5 = vmul.f32 %v5068_v55, %v2929_v40 }
 0x3fc   :  { %v3876_v32 = vpop.eup %3875  ;;  %2988 = vst [vmem:[#allocation5 + $0x50] sm:$0xff] %v2972_v59  ;;  %v2951_v42 = vmul.f32 %v5068_v55, %v2928_v28 }
 0x3fd   :  { %v3878_v52 = vpop.eup %3877  ;;  %v2975_v63 = vadd.f32 %v5074_v16, %v2952_v5  ;;  %v2931_v19 = vmul.f32 %v3876_v32, %v5059_v60 }
 0x3fe   :  { %v2974_v33 = vadd.f32 %v5074_v16, %v2951_v42  ;;  %v2930_v27 = vmul.f32 %v3878_v52, %v5052_v49 }
 0x3ff   :  { %2991 = vst [vmem:[#allocation5 + $0x68] sm:$0xff] %v2975_v63  ;;  %v2954_v20 = vmul.f32 %v5068_v55, %v2931_v19 }
 0x400   :  { %2990 = vst [vmem:[#allocation5 + $0x60] sm:$0xff] %v2974_v33  ;;  %v2953_v58 = vmul.f32 %v5068_v55, %v2930_v27 }
 0x401   :  { %v2977_v11 = vadd.f32 %v5074_v16, %v2954_v20 }
 0x402   :  { %v2976_v14 = vadd.f32 %v5074_v16, %v2953_v58 }
 0x403   :  { %2993 = vst [vmem:[#allocation5 + $0x78] sm:$0xff] %v2977_v11 }
 0x404   :  { %2992 = vst [vmem:[#allocation5 + $0x70] sm:$0xff] %v2976_v14 }
 0x405   :  { %3911 = shalt.err (!%p3908_p9)
}
 0x406   :  { %3005 = dma.vmem_to_hbm [thread:$0]  %s3000_s9, 2048, %s5139_s10, [#allocation4], %s3925_s16, %s3925_s16, %s3926_s17  }
 0x407   :  { %3922 = dma.done.wait [#allocation4], 2048  }
 0x408   :  { %3923 = vsyncadd [#allocation4], 4294965248 }
 0x409   :  { %3009 = vsyncpa [#allocation3], 1 }
 0x40a   :  { %3010 = vsyncpa [#allocation4], 1 }

</bundles_post_ra>
